<compile_context>
chip_gen: v7x
topology: tpu7x:2x2x1
jax: 0.10.0
libtpu: 0.0.40
codegen_flags: <defaults>
</compile_context>

<pallas_src>
import functools

import jax
import jax.numpy as jnp
import numpy as np
from jax.experimental import pallas as pl
from jax.experimental.pallas import tpu as pltpu


# -----------------------------------------------------------------------------
# Pallas kernel: full es_rnn forward (batch on lanes)
# -----------------------------------------------------------------------------
def es_rnn_kernel(series_ref,   # (T, B)     f32
                  seas0_ref,    # (slen, B)  f32   init_season rolled per batch, transposed
                  ag_ref,       # (2, 1)     f32   [alpha, gamma] (pre-sigmoid)
                  wih_ref,      # (3H, 1)    f32   GRU W_ih (input_size = 1)
                  whh_ref,      # (3H, H)    f32   GRU W_hh
                  bih_ref,      # (3H, 1)    f32
                  bhh_ref,      # (3H, 1)    f32
                  wlin_ref,     # (P, H)     f32   Linear weight
                  blin_ref,     # (P, 1)     f32
                  out_ref,      # (P, B)     f32
                  season_sc):   # (slen, B)  f32   VMEM scratch: first-cycle season values
    T, B = series_ref.shape
    slen = seas0_ref.shape[0]
    H = whh_ref.shape[1]
    P = wlin_ref.shape[0]

    # ---- hoisted scalars / broadcasts (not re-emitted inside the unrolled loop) ----
    sig_ag = jax.nn.sigmoid(ag_ref[...])                    # (2, 1)
    a = jnp.broadcast_to(sig_ag[0:1, :], (1, B))            # sigmoid(alpha)
    g = jnp.broadcast_to(sig_ag[1:2, :], (1, B))            # sigmoid(gamma)
    na = 1.0 - a
    ng = 1.0 - g

    wih_b = jnp.broadcast_to(wih_ref[...], (3 * H, B))      # (3H, B)
    bih_b = jnp.broadcast_to(bih_ref[...], (3 * H, B))      # (3H, B)
    bhh_b = jnp.broadcast_to(bhh_ref[...], (3 * H, B))      # (3H, B)
    whh = whh_ref[...]                                      # (3H, H)

    # seasonal state: slen live (1, B) rows (batch on lanes)
    seas = [seas0_ref[j:j + 1, :] for j in range(slen)]

    h = jnp.zeros((H, B), dtype=jnp.float32)
    smooth = series_ref[0:1, :]                             # (1, B)

    # ---- fused Holt-Winters + GRU recursion, single unrolled loop over T ----------
    for t in range(T):
        val = series_ref[t:t + 1, :]                        # (1, B) sublane row
        j = t % slen
        if t == 0:
            smooth = val
            season_t = seas[0]                              # un-updated init column
        else:
            smooth = a * (val - seas[j]) + na * smooth
            seas[j] = g * (val - smooth) + ng * seas[j]
            season_t = seas[j]
        if t < slen:
            # first-cycle seasonal value, needed later for season_forecast
            season_sc[t:t + 1, :] = season_t

        # de-seasonalize / de-level for this step and run the GRU step on it
        x = val - season_t - smooth                         # (1, B)
        gi = wih_b * x + bih_b                              # (3H, B) K=1 input proj (VPU)
        gh = jnp.dot(whh, h, preferred_element_type=jnp.float32) + bhh_b   # (3H, B)
        # gate slices along sublanes at 0/H/2H -> 8-aligned for H=16 (no lane relayout)
        r = jax.nn.sigmoid(gi[0:H] + gh[0:H])
        z = jax.nn.sigmoid(gi[H:2 * H] + gh[H:2 * H])
        n = jnp.tanh(gi[2 * H:3 * H] + r * gh[2 * H:3 * H])
        h = (1.0 - z) * n + z * h

    # ---- epilogue: Linear head + seasonal forecast + final combination ------------
    pred = jnp.dot(wlin_ref[...], h, preferred_element_type=jnp.float32) \
        + jnp.broadcast_to(blin_ref[...], (P, B))           # (P, B)

    season_first = season_sc[...]                           # (slen, B)
    if P <= slen:
        season_fc = season_first[0:P, :]                    # (P, B) single sublane slice
    else:
        reps = -(-P // slen)
        season_fc = jnp.concatenate([season_first] * reps, axis=0)[0:P, :]

    out_ref[...] = smooth + season_fc + pred                # smooth broadcasts over sublanes


# -----------------------------------------------------------------------------
# Wrapper: parameter plumbing + pallas_call
# -----------------------------------------------------------------------------
@functools.partial(jax.jit)
def es_rnn_forward(series, shifts, params):
    """series: (B, T) f32, shifts: (B,) int32. Returns (B, pred_len) f32."""
    B, T = series.shape
    slen = params["init_season"].shape[0]
    H = params["W_hh"].shape[1]
    P = params["W_lin"].shape[0]
    assert T >= slen, "season_forecast indexing requires series length >= slen"

    # per-batch roll of init_season (torch.roll: out[k] = in[(k - shift) % n])
    idx = (jnp.arange(slen)[None, :] - shifts[:, None]) % slen           # (B, slen)
    seas0 = params["init_season"][idx].astype(jnp.float32)               # (B, slen)

    series_tb = series.astype(jnp.float32).T                             # (T, B)
    seas0_sb = seas0.T                                                   # (slen, B)
    ag = jnp.stack([params["alpha"], params["gamma"]]).reshape(2, 1).astype(jnp.float32)
    wih = params["W_ih"].astype(jnp.float32)                             # (3H, 1)
    whh = params["W_hh"].astype(jnp.float32)                             # (3H, H)
    bih = params["b_ih"].reshape(-1, 1).astype(jnp.float32)              # (3H, 1)
    bhh = params["b_hh"].reshape(-1, 1).astype(jnp.float32)              # (3H, 1)
    wlin = params["W_lin"].astype(jnp.float32)                           # (P, H)
    blin = params["b_lin"].reshape(-1, 1).astype(jnp.float32)            # (P, 1)

    vmem = pl.BlockSpec(memory_space=pltpu.MemorySpace.VMEM)
    out_pb = pl.pallas_call(
        es_rnn_kernel,
        out_shape=jax.ShapeDtypeStruct((P, B), jnp.float32),
        in_specs=[vmem] * 9,
        out_specs=vmem,
        scratch_shapes=[pltpu.VMEM((slen, B), jnp.float32)],
    )(series_tb, seas0_sb, ag, wih, whh, bih, bhh, wlin, blin)
    return out_pb.T                                                      # (B, P)


# -----------------------------------------------------------------------------
# Pure-JAX reference (mirrors the PyTorch forward) for a correctness check
# -----------------------------------------------------------------------------
def es_rnn_reference(series, shifts, params):
    B, T = series.shape
    slen = params["init_season"].shape[0]
    H = params["W_hh"].shape[1]
    P = params["W_lin"].shape[0]

    idx = (jnp.arange(slen)[None, :] - shifts[:, None]) % slen
    seas = [params["init_season"][idx][:, j] for j in range(slen)]       # list of (B,)
    a = jax.nn.sigmoid(params["alpha"])
    g = jax.nn.sigmoid(params["gamma"])

    smooth = series[:, 0]
    vlist, slist = [smooth], [seas[0]]
    for i in range(1, T):
        j = i % slen
        val = series[:, i]
        smooth = a * (val - seas[j]) + (1.0 - a) * smooth
        seas[j] = g * (val - smooth) + (1.0 - g) * seas[j]
        vlist.append(smooth)
        slist.append(seas[j])
    smoothed_value = jnp.stack(vlist, axis=1)
    smoothed_season = jnp.stack(slist, axis=1)

    de_level = series - smoothed_season - smoothed_value
    h = jnp.zeros((B, H), jnp.float32)
    for t in range(T):
        x_t = de_level[:, t:t + 1]
        gi = x_t @ params["W_ih"].T + params["b_ih"]
        gh = h @ params["W_hh"].T + params["b_hh"]
        r = jax.nn.sigmoid(gi[:, :H] + gh[:, :H])
        z = jax.nn.sigmoid(gi[:, H:2 * H] + gh[:, H:2 * H])
        n = jnp.tanh(gi[:, 2 * H:] + r * gh[:, 2 * H:])
        h = (1.0 - z) * n + z * h
    pred = h @ params["W_lin"].T + params["b_lin"]
    season_forecast = jnp.stack([smoothed_season[:, i % slen] for i in range(P)], axis=1)
    return smoothed_value[:, -1:] + season_forecast + pred


if __name__ == "__main__":
    B, T = 4, 24             # batch, series length (T >= slen)
    H, slen, P = 16, 12, 12  # hidden_size, slen, pred_len (module defaults)

    key = jax.random.PRNGKey(0)
    ks = jax.random.split(key, 9)
    bound = 1.0 / np.sqrt(H)

    params = {
        "alpha": jnp.float32(0.1),
        "gamma": jnp.float32(0.1),
        "init_season": jax.random.uniform(ks[0], (slen,), jnp.float32, 0.0, 1.0),
        "W_ih": jax.random.uniform(ks[1], (3 * H, 1), jnp.float32, -bound, bound),
        "W_hh": jax.random.uniform(ks[2], (3 * H, H), jnp.float32, -bound, bound),
        "b_ih": jax.random.uniform(ks[3], (3 * H,), jnp.float32, -bound, bound),
        "b_hh": jax.random.uniform(ks[4], (3 * H,), jnp.float32, -bound, bound),
        "W_lin": jax.random.uniform(ks[5], (P, H), jnp.float32, -bound, bound),
        "b_lin": jax.random.uniform(ks[6], (P,), jnp.float32, -bound, bound),
    }

    series = jax.random.normal(ks[7], (B, T), jnp.float32)
    shifts = jnp.array([0, 3, 5, 2], dtype=jnp.int32)

    out = jax.block_until_ready(es_rnn_forward(series, shifts, params))
    ref = jax.block_until_ready(es_rnn_reference(series, shifts, params))

    assert out.shape == (B, P), out.shape
    np.testing.assert_allclose(np.asarray(out), np.asarray(ref), rtol=2e-3, atol=2e-3)
    print("KERNEL_OK")
</pallas_src>

<mosaic_0001>
module attributes {stable_mosaic.version = 11 : i64} {
  func.func @es_rnn_kernel(%arg0: memref<24x4xf32, #tpu.memory_space<vmem>>, %arg1: memref<12x4xf32, #tpu.memory_space<vmem>>, %arg2: memref<2x1xf32, #tpu.memory_space<vmem>>, %arg3: memref<48x1xf32, #tpu.memory_space<vmem>>, %arg4: memref<48x16xf32, #tpu.memory_space<vmem>>, %arg5: memref<48x1xf32, #tpu.memory_space<vmem>>, %arg6: memref<48x1xf32, #tpu.memory_space<vmem>>, %arg7: memref<12x16xf32, #tpu.memory_space<vmem>>, %arg8: memref<12x1xf32, #tpu.memory_space<vmem>>, %arg9: memref<12x4xf32, #tpu.memory_space<vmem>>, %arg10: memref<12x4xf32, #tpu.memory_space<vmem>>) attributes {dimension_semantics = [], scalar_prefetch = 0 : i64, scratch_operands = 1 : i64, tpu.core_type = #tpu.core_type<tc>} {
    %c0 = arith.constant 0 : index
    %c0_0 = arith.constant 0 : index
    %0 = vector.load %arg2[%c0, %c0_0] : memref<2x1xf32, #tpu.memory_space<vmem>>, vector<2x1xf32>
    %1 = arith.negf %0 : vector<2x1xf32>
    %2 = math.exp %1 : vector<2x1xf32>
    %cst = arith.constant 1.000000e+00 : f32
    %3 = vector.broadcast %cst : f32 to vector<2x1xf32>
    %4 = arith.addf %3, %2 : vector<2x1xf32>
    %5 = arith.divf %3, %4 : vector<2x1xf32>
    %6 = vector.extract_strided_slice %5 {offsets = [0, 0], sizes = [1, 1], strides = [1, 1]} : vector<2x1xf32> to vector<1x1xf32>
    %7 = vector.shape_cast %6 : vector<1x1xf32> to vector<1x1xf32>
    %8 = vector.broadcast %7 : vector<1x1xf32> to vector<1x4xf32>
    %9 = vector.extract_strided_slice %5 {offsets = [1, 0], sizes = [1, 1], strides = [1, 1]} : vector<2x1xf32> to vector<1x1xf32>
    %10 = vector.shape_cast %9 : vector<1x1xf32> to vector<1x1xf32>
    %11 = vector.broadcast %10 : vector<1x1xf32> to vector<1x4xf32>
    %cst_1 = arith.constant 1.000000e+00 : f32
    %12 = vector.broadcast %cst_1 : f32 to vector<1x4xf32>
    %13 = arith.subf %12, %8 : vector<1x4xf32>
    %cst_2 = arith.constant 1.000000e+00 : f32
    %14 = vector.broadcast %cst_2 : f32 to vector<1x4xf32>
    %15 = arith.subf %14, %11 : vector<1x4xf32>
    %c0_3 = arith.constant 0 : index
    %c0_4 = arith.constant 0 : index
    %16 = vector.load %arg3[%c0_3, %c0_4] : memref<48x1xf32, #tpu.memory_space<vmem>>, vector<48x1xf32>
    %17 = vector.shape_cast %16 : vector<48x1xf32> to vector<48x1xf32>
    %18 = vector.broadcast %17 : vector<48x1xf32> to vector<48x4xf32>
    %c0_5 = arith.constant 0 : index
    %c0_6 = arith.constant 0 : index
    %19 = vector.load %arg5[%c0_5, %c0_6] : memref<48x1xf32, #tpu.memory_space<vmem>>, vector<48x1xf32>
    %20 = vector.shape_cast %19 : vector<48x1xf32> to vector<48x1xf32>
    %21 = vector.broadcast %20 : vector<48x1xf32> to vector<48x4xf32>
    %c0_7 = arith.constant 0 : index
    %c0_8 = arith.constant 0 : index
    %22 = vector.load %arg6[%c0_7, %c0_8] : memref<48x1xf32, #tpu.memory_space<vmem>>, vector<48x1xf32>
    %23 = vector.shape_cast %22 : vector<48x1xf32> to vector<48x1xf32>
    %24 = vector.broadcast %23 : vector<48x1xf32> to vector<48x4xf32>
    %c0_9 = arith.constant 0 : index
    %c0_10 = arith.constant 0 : index
    %25 = vector.load %arg4[%c0_9, %c0_10] : memref<48x16xf32, #tpu.memory_space<vmem>>, vector<48x16xf32>
    %c0_11 = arith.constant 0 : index
    %c0_12 = arith.constant 0 : index
    %26 = vector.load %arg1[%c0_11, %c0_12] : memref<12x4xf32, #tpu.memory_space<vmem>>, vector<1x4xf32>
    %c1 = arith.constant 1 : index
    %c0_13 = arith.constant 0 : index
    %27 = vector.load %arg1[%c1, %c0_13] : memref<12x4xf32, #tpu.memory_space<vmem>>, vector<1x4xf32>
    %c2 = arith.constant 2 : index
    %c0_14 = arith.constant 0 : index
    %28 = vector.load %arg1[%c2, %c0_14] : memref<12x4xf32, #tpu.memory_space<vmem>>, vector<1x4xf32>
    %c3 = arith.constant 3 : index
    %c0_15 = arith.constant 0 : index
    %29 = vector.load %arg1[%c3, %c0_15] : memref<12x4xf32, #tpu.memory_space<vmem>>, vector<1x4xf32>
    %c4 = arith.constant 4 : index
    %c0_16 = arith.constant 0 : index
    %30 = vector.load %arg1[%c4, %c0_16] : memref<12x4xf32, #tpu.memory_space<vmem>>, vector<1x4xf32>
    %c5 = arith.constant 5 : index
    %c0_17 = arith.constant 0 : index
    %31 = vector.load %arg1[%c5, %c0_17] : memref<12x4xf32, #tpu.memory_space<vmem>>, vector<1x4xf32>
    %c6 = arith.constant 6 : index
    %c0_18 = arith.constant 0 : index
    %32 = vector.load %arg1[%c6, %c0_18] : memref<12x4xf32, #tpu.memory_space<vmem>>, vector<1x4xf32>
    %c7 = arith.constant 7 : index
    %c0_19 = arith.constant 0 : index
    %33 = vector.load %arg1[%c7, %c0_19] : memref<12x4xf32, #tpu.memory_space<vmem>>, vector<1x4xf32>
    %c8 = arith.constant 8 : index
    %c0_20 = arith.constant 0 : index
    %34 = vector.load %arg1[%c8, %c0_20] : memref<12x4xf32, #tpu.memory_space<vmem>>, vector<1x4xf32>
    %c9 = arith.constant 9 : index
    %c0_21 = arith.constant 0 : index
    %35 = vector.load %arg1[%c9, %c0_21] : memref<12x4xf32, #tpu.memory_space<vmem>>, vector<1x4xf32>
    %c10 = arith.constant 10 : index
    %c0_22 = arith.constant 0 : index
    %36 = vector.load %arg1[%c10, %c0_22] : memref<12x4xf32, #tpu.memory_space<vmem>>, vector<1x4xf32>
    %c11 = arith.constant 11 : index
    %c0_23 = arith.constant 0 : index
    %37 = vector.load %arg1[%c11, %c0_23] : memref<12x4xf32, #tpu.memory_space<vmem>>, vector<1x4xf32>
    %cst_24 = arith.constant 0.000000e+00 : f32
    %38 = vector.broadcast %cst_24 : f32 to vector<16x4xf32>
    %c0_25 = arith.constant 0 : index
    %c0_26 = arith.constant 0 : index
    %39 = vector.load %arg0[%c0_25, %c0_26] : memref<24x4xf32, #tpu.memory_space<vmem>>, vector<1x4xf32>
    %c0_27 = arith.constant 0 : index
    %c0_28 = arith.constant 0 : index
    %40 = vector.load %arg10[%c0_27, %c0_28] : memref<12x4xf32, #tpu.memory_space<vmem>>, vector<1x4xf32>
    tpu.vector_store %arg10[%c0_27, %c0_28], %26 {strides = array<i32>} : memref<12x4xf32, #tpu.memory_space<vmem>>, vector<1x4xf32>,
    %41 = arith.subf %39, %26 : vector<1x4xf32>
    %42 = arith.subf %41, %39 : vector<1x4xf32>
    %43 = vector.broadcast %42 : vector<1x4xf32> to vector<48x4xf32>
    %44 = arith.mulf %18, %43 : vector<48x4xf32>
    %45 = arith.addf %44, %21 : vector<48x4xf32>
    %cst_29 = arith.constant dense<0.000000e+00> : vector<48x4xf32>
    %46 = tpu.matmul %25, %38, %cst_29 {dimension_numbers = #tpu.dot_dimension_numbers<[1], [0], [0], [1], [0, 0, 1, 1], [], []>} : vector<48x16xf32>, vector<16x4xf32>, vector<48x4xf32> -> vector<48x4xf32>
    %47 = arith.addf %46, %24 : vector<48x4xf32>
    %48 = vector.extract_strided_slice %45 {offsets = [0, 0], sizes = [16, 4], strides = [1, 1]} : vector<48x4xf32> to vector<16x4xf32>
    %49 = vector.extract_strided_slice %47 {offsets = [0, 0], sizes = [16, 4], strides = [1, 1]} : vector<48x4xf32> to vector<16x4xf32>
    %50 = arith.addf %48, %49 : vector<16x4xf32>
    %51 = arith.negf %50 : vector<16x4xf32>
    %52 = math.exp %51 : vector<16x4xf32>
    %cst_30 = arith.constant 1.000000e+00 : f32
    %53 = vector.broadcast %cst_30 : f32 to vector<16x4xf32>
    %54 = arith.addf %53, %52 : vector<16x4xf32>
    %55 = arith.divf %53, %54 : vector<16x4xf32>
    %56 = vector.extract_strided_slice %45 {offsets = [16, 0], sizes = [16, 4], strides = [1, 1]} : vector<48x4xf32> to vector<16x4xf32>
    %57 = vector.extract_strided_slice %47 {offsets = [16, 0], sizes = [16, 4], strides = [1, 1]} : vector<48x4xf32> to vector<16x4xf32>
    %58 = arith.addf %56, %57 : vector<16x4xf32>
    %59 = arith.negf %58 : vector<16x4xf32>
    %60 = math.exp %59 : vector<16x4xf32>
    %cst_31 = arith.constant 1.000000e+00 : f32
    %61 = vector.broadcast %cst_31 : f32 to vector<16x4xf32>
    %62 = arith.addf %61, %60 : vector<16x4xf32>
    %63 = arith.divf %61, %62 : vector<16x4xf32>
    %64 = vector.extract_strided_slice %45 {offsets = [32, 0], sizes = [16, 4], strides = [1, 1]} : vector<48x4xf32> to vector<16x4xf32>
    %65 = vector.extract_strided_slice %47 {offsets = [32, 0], sizes = [16, 4], strides = [1, 1]} : vector<48x4xf32> to vector<16x4xf32>
    %66 = arith.mulf %55, %65 : vector<16x4xf32>
    %67 = arith.addf %64, %66 : vector<16x4xf32>
    %68 = math.tanh %67 : vector<16x4xf32>
    %cst_32 = arith.constant 1.000000e+00 : f32
    %69 = vector.broadcast %cst_32 : f32 to vector<16x4xf32>
    %70 = arith.subf %69, %63 : vector<16x4xf32>
    %71 = arith.mulf %70, %68 : vector<16x4xf32>
    %72 = arith.mulf %63, %38 : vector<16x4xf32>
    %73 = arith.addf %71, %72 : vector<16x4xf32>
    %c1_33 = arith.constant 1 : index
    %c0_34 = arith.constant 0 : index
    %74 = vector.load %arg0[%c1_33, %c0_34] : memref<24x4xf32, #tpu.memory_space<vmem>>, vector<1x4xf32>
    %75 = arith.subf %74, %27 : vector<1x4xf32>
    %76 = arith.mulf %8, %75 : vector<1x4xf32>
    %77 = arith.mulf %13, %39 : vector<1x4xf32>
    %78 = arith.addf %76, %77 : vector<1x4xf32>
    %79 = arith.subf %74, %78 : vector<1x4xf32>
    %80 = arith.mulf %11, %79 : vector<1x4xf32>
    %81 = arith.mulf %15, %27 : vector<1x4xf32>
    %82 = arith.addf %80, %81 : vector<1x4xf32>
    %c1_35 = arith.constant 1 : index
    %c0_36 = arith.constant 0 : index
    %83 = vector.load %arg10[%c1_35, %c0_36] : memref<12x4xf32, #tpu.memory_space<vmem>>, vector<1x4xf32>
    tpu.vector_store %arg10[%c1_35, %c0_36], %82 {strides = array<i32>} : memref<12x4xf32, #tpu.memory_space<vmem>>, vector<1x4xf32>,
    %84 = arith.subf %74, %82 : vector<1x4xf32>
    %85 = arith.subf %84, %78 : vector<1x4xf32>
    %86 = vector.broadcast %85 : vector<1x4xf32> to vector<48x4xf32>
    %87 = arith.mulf %18, %86 : vector<48x4xf32>
    %88 = arith.addf %87, %21 : vector<48x4xf32>
    %cst_37 = arith.constant dense<0.000000e+00> : vector<48x4xf32>
    %89 = tpu.matmul %25, %73, %cst_37 {dimension_numbers = #tpu.dot_dimension_numbers<[1], [0], [0], [1], [0, 0, 1, 1], [], []>} : vector<48x16xf32>, vector<16x4xf32>, vector<48x4xf32> -> vector<48x4xf32>
    %90 = arith.addf %89, %24 : vector<48x4xf32>
    %91 = vector.extract_strided_slice %88 {offsets = [0, 0], sizes = [16, 4], strides = [1, 1]} : vector<48x4xf32> to vector<16x4xf32>
    %92 = vector.extract_strided_slice %90 {offsets = [0, 0], sizes = [16, 4], strides = [1, 1]} : vector<48x4xf32> to vector<16x4xf32>
    %93 = arith.addf %91, %92 : vector<16x4xf32>
    %94 = arith.negf %93 : vector<16x4xf32>
    %95 = math.exp %94 : vector<16x4xf32>
    %cst_38 = arith.constant 1.000000e+00 : f32
    %96 = vector.broadcast %cst_38 : f32 to vector<16x4xf32>
    %97 = arith.addf %96, %95 : vector<16x4xf32>
    %98 = arith.divf %96, %97 : vector<16x4xf32>
    %99 = vector.extract_strided_slice %88 {offsets = [16, 0], sizes = [16, 4], strides = [1, 1]} : vector<48x4xf32> to vector<16x4xf32>
    %100 = vector.extract_strided_slice %90 {offsets = [16, 0], sizes = [16, 4], strides = [1, 1]} : vector<48x4xf32> to vector<16x4xf32>
    %101 = arith.addf %99, %100 : vector<16x4xf32>
    %102 = arith.negf %101 : vector<16x4xf32>
    %103 = math.exp %102 : vector<16x4xf32>
    %cst_39 = arith.constant 1.000000e+00 : f32
    %104 = vector.broadcast %cst_39 : f32 to vector<16x4xf32>
    %105 = arith.addf %104, %103 : vector<16x4xf32>
    %106 = arith.divf %104, %105 : vector<16x4xf32>
    %107 = vector.extract_strided_slice %88 {offsets = [32, 0], sizes = [16, 4], strides = [1, 1]} : vector<48x4xf32> to vector<16x4xf32>
    %108 = vector.extract_strided_slice %90 {offsets = [32, 0], sizes = [16, 4], strides = [1, 1]} : vector<48x4xf32> to vector<16x4xf32>
    %109 = arith.mulf %98, %108 : vector<16x4xf32>
    %110 = arith.addf %107, %109 : vector<16x4xf32>
    %111 = math.tanh %110 : vector<16x4xf32>
    %cst_40 = arith.constant 1.000000e+00 : f32
    %112 = vector.broadcast %cst_40 : f32 to vector<16x4xf32>
    %113 = arith.subf %112, %106 : vector<16x4xf32>
    %114 = arith.mulf %113, %111 : vector<16x4xf32>
    %115 = arith.mulf %106, %73 : vector<16x4xf32>
    %116 = arith.addf %114, %115 : vector<16x4xf32>
    %c2_41 = arith.constant 2 : index
    %c0_42 = arith.constant 0 : index
    %117 = vector.load %arg0[%c2_41, %c0_42] : memref<24x4xf32, #tpu.memory_space<vmem>>, vector<1x4xf32>
    %118 = arith.subf %117, %28 : vector<1x4xf32>
    %119 = arith.mulf %8, %118 : vector<1x4xf32>
    %120 = arith.mulf %13, %78 : vector<1x4xf32>
    %121 = arith.addf %119, %120 : vector<1x4xf32>
    %122 = arith.subf %117, %121 : vector<1x4xf32>
    %123 = arith.mulf %11, %122 : vector<1x4xf32>
    %124 = arith.mulf %15, %28 : vector<1x4xf32>
    %125 = arith.addf %123, %124 : vector<1x4xf32>
    %c2_43 = arith.constant 2 : index
    %c0_44 = arith.constant 0 : index
    %126 = vector.load %arg10[%c2_43, %c0_44] : memref<12x4xf32, #tpu.memory_space<vmem>>, vector<1x4xf32>
    tpu.vector_store %arg10[%c2_43, %c0_44], %125 {strides = array<i32>} : memref<12x4xf32, #tpu.memory_space<vmem>>, vector<1x4xf32>,
    %127 = arith.subf %117, %125 : vector<1x4xf32>
    %128 = arith.subf %127, %121 : vector<1x4xf32>
    %129 = vector.broadcast %128 : vector<1x4xf32> to vector<48x4xf32>
    %130 = arith.mulf %18, %129 : vector<48x4xf32>
    %131 = arith.addf %130, %21 : vector<48x4xf32>
    %cst_45 = arith.constant dense<0.000000e+00> : vector<48x4xf32>
    %132 = tpu.matmul %25, %116, %cst_45 {dimension_numbers = #tpu.dot_dimension_numbers<[1], [0], [0], [1], [0, 0, 1, 1], [], []>} : vector<48x16xf32>, vector<16x4xf32>, vector<48x4xf32> -> vector<48x4xf32>
    %133 = arith.addf %132, %24 : vector<48x4xf32>
    %134 = vector.extract_strided_slice %131 {offsets = [0, 0], sizes = [16, 4], strides = [1, 1]} : vector<48x4xf32> to vector<16x4xf32>
    %135 = vector.extract_strided_slice %133 {offsets = [0, 0], sizes = [16, 4], strides = [1, 1]} : vector<48x4xf32> to vector<16x4xf32>
    %136 = arith.addf %134, %135 : vector<16x4xf32>
    %137 = arith.negf %136 : vector<16x4xf32>
    %138 = math.exp %137 : vector<16x4xf32>
    %cst_46 = arith.constant 1.000000e+00 : f32
    %139 = vector.broadcast %cst_46 : f32 to vector<16x4xf32>
    %140 = arith.addf %139, %138 : vector<16x4xf32>
    %141 = arith.divf %139, %140 : vector<16x4xf32>
    %142 = vector.extract_strided_slice %131 {offsets = [16, 0], sizes = [16, 4], strides = [1, 1]} : vector<48x4xf32> to vector<16x4xf32>
    %143 = vector.extract_strided_slice %133 {offsets = [16, 0], sizes = [16, 4], strides = [1, 1]} : vector<48x4xf32> to vector<16x4xf32>
    %144 = arith.addf %142, %143 : vector<16x4xf32>
    %145 = arith.negf %144 : vector<16x4xf32>
    %146 = math.exp %145 : vector<16x4xf32>
    %cst_47 = arith.constant 1.000000e+00 : f32
    %147 = vector.broadcast %cst_47 : f32 to vector<16x4xf32>
    %148 = arith.addf %147, %146 : vector<16x4xf32>
    %149 = arith.divf %147, %148 : vector<16x4xf32>
    %150 = vector.extract_strided_slice %131 {offsets = [32, 0], sizes = [16, 4], strides = [1, 1]} : vector<48x4xf32> to vector<16x4xf32>
    %151 = vector.extract_strided_slice %133 {offsets = [32, 0], sizes = [16, 4], strides = [1, 1]} : vector<48x4xf32> to vector<16x4xf32>
    %152 = arith.mulf %141, %151 : vector<16x4xf32>
    %153 = arith.addf %150, %152 : vector<16x4xf32>
    %154 = math.tanh %153 : vector<16x4xf32>
    %cst_48 = arith.constant 1.000000e+00 : f32
    %155 = vector.broadcast %cst_48 : f32 to vector<16x4xf32>
    %156 = arith.subf %155, %149 : vector<16x4xf32>
    %157 = arith.mulf %156, %154 : vector<16x4xf32>
    %158 = arith.mulf %149, %116 : vector<16x4xf32>
    %159 = arith.addf %157, %158 : vector<16x4xf32>
    %c3_49 = arith.constant 3 : index
    %c0_50 = arith.constant 0 : index
    %160 = vector.load %arg0[%c3_49, %c0_50] : memref<24x4xf32, #tpu.memory_space<vmem>>, vector<1x4xf32>
    %161 = arith.subf %160, %29 : vector<1x4xf32>
    %162 = arith.mulf %8, %161 : vector<1x4xf32>
    %163 = arith.mulf %13, %121 : vector<1x4xf32>
    %164 = arith.addf %162, %163 : vector<1x4xf32>
    %165 = arith.subf %160, %164 : vector<1x4xf32>
    %166 = arith.mulf %11, %165 : vector<1x4xf32>
    %167 = arith.mulf %15, %29 : vector<1x4xf32>
    %168 = arith.addf %166, %167 : vector<1x4xf32>
    %c3_51 = arith.constant 3 : index
    %c0_52 = arith.constant 0 : index
    %169 = vector.load %arg10[%c3_51, %c0_52] : memref<12x4xf32, #tpu.memory_space<vmem>>, vector<1x4xf32>
    tpu.vector_store %arg10[%c3_51, %c0_52], %168 {strides = array<i32>} : memref<12x4xf32, #tpu.memory_space<vmem>>, vector<1x4xf32>,
    %170 = arith.subf %160, %168 : vector<1x4xf32>
    %171 = arith.subf %170, %164 : vector<1x4xf32>
    %172 = vector.broadcast %171 : vector<1x4xf32> to vector<48x4xf32>
    %173 = arith.mulf %18, %172 : vector<48x4xf32>
    %174 = arith.addf %173, %21 : vector<48x4xf32>
    %cst_53 = arith.constant dense<0.000000e+00> : vector<48x4xf32>
    %175 = tpu.matmul %25, %159, %cst_53 {dimension_numbers = #tpu.dot_dimension_numbers<[1], [0], [0], [1], [0, 0, 1, 1], [], []>} : vector<48x16xf32>, vector<16x4xf32>, vector<48x4xf32> -> vector<48x4xf32>
    %176 = arith.addf %175, %24 : vector<48x4xf32>
    %177 = vector.extract_strided_slice %174 {offsets = [0, 0], sizes = [16, 4], strides = [1, 1]} : vector<48x4xf32> to vector<16x4xf32>
    %178 = vector.extract_strided_slice %176 {offsets = [0, 0], sizes = [16, 4], strides = [1, 1]} : vector<48x4xf32> to vector<16x4xf32>
    %179 = arith.addf %177, %178 : vector<16x4xf32>
    %180 = arith.negf %179 : vector<16x4xf32>
    %181 = math.exp %180 : vector<16x4xf32>
    %cst_54 = arith.constant 1.000000e+00 : f32
    %182 = vector.broadcast %cst_54 : f32 to vector<16x4xf32>
    %183 = arith.addf %182, %181 : vector<16x4xf32>
    %184 = arith.divf %182, %183 : vector<16x4xf32>
    %185 = vector.extract_strided_slice %174 {offsets = [16, 0], sizes = [16, 4], strides = [1, 1]} : vector<48x4xf32> to vector<16x4xf32>
    %186 = vector.extract_strided_slice %176 {offsets = [16, 0], sizes = [16, 4], strides = [1, 1]} : vector<48x4xf32> to vector<16x4xf32>
    %187 = arith.addf %185, %186 : vector<16x4xf32>
    %188 = arith.negf %187 : vector<16x4xf32>
    %189 = math.exp %188 : vector<16x4xf32>
    %cst_55 = arith.constant 1.000000e+00 : f32
    %190 = vector.broadcast %cst_55 : f32 to vector<16x4xf32>
    %191 = arith.addf %190, %189 : vector<16x4xf32>
    %192 = arith.divf %190, %191 : vector<16x4xf32>
    %193 = vector.extract_strided_slice %174 {offsets = [32, 0], sizes = [16, 4], strides = [1, 1]} : vector<48x4xf32> to vector<16x4xf32>
    %194 = vector.extract_strided_slice %176 {offsets = [32, 0], sizes = [16, 4], strides = [1, 1]} : vector<48x4xf32> to vector<16x4xf32>
    %195 = arith.mulf %184, %194 : vector<16x4xf32>
    %196 = arith.addf %193, %195 : vector<16x4xf32>
    %197 = math.tanh %196 : vector<16x4xf32>
    %cst_56 = arith.constant 1.000000e+00 : f32
    %198 = vector.broadcast %cst_56 : f32 to vector<16x4xf32>
    %199 = arith.subf %198, %192 : vector<16x4xf32>
    %200 = arith.mulf %199, %197 : vector<16x4xf32>
    %201 = arith.mulf %192, %159 : vector<16x4xf32>
    %202 = arith.addf %200, %201 : vector<16x4xf32>
    %c4_57 = arith.constant 4 : index
    %c0_58 = arith.constant 0 : index
    %203 = vector.load %arg0[%c4_57, %c0_58] : memref<24x4xf32, #tpu.memory_space<vmem>>, vector<1x4xf32>
    %204 = arith.subf %203, %30 : vector<1x4xf32>
    %205 = arith.mulf %8, %204 : vector<1x4xf32>
    %206 = arith.mulf %13, %164 : vector<1x4xf32>
    %207 = arith.addf %205, %206 : vector<1x4xf32>
    %208 = arith.subf %203, %207 : vector<1x4xf32>
    %209 = arith.mulf %11, %208 : vector<1x4xf32>
    %210 = arith.mulf %15, %30 : vector<1x4xf32>
    %211 = arith.addf %209, %210 : vector<1x4xf32>
    %c4_59 = arith.constant 4 : index
    %c0_60 = arith.constant 0 : index
    %212 = vector.load %arg10[%c4_59, %c0_60] : memref<12x4xf32, #tpu.memory_space<vmem>>, vector<1x4xf32>
    tpu.vector_store %arg10[%c4_59, %c0_60], %211 {strides = array<i32>} : memref<12x4xf32, #tpu.memory_space<vmem>>, vector<1x4xf32>,
    %213 = arith.subf %203, %211 : vector<1x4xf32>
    %214 = arith.subf %213, %207 : vector<1x4xf32>
    %215 = vector.broadcast %214 : vector<1x4xf32> to vector<48x4xf32>
    %216 = arith.mulf %18, %215 : vector<48x4xf32>
    %217 = arith.addf %216, %21 : vector<48x4xf32>
    %cst_61 = arith.constant dense<0.000000e+00> : vector<48x4xf32>
    %218 = tpu.matmul %25, %202, %cst_61 {dimension_numbers = #tpu.dot_dimension_numbers<[1], [0], [0], [1], [0, 0, 1, 1], [], []>} : vector<48x16xf32>, vector<16x4xf32>, vector<48x4xf32> -> vector<48x4xf32>
    %219 = arith.addf %218, %24 : vector<48x4xf32>
    %220 = vector.extract_strided_slice %217 {offsets = [0, 0], sizes = [16, 4], strides = [1, 1]} : vector<48x4xf32> to vector<16x4xf32>
    %221 = vector.extract_strided_slice %219 {offsets = [0, 0], sizes = [16, 4], strides = [1, 1]} : vector<48x4xf32> to vector<16x4xf32>
    %222 = arith.addf %220, %221 : vector<16x4xf32>
    %223 = arith.negf %222 : vector<16x4xf32>
    %224 = math.exp %223 : vector<16x4xf32>
    %cst_62 = arith.constant 1.000000e+00 : f32
    %225 = vector.broadcast %cst_62 : f32 to vector<16x4xf32>
    %226 = arith.addf %225, %224 : vector<16x4xf32>
    %227 = arith.divf %225, %226 : vector<16x4xf32>
    %228 = vector.extract_strided_slice %217 {offsets = [16, 0], sizes = [16, 4], strides = [1, 1]} : vector<48x4xf32> to vector<16x4xf32>
    %229 = vector.extract_strided_slice %219 {offsets = [16, 0], sizes = [16, 4], strides = [1, 1]} : vector<48x4xf32> to vector<16x4xf32>
    %230 = arith.addf %228, %229 : vector<16x4xf32>
    %231 = arith.negf %230 : vector<16x4xf32>
    %232 = math.exp %231 : vector<16x4xf32>
    %cst_63 = arith.constant 1.000000e+00 : f32
    %233 = vector.broadcast %cst_63 : f32 to vector<16x4xf32>
    %234 = arith.addf %233, %232 : vector<16x4xf32>
    %235 = arith.divf %233, %234 : vector<16x4xf32>
    %236 = vector.extract_strided_slice %217 {offsets = [32, 0], sizes = [16, 4], strides = [1, 1]} : vector<48x4xf32> to vector<16x4xf32>
    %237 = vector.extract_strided_slice %219 {offsets = [32, 0], sizes = [16, 4], strides = [1, 1]} : vector<48x4xf32> to vector<16x4xf32>
    %238 = arith.mulf %227, %237 : vector<16x4xf32>
    %239 = arith.addf %236, %238 : vector<16x4xf32>
    %240 = math.tanh %239 : vector<16x4xf32>
    %cst_64 = arith.constant 1.000000e+00 : f32
    %241 = vector.broadcast %cst_64 : f32 to vector<16x4xf32>
    %242 = arith.subf %241, %235 : vector<16x4xf32>
    %243 = arith.mulf %242, %240 : vector<16x4xf32>
    %244 = arith.mulf %235, %202 : vector<16x4xf32>
    %245 = arith.addf %243, %244 : vector<16x4xf32>
    %c5_65 = arith.constant 5 : index
    %c0_66 = arith.constant 0 : index
    %246 = vector.load %arg0[%c5_65, %c0_66] : memref<24x4xf32, #tpu.memory_space<vmem>>, vector<1x4xf32>
    %247 = arith.subf %246, %31 : vector<1x4xf32>
    %248 = arith.mulf %8, %247 : vector<1x4xf32>
    %249 = arith.mulf %13, %207 : vector<1x4xf32>
    %250 = arith.addf %248, %249 : vector<1x4xf32>
    %251 = arith.subf %246, %250 : vector<1x4xf32>
    %252 = arith.mulf %11, %251 : vector<1x4xf32>
    %253 = arith.mulf %15, %31 : vector<1x4xf32>
    %254 = arith.addf %252, %253 : vector<1x4xf32>
    %c5_67 = arith.constant 5 : index
    %c0_68 = arith.constant 0 : index
    %255 = vector.load %arg10[%c5_67, %c0_68] : memref<12x4xf32, #tpu.memory_space<vmem>>, vector<1x4xf32>
    tpu.vector_store %arg10[%c5_67, %c0_68], %254 {strides = array<i32>} : memref<12x4xf32, #tpu.memory_space<vmem>>, vector<1x4xf32>,
    %256 = arith.subf %246, %254 : vector<1x4xf32>
    %257 = arith.subf %256, %250 : vector<1x4xf32>
    %258 = vector.broadcast %257 : vector<1x4xf32> to vector<48x4xf32>
    %259 = arith.mulf %18, %258 : vector<48x4xf32>
    %260 = arith.addf %259, %21 : vector<48x4xf32>
    %cst_69 = arith.constant dense<0.000000e+00> : vector<48x4xf32>
    %261 = tpu.matmul %25, %245, %cst_69 {dimension_numbers = #tpu.dot_dimension_numbers<[1], [0], [0], [1], [0, 0, 1, 1], [], []>} : vector<48x16xf32>, vector<16x4xf32>, vector<48x4xf32> -> vector<48x4xf32>
    %262 = arith.addf %261, %24 : vector<48x4xf32>
    %263 = vector.extract_strided_slice %260 {offsets = [0, 0], sizes = [16, 4], strides = [1, 1]} : vector<48x4xf32> to vector<16x4xf32>
    %264 = vector.extract_strided_slice %262 {offsets = [0, 0], sizes = [16, 4], strides = [1, 1]} : vector<48x4xf32> to vector<16x4xf32>
    %265 = arith.addf %263, %264 : vector<16x4xf32>
    %266 = arith.negf %265 : vector<16x4xf32>
    %267 = math.exp %266 : vector<16x4xf32>
    %cst_70 = arith.constant 1.000000e+00 : f32
    %268 = vector.broadcast %cst_70 : f32 to vector<16x4xf32>
    %269 = arith.addf %268, %267 : vector<16x4xf32>
    %270 = arith.divf %268, %269 : vector<16x4xf32>
    %271 = vector.extract_strided_slice %260 {offsets = [16, 0], sizes = [16, 4], strides = [1, 1]} : vector<48x4xf32> to vector<16x4xf32>
    %272 = vector.extract_strided_slice %262 {offsets = [16, 0], sizes = [16, 4], strides = [1, 1]} : vector<48x4xf32> to vector<16x4xf32>
    %273 = arith.addf %271, %272 : vector<16x4xf32>
    %274 = arith.negf %273 : vector<16x4xf32>
    %275 = math.exp %274 : vector<16x4xf32>
    %cst_71 = arith.constant 1.000000e+00 : f32
    %276 = vector.broadcast %cst_71 : f32 to vector<16x4xf32>
    %277 = arith.addf %276, %275 : vector<16x4xf32>
    %278 = arith.divf %276, %277 : vector<16x4xf32>
    %279 = vector.extract_strided_slice %260 {offsets = [32, 0], sizes = [16, 4], strides = [1, 1]} : vector<48x4xf32> to vector<16x4xf32>
    %280 = vector.extract_strided_slice %262 {offsets = [32, 0], sizes = [16, 4], strides = [1, 1]} : vector<48x4xf32> to vector<16x4xf32>
    %281 = arith.mulf %270, %280 : vector<16x4xf32>
    %282 = arith.addf %279, %281 : vector<16x4xf32>
    %283 = math.tanh %282 : vector<16x4xf32>
    %cst_72 = arith.constant 1.000000e+00 : f32
    %284 = vector.broadcast %cst_72 : f32 to vector<16x4xf32>
    %285 = arith.subf %284, %278 : vector<16x4xf32>
    %286 = arith.mulf %285, %283 : vector<16x4xf32>
    %287 = arith.mulf %278, %245 : vector<16x4xf32>
    %288 = arith.addf %286, %287 : vector<16x4xf32>
    %c6_73 = arith.constant 6 : index
    %c0_74 = arith.constant 0 : index
    %289 = vector.load %arg0[%c6_73, %c0_74] : memref<24x4xf32, #tpu.memory_space<vmem>>, vector<1x4xf32>
    %290 = arith.subf %289, %32 : vector<1x4xf32>
    %291 = arith.mulf %8, %290 : vector<1x4xf32>
    %292 = arith.mulf %13, %250 : vector<1x4xf32>
    %293 = arith.addf %291, %292 : vector<1x4xf32>
    %294 = arith.subf %289, %293 : vector<1x4xf32>
    %295 = arith.mulf %11, %294 : vector<1x4xf32>
    %296 = arith.mulf %15, %32 : vector<1x4xf32>
    %297 = arith.addf %295, %296 : vector<1x4xf32>
    %c6_75 = arith.constant 6 : index
    %c0_76 = arith.constant 0 : index
    %298 = vector.load %arg10[%c6_75, %c0_76] : memref<12x4xf32, #tpu.memory_space<vmem>>, vector<1x4xf32>
    tpu.vector_store %arg10[%c6_75, %c0_76], %297 {strides = array<i32>} : memref<12x4xf32, #tpu.memory_space<vmem>>, vector<1x4xf32>,
    %299 = arith.subf %289, %297 : vector<1x4xf32>
    %300 = arith.subf %299, %293 : vector<1x4xf32>
    %301 = vector.broadcast %300 : vector<1x4xf32> to vector<48x4xf32>
    %302 = arith.mulf %18, %301 : vector<48x4xf32>
    %303 = arith.addf %302, %21 : vector<48x4xf32>
    %cst_77 = arith.constant dense<0.000000e+00> : vector<48x4xf32>
    %304 = tpu.matmul %25, %288, %cst_77 {dimension_numbers = #tpu.dot_dimension_numbers<[1], [0], [0], [1], [0, 0, 1, 1], [], []>} : vector<48x16xf32>, vector<16x4xf32>, vector<48x4xf32> -> vector<48x4xf32>
    %305 = arith.addf %304, %24 : vector<48x4xf32>
    %306 = vector.extract_strided_slice %303 {offsets = [0, 0], sizes = [16, 4], strides = [1, 1]} : vector<48x4xf32> to vector<16x4xf32>
    %307 = vector.extract_strided_slice %305 {offsets = [0, 0], sizes = [16, 4], strides = [1, 1]} : vector<48x4xf32> to vector<16x4xf32>
    %308 = arith.addf %306, %307 : vector<16x4xf32>
    %309 = arith.negf %308 : vector<16x4xf32>
    %310 = math.exp %309 : vector<16x4xf32>
    %cst_78 = arith.constant 1.000000e+00 : f32
    %311 = vector.broadcast %cst_78 : f32 to vector<16x4xf32>
    %312 = arith.addf %311, %310 : vector<16x4xf32>
    %313 = arith.divf %311, %312 : vector<16x4xf32>
    %314 = vector.extract_strided_slice %303 {offsets = [16, 0], sizes = [16, 4], strides = [1, 1]} : vector<48x4xf32> to vector<16x4xf32>
    %315 = vector.extract_strided_slice %305 {offsets = [16, 0], sizes = [16, 4], strides = [1, 1]} : vector<48x4xf32> to vector<16x4xf32>
    %316 = arith.addf %314, %315 : vector<16x4xf32>
    %317 = arith.negf %316 : vector<16x4xf32>
    %318 = math.exp %317 : vector<16x4xf32>
    %cst_79 = arith.constant 1.000000e+00 : f32
    %319 = vector.broadcast %cst_79 : f32 to vector<16x4xf32>
    %320 = arith.addf %319, %318 : vector<16x4xf32>
    %321 = arith.divf %319, %320 : vector<16x4xf32>
    %322 = vector.extract_strided_slice %303 {offsets = [32, 0], sizes = [16, 4], strides = [1, 1]} : vector<48x4xf32> to vector<16x4xf32>
    %323 = vector.extract_strided_slice %305 {offsets = [32, 0], sizes = [16, 4], strides = [1, 1]} : vector<48x4xf32> to vector<16x4xf32>
    %324 = arith.mulf %313, %323 : vector<16x4xf32>
    %325 = arith.addf %322, %324 : vector<16x4xf32>
    %326 = math.tanh %325 : vector<16x4xf32>
    %cst_80 = arith.constant 1.000000e+00 : f32
    %327 = vector.broadcast %cst_80 : f32 to vector<16x4xf32>
    %328 = arith.subf %327, %321 : vector<16x4xf32>
    %329 = arith.mulf %328, %326 : vector<16x4xf32>
    %330 = arith.mulf %321, %288 : vector<16x4xf32>
    %331 = arith.addf %329, %330 : vector<16x4xf32>
    %c7_81 = arith.constant 7 : index
    %c0_82 = arith.constant 0 : index
    %332 = vector.load %arg0[%c7_81, %c0_82] : memref<24x4xf32, #tpu.memory_space<vmem>>, vector<1x4xf32>
    %333 = arith.subf %332, %33 : vector<1x4xf32>
    %334 = arith.mulf %8, %333 : vector<1x4xf32>
    %335 = arith.mulf %13, %293 : vector<1x4xf32>
    %336 = arith.addf %334, %335 : vector<1x4xf32>
    %337 = arith.subf %332, %336 : vector<1x4xf32>
    %338 = arith.mulf %11, %337 : vector<1x4xf32>
    %339 = arith.mulf %15, %33 : vector<1x4xf32>
    %340 = arith.addf %338, %339 : vector<1x4xf32>
    %c7_83 = arith.constant 7 : index
    %c0_84 = arith.constant 0 : index
    %341 = vector.load %arg10[%c7_83, %c0_84] : memref<12x4xf32, #tpu.memory_space<vmem>>, vector<1x4xf32>
    tpu.vector_store %arg10[%c7_83, %c0_84], %340 {strides = array<i32>} : memref<12x4xf32, #tpu.memory_space<vmem>>, vector<1x4xf32>,
    %342 = arith.subf %332, %340 : vector<1x4xf32>
    %343 = arith.subf %342, %336 : vector<1x4xf32>
    %344 = vector.broadcast %343 : vector<1x4xf32> to vector<48x4xf32>
    %345 = arith.mulf %18, %344 : vector<48x4xf32>
    %346 = arith.addf %345, %21 : vector<48x4xf32>
    %cst_85 = arith.constant dense<0.000000e+00> : vector<48x4xf32>
    %347 = tpu.matmul %25, %331, %cst_85 {dimension_numbers = #tpu.dot_dimension_numbers<[1], [0], [0], [1], [0, 0, 1, 1], [], []>} : vector<48x16xf32>, vector<16x4xf32>, vector<48x4xf32> -> vector<48x4xf32>
    %348 = arith.addf %347, %24 : vector<48x4xf32>
    %349 = vector.extract_strided_slice %346 {offsets = [0, 0], sizes = [16, 4], strides = [1, 1]} : vector<48x4xf32> to vector<16x4xf32>
    %350 = vector.extract_strided_slice %348 {offsets = [0, 0], sizes = [16, 4], strides = [1, 1]} : vector<48x4xf32> to vector<16x4xf32>
    %351 = arith.addf %349, %350 : vector<16x4xf32>
    %352 = arith.negf %351 : vector<16x4xf32>
    %353 = math.exp %352 : vector<16x4xf32>
    %cst_86 = arith.constant 1.000000e+00 : f32
    %354 = vector.broadcast %cst_86 : f32 to vector<16x4xf32>
    %355 = arith.addf %354, %353 : vector<16x4xf32>
    %356 = arith.divf %354, %355 : vector<16x4xf32>
    %357 = vector.extract_strided_slice %346 {offsets = [16, 0], sizes = [16, 4], strides = [1, 1]} : vector<48x4xf32> to vector<16x4xf32>
    %358 = vector.extract_strided_slice %348 {offsets = [16, 0], sizes = [16, 4], strides = [1, 1]} : vector<48x4xf32> to vector<16x4xf32>
    %359 = arith.addf %357, %358 : vector<16x4xf32>
    %360 = arith.negf %359 : vector<16x4xf32>
    %361 = math.exp %360 : vector<16x4xf32>
    %cst_87 = arith.constant 1.000000e+00 : f32
    %362 = vector.broadcast %cst_87 : f32 to vector<16x4xf32>
    %363 = arith.addf %362, %361 : vector<16x4xf32>
    %364 = arith.divf %362, %363 : vector<16x4xf32>
    %365 = vector.extract_strided_slice %346 {offsets = [32, 0], sizes = [16, 4], strides = [1, 1]} : vector<48x4xf32> to vector<16x4xf32>
    %366 = vector.extract_strided_slice %348 {offsets = [32, 0], sizes = [16, 4], strides = [1, 1]} : vector<48x4xf32> to vector<16x4xf32>
    %367 = arith.mulf %356, %366 : vector<16x4xf32>
    %368 = arith.addf %365, %367 : vector<16x4xf32>
    %369 = math.tanh %368 : vector<16x4xf32>
    %cst_88 = arith.constant 1.000000e+00 : f32
    %370 = vector.broadcast %cst_88 : f32 to vector<16x4xf32>
    %371 = arith.subf %370, %364 : vector<16x4xf32>
    %372 = arith.mulf %371, %369 : vector<16x4xf32>
    %373 = arith.mulf %364, %331 : vector<16x4xf32>
    %374 = arith.addf %372, %373 : vector<16x4xf32>
    %c8_89 = arith.constant 8 : index
    %c0_90 = arith.constant 0 : index
    %375 = vector.load %arg0[%c8_89, %c0_90] : memref<24x4xf32, #tpu.memory_space<vmem>>, vector<1x4xf32>
    %376 = arith.subf %375, %34 : vector<1x4xf32>
    %377 = arith.mulf %8, %376 : vector<1x4xf32>
    %378 = arith.mulf %13, %336 : vector<1x4xf32>
    %379 = arith.addf %377, %378 : vector<1x4xf32>
    %380 = arith.subf %375, %379 : vector<1x4xf32>
    %381 = arith.mulf %11, %380 : vector<1x4xf32>
    %382 = arith.mulf %15, %34 : vector<1x4xf32>
    %383 = arith.addf %381, %382 : vector<1x4xf32>
    %c8_91 = arith.constant 8 : index
    %c0_92 = arith.constant 0 : index
    %384 = vector.load %arg10[%c8_91, %c0_92] : memref<12x4xf32, #tpu.memory_space<vmem>>, vector<1x4xf32>
    tpu.vector_store %arg10[%c8_91, %c0_92], %383 {strides = array<i32>} : memref<12x4xf32, #tpu.memory_space<vmem>>, vector<1x4xf32>,
    %385 = arith.subf %375, %383 : vector<1x4xf32>
    %386 = arith.subf %385, %379 : vector<1x4xf32>
    %387 = vector.broadcast %386 : vector<1x4xf32> to vector<48x4xf32>
    %388 = arith.mulf %18, %387 : vector<48x4xf32>
    %389 = arith.addf %388, %21 : vector<48x4xf32>
    %cst_93 = arith.constant dense<0.000000e+00> : vector<48x4xf32>
    %390 = tpu.matmul %25, %374, %cst_93 {dimension_numbers = #tpu.dot_dimension_numbers<[1], [0], [0], [1], [0, 0, 1, 1], [], []>} : vector<48x16xf32>, vector<16x4xf32>, vector<48x4xf32> -> vector<48x4xf32>
    %391 = arith.addf %390, %24 : vector<48x4xf32>
    %392 = vector.extract_strided_slice %389 {offsets = [0, 0], sizes = [16, 4], strides = [1, 1]} : vector<48x4xf32> to vector<16x4xf32>
    %393 = vector.extract_strided_slice %391 {offsets = [0, 0], sizes = [16, 4], strides = [1, 1]} : vector<48x4xf32> to vector<16x4xf32>
    %394 = arith.addf %392, %393 : vector<16x4xf32>
    %395 = arith.negf %394 : vector<16x4xf32>
    %396 = math.exp %395 : vector<16x4xf32>
    %cst_94 = arith.constant 1.000000e+00 : f32
    %397 = vector.broadcast %cst_94 : f32 to vector<16x4xf32>
    %398 = arith.addf %397, %396 : vector<16x4xf32>
    %399 = arith.divf %397, %398 : vector<16x4xf32>
    %400 = vector.extract_strided_slice %389 {offsets = [16, 0], sizes = [16, 4], strides = [1, 1]} : vector<48x4xf32> to vector<16x4xf32>
    %401 = vector.extract_strided_slice %391 {offsets = [16, 0], sizes = [16, 4], strides = [1, 1]} : vector<48x4xf32> to vector<16x4xf32>
    %402 = arith.addf %400, %401 : vector<16x4xf32>
    %403 = arith.negf %402 : vector<16x4xf32>
    %404 = math.exp %403 : vector<16x4xf32>
    %cst_95 = arith.constant 1.000000e+00 : f32
    %405 = vector.broadcast %cst_95 : f32 to vector<16x4xf32>
    %406 = arith.addf %405, %404 : vector<16x4xf32>
    %407 = arith.divf %405, %406 : vector<16x4xf32>
    %408 = vector.extract_strided_slice %389 {offsets = [32, 0], sizes = [16, 4], strides = [1, 1]} : vector<48x4xf32> to vector<16x4xf32>
    %409 = vector.extract_strided_slice %391 {offsets = [32, 0], sizes = [16, 4], strides = [1, 1]} : vector<48x4xf32> to vector<16x4xf32>
    %410 = arith.mulf %399, %409 : vector<16x4xf32>
    %411 = arith.addf %408, %410 : vector<16x4xf32>
    %412 = math.tanh %411 : vector<16x4xf32>
    %cst_96 = arith.constant 1.000000e+00 : f32
    %413 = vector.broadcast %cst_96 : f32 to vector<16x4xf32>
    %414 = arith.subf %413, %407 : vector<16x4xf32>
    %415 = arith.mulf %414, %412 : vector<16x4xf32>
    %416 = arith.mulf %407, %374 : vector<16x4xf32>
    %417 = arith.addf %415, %416 : vector<16x4xf32>
    %c9_97 = arith.constant 9 : index
    %c0_98 = arith.constant 0 : index
    %418 = vector.load %arg0[%c9_97, %c0_98] : memref<24x4xf32, #tpu.memory_space<vmem>>, vector<1x4xf32>
    %419 = arith.subf %418, %35 : vector<1x4xf32>
    %420 = arith.mulf %8, %419 : vector<1x4xf32>
    %421 = arith.mulf %13, %379 : vector<1x4xf32>
    %422 = arith.addf %420, %421 : vector<1x4xf32>
    %423 = arith.subf %418, %422 : vector<1x4xf32>
    %424 = arith.mulf %11, %423 : vector<1x4xf32>
    %425 = arith.mulf %15, %35 : vector<1x4xf32>
    %426 = arith.addf %424, %425 : vector<1x4xf32>
    %c9_99 = arith.constant 9 : index
    %c0_100 = arith.constant 0 : index
    %427 = vector.load %arg10[%c9_99, %c0_100] : memref<12x4xf32, #tpu.memory_space<vmem>>, vector<1x4xf32>
    tpu.vector_store %arg10[%c9_99, %c0_100], %426 {strides = array<i32>} : memref<12x4xf32, #tpu.memory_space<vmem>>, vector<1x4xf32>,
    %428 = arith.subf %418, %426 : vector<1x4xf32>
    %429 = arith.subf %428, %422 : vector<1x4xf32>
    %430 = vector.broadcast %429 : vector<1x4xf32> to vector<48x4xf32>
    %431 = arith.mulf %18, %430 : vector<48x4xf32>
    %432 = arith.addf %431, %21 : vector<48x4xf32>
    %cst_101 = arith.constant dense<0.000000e+00> : vector<48x4xf32>
    %433 = tpu.matmul %25, %417, %cst_101 {dimension_numbers = #tpu.dot_dimension_numbers<[1], [0], [0], [1], [0, 0, 1, 1], [], []>} : vector<48x16xf32>, vector<16x4xf32>, vector<48x4xf32> -> vector<48x4xf32>
    %434 = arith.addf %433, %24 : vector<48x4xf32>
    %435 = vector.extract_strided_slice %432 {offsets = [0, 0], sizes = [16, 4], strides = [1, 1]} : vector<48x4xf32> to vector<16x4xf32>
    %436 = vector.extract_strided_slice %434 {offsets = [0, 0], sizes = [16, 4], strides = [1, 1]} : vector<48x4xf32> to vector<16x4xf32>
    %437 = arith.addf %435, %436 : vector<16x4xf32>
    %438 = arith.negf %437 : vector<16x4xf32>
    %439 = math.exp %438 : vector<16x4xf32>
    %cst_102 = arith.constant 1.000000e+00 : f32
    %440 = vector.broadcast %cst_102 : f32 to vector<16x4xf32>
    %441 = arith.addf %440, %439 : vector<16x4xf32>
    %442 = arith.divf %440, %441 : vector<16x4xf32>
    %443 = vector.extract_strided_slice %432 {offsets = [16, 0], sizes = [16, 4], strides = [1, 1]} : vector<48x4xf32> to vector<16x4xf32>
    %444 = vector.extract_strided_slice %434 {offsets = [16, 0], sizes = [16, 4], strides = [1, 1]} : vector<48x4xf32> to vector<16x4xf32>
    %445 = arith.addf %443, %444 : vector<16x4xf32>
    %446 = arith.negf %445 : vector<16x4xf32>
    %447 = math.exp %446 : vector<16x4xf32>
    %cst_103 = arith.constant 1.000000e+00 : f32
    %448 = vector.broadcast %cst_103 : f32 to vector<16x4xf32>
    %449 = arith.addf %448, %447 : vector<16x4xf32>
    %450 = arith.divf %448, %449 : vector<16x4xf32>
    %451 = vector.extract_strided_slice %432 {offsets = [32, 0], sizes = [16, 4], strides = [1, 1]} : vector<48x4xf32> to vector<16x4xf32>
    %452 = vector.extract_strided_slice %434 {offsets = [32, 0], sizes = [16, 4], strides = [1, 1]} : vector<48x4xf32> to vector<16x4xf32>
    %453 = arith.mulf %442, %452 : vector<16x4xf32>
    %454 = arith.addf %451, %453 : vector<16x4xf32>
    %455 = math.tanh %454 : vector<16x4xf32>
    %cst_104 = arith.constant 1.000000e+00 : f32
    %456 = vector.broadcast %cst_104 : f32 to vector<16x4xf32>
    %457 = arith.subf %456, %450 : vector<16x4xf32>
    %458 = arith.mulf %457, %455 : vector<16x4xf32>
    %459 = arith.mulf %450, %417 : vector<16x4xf32>
    %460 = arith.addf %458, %459 : vector<16x4xf32>
    %c10_105 = arith.constant 10 : index
    %c0_106 = arith.constant 0 : index
    %461 = vector.load %arg0[%c10_105, %c0_106] : memref<24x4xf32, #tpu.memory_space<vmem>>, vector<1x4xf32>
    %462 = arith.subf %461, %36 : vector<1x4xf32>
    %463 = arith.mulf %8, %462 : vector<1x4xf32>
    %464 = arith.mulf %13, %422 : vector<1x4xf32>
    %465 = arith.addf %463, %464 : vector<1x4xf32>
    %466 = arith.subf %461, %465 : vector<1x4xf32>
    %467 = arith.mulf %11, %466 : vector<1x4xf32>
    %468 = arith.mulf %15, %36 : vector<1x4xf32>
    %469 = arith.addf %467, %468 : vector<1x4xf32>
    %c10_107 = arith.constant 10 : index
    %c0_108 = arith.constant 0 : index
    %470 = vector.load %arg10[%c10_107, %c0_108] : memref<12x4xf32, #tpu.memory_space<vmem>>, vector<1x4xf32>
    tpu.vector_store %arg10[%c10_107, %c0_108], %469 {strides = array<i32>} : memref<12x4xf32, #tpu.memory_space<vmem>>, vector<1x4xf32>,
    %471 = arith.subf %461, %469 : vector<1x4xf32>
    %472 = arith.subf %471, %465 : vector<1x4xf32>
    %473 = vector.broadcast %472 : vector<1x4xf32> to vector<48x4xf32>
    %474 = arith.mulf %18, %473 : vector<48x4xf32>
    %475 = arith.addf %474, %21 : vector<48x4xf32>
    %cst_109 = arith.constant dense<0.000000e+00> : vector<48x4xf32>
    %476 = tpu.matmul %25, %460, %cst_109 {dimension_numbers = #tpu.dot_dimension_numbers<[1], [0], [0], [1], [0, 0, 1, 1], [], []>} : vector<48x16xf32>, vector<16x4xf32>, vector<48x4xf32> -> vector<48x4xf32>
    %477 = arith.addf %476, %24 : vector<48x4xf32>
    %478 = vector.extract_strided_slice %475 {offsets = [0, 0], sizes = [16, 4], strides = [1, 1]} : vector<48x4xf32> to vector<16x4xf32>
    %479 = vector.extract_strided_slice %477 {offsets = [0, 0], sizes = [16, 4], strides = [1, 1]} : vector<48x4xf32> to vector<16x4xf32>
    %480 = arith.addf %478, %479 : vector<16x4xf32>
    %481 = arith.negf %480 : vector<16x4xf32>
    %482 = math.exp %481 : vector<16x4xf32>
    %cst_110 = arith.constant 1.000000e+00 : f32
    %483 = vector.broadcast %cst_110 : f32 to vector<16x4xf32>
    %484 = arith.addf %483, %482 : vector<16x4xf32>
    %485 = arith.divf %483, %484 : vector<16x4xf32>
    %486 = vector.extract_strided_slice %475 {offsets = [16, 0], sizes = [16, 4], strides = [1, 1]} : vector<48x4xf32> to vector<16x4xf32>
    %487 = vector.extract_strided_slice %477 {offsets = [16, 0], sizes = [16, 4], strides = [1, 1]} : vector<48x4xf32> to vector<16x4xf32>
    %488 = arith.addf %486, %487 : vector<16x4xf32>
    %489 = arith.negf %488 : vector<16x4xf32>
    %490 = math.exp %489 : vector<16x4xf32>
    %cst_111 = arith.constant 1.000000e+00 : f32
    %491 = vector.broadcast %cst_111 : f32 to vector<16x4xf32>
    %492 = arith.addf %491, %490 : vector<16x4xf32>
    %493 = arith.divf %491, %492 : vector<16x4xf32>
    %494 = vector.extract_strided_slice %475 {offsets = [32, 0], sizes = [16, 4], strides = [1, 1]} : vector<48x4xf32> to vector<16x4xf32>
    %495 = vector.extract_strided_slice %477 {offsets = [32, 0], sizes = [16, 4], strides = [1, 1]} : vector<48x4xf32> to vector<16x4xf32>
    %496 = arith.mulf %485, %495 : vector<16x4xf32>
    %497 = arith.addf %494, %496 : vector<16x4xf32>
    %498 = math.tanh %497 : vector<16x4xf32>
    %cst_112 = arith.constant 1.000000e+00 : f32
    %499 = vector.broadcast %cst_112 : f32 to vector<16x4xf32>
    %500 = arith.subf %499, %493 : vector<16x4xf32>
    %501 = arith.mulf %500, %498 : vector<16x4xf32>
    %502 = arith.mulf %493, %460 : vector<16x4xf32>
    %503 = arith.addf %501, %502 : vector<16x4xf32>
    %c11_113 = arith.constant 11 : index
    %c0_114 = arith.constant 0 : index
    %504 = vector.load %arg0[%c11_113, %c0_114] : memref<24x4xf32, #tpu.memory_space<vmem>>, vector<1x4xf32>
    %505 = arith.subf %504, %37 : vector<1x4xf32>
    %506 = arith.mulf %8, %505 : vector<1x4xf32>
    %507 = arith.mulf %13, %465 : vector<1x4xf32>
    %508 = arith.addf %506, %507 : vector<1x4xf32>
    %509 = arith.subf %504, %508 : vector<1x4xf32>
    %510 = arith.mulf %11, %509 : vector<1x4xf32>
    %511 = arith.mulf %15, %37 : vector<1x4xf32>
    %512 = arith.addf %510, %511 : vector<1x4xf32>
    %c11_115 = arith.constant 11 : index
    %c0_116 = arith.constant 0 : index
    %513 = vector.load %arg10[%c11_115, %c0_116] : memref<12x4xf32, #tpu.memory_space<vmem>>, vector<1x4xf32>
    tpu.vector_store %arg10[%c11_115, %c0_116], %512 {strides = array<i32>} : memref<12x4xf32, #tpu.memory_space<vmem>>, vector<1x4xf32>,
    %514 = arith.subf %504, %512 : vector<1x4xf32>
    %515 = arith.subf %514, %508 : vector<1x4xf32>
    %516 = vector.broadcast %515 : vector<1x4xf32> to vector<48x4xf32>
    %517 = arith.mulf %18, %516 : vector<48x4xf32>
    %518 = arith.addf %517, %21 : vector<48x4xf32>
    %cst_117 = arith.constant dense<0.000000e+00> : vector<48x4xf32>
    %519 = tpu.matmul %25, %503, %cst_117 {dimension_numbers = #tpu.dot_dimension_numbers<[1], [0], [0], [1], [0, 0, 1, 1], [], []>} : vector<48x16xf32>, vector<16x4xf32>, vector<48x4xf32> -> vector<48x4xf32>
    %520 = arith.addf %519, %24 : vector<48x4xf32>
    %521 = vector.extract_strided_slice %518 {offsets = [0, 0], sizes = [16, 4], strides = [1, 1]} : vector<48x4xf32> to vector<16x4xf32>
    %522 = vector.extract_strided_slice %520 {offsets = [0, 0], sizes = [16, 4], strides = [1, 1]} : vector<48x4xf32> to vector<16x4xf32>
    %523 = arith.addf %521, %522 : vector<16x4xf32>
    %524 = arith.negf %523 : vector<16x4xf32>
    %525 = math.exp %524 : vector<16x4xf32>
    %cst_118 = arith.constant 1.000000e+00 : f32
    %526 = vector.broadcast %cst_118 : f32 to vector<16x4xf32>
    %527 = arith.addf %526, %525 : vector<16x4xf32>
    %528 = arith.divf %526, %527 : vector<16x4xf32>
    %529 = vector.extract_strided_slice %518 {offsets = [16, 0], sizes = [16, 4], strides = [1, 1]} : vector<48x4xf32> to vector<16x4xf32>
    %530 = vector.extract_strided_slice %520 {offsets = [16, 0], sizes = [16, 4], strides = [1, 1]} : vector<48x4xf32> to vector<16x4xf32>
    %531 = arith.addf %529, %530 : vector<16x4xf32>
    %532 = arith.negf %531 : vector<16x4xf32>
    %533 = math.exp %532 : vector<16x4xf32>
    %cst_119 = arith.constant 1.000000e+00 : f32
    %534 = vector.broadcast %cst_119 : f32 to vector<16x4xf32>
    %535 = arith.addf %534, %533 : vector<16x4xf32>
    %536 = arith.divf %534, %535 : vector<16x4xf32>
    %537 = vector.extract_strided_slice %518 {offsets = [32, 0], sizes = [16, 4], strides = [1, 1]} : vector<48x4xf32> to vector<16x4xf32>
    %538 = vector.extract_strided_slice %520 {offsets = [32, 0], sizes = [16, 4], strides = [1, 1]} : vector<48x4xf32> to vector<16x4xf32>
    %539 = arith.mulf %528, %538 : vector<16x4xf32>
    %540 = arith.addf %537, %539 : vector<16x4xf32>
    %541 = math.tanh %540 : vector<16x4xf32>
    %cst_120 = arith.constant 1.000000e+00 : f32
    %542 = vector.broadcast %cst_120 : f32 to vector<16x4xf32>
    %543 = arith.subf %542, %536 : vector<16x4xf32>
    %544 = arith.mulf %543, %541 : vector<16x4xf32>
    %545 = arith.mulf %536, %503 : vector<16x4xf32>
    %546 = arith.addf %544, %545 : vector<16x4xf32>
    %c12 = arith.constant 12 : index
    %c0_121 = arith.constant 0 : index
    %547 = vector.load %arg0[%c12, %c0_121] : memref<24x4xf32, #tpu.memory_space<vmem>>, vector<1x4xf32>
    %548 = arith.subf %547, %26 : vector<1x4xf32>
    %549 = arith.mulf %8, %548 : vector<1x4xf32>
    %550 = arith.mulf %13, %508 : vector<1x4xf32>
    %551 = arith.addf %549, %550 : vector<1x4xf32>
    %552 = arith.subf %547, %551 : vector<1x4xf32>
    %553 = arith.mulf %11, %552 : vector<1x4xf32>
    %554 = arith.mulf %15, %26 : vector<1x4xf32>
    %555 = arith.addf %553, %554 : vector<1x4xf32>
    %556 = arith.subf %547, %555 : vector<1x4xf32>
    %557 = arith.subf %556, %551 : vector<1x4xf32>
    %558 = vector.broadcast %557 : vector<1x4xf32> to vector<48x4xf32>
    %559 = arith.mulf %18, %558 : vector<48x4xf32>
    %560 = arith.addf %559, %21 : vector<48x4xf32>
    %cst_122 = arith.constant dense<0.000000e+00> : vector<48x4xf32>
    %561 = tpu.matmul %25, %546, %cst_122 {dimension_numbers = #tpu.dot_dimension_numbers<[1], [0], [0], [1], [0, 0, 1, 1], [], []>} : vector<48x16xf32>, vector<16x4xf32>, vector<48x4xf32> -> vector<48x4xf32>
    %562 = arith.addf %561, %24 : vector<48x4xf32>
    %563 = vector.extract_strided_slice %560 {offsets = [0, 0], sizes = [16, 4], strides = [1, 1]} : vector<48x4xf32> to vector<16x4xf32>
    %564 = vector.extract_strided_slice %562 {offsets = [0, 0], sizes = [16, 4], strides = [1, 1]} : vector<48x4xf32> to vector<16x4xf32>
    %565 = arith.addf %563, %564 : vector<16x4xf32>
    %566 = arith.negf %565 : vector<16x4xf32>
    %567 = math.exp %566 : vector<16x4xf32>
    %cst_123 = arith.constant 1.000000e+00 : f32
    %568 = vector.broadcast %cst_123 : f32 to vector<16x4xf32>
    %569 = arith.addf %568, %567 : vector<16x4xf32>
    %570 = arith.divf %568, %569 : vector<16x4xf32>
    %571 = vector.extract_strided_slice %560 {offsets = [16, 0], sizes = [16, 4], strides = [1, 1]} : vector<48x4xf32> to vector<16x4xf32>
    %572 = vector.extract_strided_slice %562 {offsets = [16, 0], sizes = [16, 4], strides = [1, 1]} : vector<48x4xf32> to vector<16x4xf32>
    %573 = arith.addf %571, %572 : vector<16x4xf32>
    %574 = arith.negf %573 : vector<16x4xf32>
    %575 = math.exp %574 : vector<16x4xf32>
    %cst_124 = arith.constant 1.000000e+00 : f32
    %576 = vector.broadcast %cst_124 : f32 to vector<16x4xf32>
    %577 = arith.addf %576, %575 : vector<16x4xf32>
    %578 = arith.divf %576, %577 : vector<16x4xf32>
    %579 = vector.extract_strided_slice %560 {offsets = [32, 0], sizes = [16, 4], strides = [1, 1]} : vector<48x4xf32> to vector<16x4xf32>
    %580 = vector.extract_strided_slice %562 {offsets = [32, 0], sizes = [16, 4], strides = [1, 1]} : vector<48x4xf32> to vector<16x4xf32>
    %581 = arith.mulf %570, %580 : vector<16x4xf32>
    %582 = arith.addf %579, %581 : vector<16x4xf32>
    %583 = math.tanh %582 : vector<16x4xf32>
    %cst_125 = arith.constant 1.000000e+00 : f32
    %584 = vector.broadcast %cst_125 : f32 to vector<16x4xf32>
    %585 = arith.subf %584, %578 : vector<16x4xf32>
    %586 = arith.mulf %585, %583 : vector<16x4xf32>
    %587 = arith.mulf %578, %546 : vector<16x4xf32>
    %588 = arith.addf %586, %587 : vector<16x4xf32>
    %c13 = arith.constant 13 : index
    %c0_126 = arith.constant 0 : index
    %589 = vector.load %arg0[%c13, %c0_126] : memref<24x4xf32, #tpu.memory_space<vmem>>, vector<1x4xf32>
    %590 = arith.subf %589, %82 : vector<1x4xf32>
    %591 = arith.mulf %8, %590 : vector<1x4xf32>
    %592 = arith.mulf %13, %551 : vector<1x4xf32>
    %593 = arith.addf %591, %592 : vector<1x4xf32>
    %594 = arith.subf %589, %593 : vector<1x4xf32>
    %595 = arith.mulf %11, %594 : vector<1x4xf32>
    %596 = arith.mulf %15, %82 : vector<1x4xf32>
    %597 = arith.addf %595, %596 : vector<1x4xf32>
    %598 = arith.subf %589, %597 : vector<1x4xf32>
    %599 = arith.subf %598, %593 : vector<1x4xf32>
    %600 = vector.broadcast %599 : vector<1x4xf32> to vector<48x4xf32>
    %601 = arith.mulf %18, %600 : vector<48x4xf32>
    %602 = arith.addf %601, %21 : vector<48x4xf32>
    %cst_127 = arith.constant dense<0.000000e+00> : vector<48x4xf32>
    %603 = tpu.matmul %25, %588, %cst_127 {dimension_numbers = #tpu.dot_dimension_numbers<[1], [0], [0], [1], [0, 0, 1, 1], [], []>} : vector<48x16xf32>, vector<16x4xf32>, vector<48x4xf32> -> vector<48x4xf32>
    %604 = arith.addf %603, %24 : vector<48x4xf32>
    %605 = vector.extract_strided_slice %602 {offsets = [0, 0], sizes = [16, 4], strides = [1, 1]} : vector<48x4xf32> to vector<16x4xf32>
    %606 = vector.extract_strided_slice %604 {offsets = [0, 0], sizes = [16, 4], strides = [1, 1]} : vector<48x4xf32> to vector<16x4xf32>
    %607 = arith.addf %605, %606 : vector<16x4xf32>
    %608 = arith.negf %607 : vector<16x4xf32>
    %609 = math.exp %608 : vector<16x4xf32>
    %cst_128 = arith.constant 1.000000e+00 : f32
    %610 = vector.broadcast %cst_128 : f32 to vector<16x4xf32>
    %611 = arith.addf %610, %609 : vector<16x4xf32>
    %612 = arith.divf %610, %611 : vector<16x4xf32>
    %613 = vector.extract_strided_slice %602 {offsets = [16, 0], sizes = [16, 4], strides = [1, 1]} : vector<48x4xf32> to vector<16x4xf32>
    %614 = vector.extract_strided_slice %604 {offsets = [16, 0], sizes = [16, 4], strides = [1, 1]} : vector<48x4xf32> to vector<16x4xf32>
    %615 = arith.addf %613, %614 : vector<16x4xf32>
    %616 = arith.negf %615 : vector<16x4xf32>
    %617 = math.exp %616 : vector<16x4xf32>
    %cst_129 = arith.constant 1.000000e+00 : f32
    %618 = vector.broadcast %cst_129 : f32 to vector<16x4xf32>
    %619 = arith.addf %618, %617 : vector<16x4xf32>
    %620 = arith.divf %618, %619 : vector<16x4xf32>
    %621 = vector.extract_strided_slice %602 {offsets = [32, 0], sizes = [16, 4], strides = [1, 1]} : vector<48x4xf32> to vector<16x4xf32>
    %622 = vector.extract_strided_slice %604 {offsets = [32, 0], sizes = [16, 4], strides = [1, 1]} : vector<48x4xf32> to vector<16x4xf32>
    %623 = arith.mulf %612, %622 : vector<16x4xf32>
    %624 = arith.addf %621, %623 : vector<16x4xf32>
    %625 = math.tanh %624 : vector<16x4xf32>
    %cst_130 = arith.constant 1.000000e+00 : f32
    %626 = vector.broadcast %cst_130 : f32 to vector<16x4xf32>
    %627 = arith.subf %626, %620 : vector<16x4xf32>
    %628 = arith.mulf %627, %625 : vector<16x4xf32>
    %629 = arith.mulf %620, %588 : vector<16x4xf32>
    %630 = arith.addf %628, %629 : vector<16x4xf32>
    %c14 = arith.constant 14 : index
    %c0_131 = arith.constant 0 : index
    %631 = vector.load %arg0[%c14, %c0_131] : memref<24x4xf32, #tpu.memory_space<vmem>>, vector<1x4xf32>
    %632 = arith.subf %631, %125 : vector<1x4xf32>
    %633 = arith.mulf %8, %632 : vector<1x4xf32>
    %634 = arith.mulf %13, %593 : vector<1x4xf32>
    %635 = arith.addf %633, %634 : vector<1x4xf32>
    %636 = arith.subf %631, %635 : vector<1x4xf32>
    %637 = arith.mulf %11, %636 : vector<1x4xf32>
    %638 = arith.mulf %15, %125 : vector<1x4xf32>
    %639 = arith.addf %637, %638 : vector<1x4xf32>
    %640 = arith.subf %631, %639 : vector<1x4xf32>
    %641 = arith.subf %640, %635 : vector<1x4xf32>
    %642 = vector.broadcast %641 : vector<1x4xf32> to vector<48x4xf32>
    %643 = arith.mulf %18, %642 : vector<48x4xf32>
    %644 = arith.addf %643, %21 : vector<48x4xf32>
    %cst_132 = arith.constant dense<0.000000e+00> : vector<48x4xf32>
    %645 = tpu.matmul %25, %630, %cst_132 {dimension_numbers = #tpu.dot_dimension_numbers<[1], [0], [0], [1], [0, 0, 1, 1], [], []>} : vector<48x16xf32>, vector<16x4xf32>, vector<48x4xf32> -> vector<48x4xf32>
    %646 = arith.addf %645, %24 : vector<48x4xf32>
    %647 = vector.extract_strided_slice %644 {offsets = [0, 0], sizes = [16, 4], strides = [1, 1]} : vector<48x4xf32> to vector<16x4xf32>
    %648 = vector.extract_strided_slice %646 {offsets = [0, 0], sizes = [16, 4], strides = [1, 1]} : vector<48x4xf32> to vector<16x4xf32>
    %649 = arith.addf %647, %648 : vector<16x4xf32>
    %650 = arith.negf %649 : vector<16x4xf32>
    %651 = math.exp %650 : vector<16x4xf32>
    %cst_133 = arith.constant 1.000000e+00 : f32
    %652 = vector.broadcast %cst_133 : f32 to vector<16x4xf32>
    %653 = arith.addf %652, %651 : vector<16x4xf32>
    %654 = arith.divf %652, %653 : vector<16x4xf32>
    %655 = vector.extract_strided_slice %644 {offsets = [16, 0], sizes = [16, 4], strides = [1, 1]} : vector<48x4xf32> to vector<16x4xf32>
    %656 = vector.extract_strided_slice %646 {offsets = [16, 0], sizes = [16, 4], strides = [1, 1]} : vector<48x4xf32> to vector<16x4xf32>
    %657 = arith.addf %655, %656 : vector<16x4xf32>
    %658 = arith.negf %657 : vector<16x4xf32>
    %659 = math.exp %658 : vector<16x4xf32>
    %cst_134 = arith.constant 1.000000e+00 : f32
    %660 = vector.broadcast %cst_134 : f32 to vector<16x4xf32>
    %661 = arith.addf %660, %659 : vector<16x4xf32>
    %662 = arith.divf %660, %661 : vector<16x4xf32>
    %663 = vector.extract_strided_slice %644 {offsets = [32, 0], sizes = [16, 4], strides = [1, 1]} : vector<48x4xf32> to vector<16x4xf32>
    %664 = vector.extract_strided_slice %646 {offsets = [32, 0], sizes = [16, 4], strides = [1, 1]} : vector<48x4xf32> to vector<16x4xf32>
    %665 = arith.mulf %654, %664 : vector<16x4xf32>
    %666 = arith.addf %663, %665 : vector<16x4xf32>
    %667 = math.tanh %666 : vector<16x4xf32>
    %cst_135 = arith.constant 1.000000e+00 : f32
    %668 = vector.broadcast %cst_135 : f32 to vector<16x4xf32>
    %669 = arith.subf %668, %662 : vector<16x4xf32>
    %670 = arith.mulf %669, %667 : vector<16x4xf32>
    %671 = arith.mulf %662, %630 : vector<16x4xf32>
    %672 = arith.addf %670, %671 : vector<16x4xf32>
    %c15 = arith.constant 15 : index
    %c0_136 = arith.constant 0 : index
    %673 = vector.load %arg0[%c15, %c0_136] : memref<24x4xf32, #tpu.memory_space<vmem>>, vector<1x4xf32>
    %674 = arith.subf %673, %168 : vector<1x4xf32>
    %675 = arith.mulf %8, %674 : vector<1x4xf32>
    %676 = arith.mulf %13, %635 : vector<1x4xf32>
    %677 = arith.addf %675, %676 : vector<1x4xf32>
    %678 = arith.subf %673, %677 : vector<1x4xf32>
    %679 = arith.mulf %11, %678 : vector<1x4xf32>
    %680 = arith.mulf %15, %168 : vector<1x4xf32>
    %681 = arith.addf %679, %680 : vector<1x4xf32>
    %682 = arith.subf %673, %681 : vector<1x4xf32>
    %683 = arith.subf %682, %677 : vector<1x4xf32>
    %684 = vector.broadcast %683 : vector<1x4xf32> to vector<48x4xf32>
    %685 = arith.mulf %18, %684 : vector<48x4xf32>
    %686 = arith.addf %685, %21 : vector<48x4xf32>
    %cst_137 = arith.constant dense<0.000000e+00> : vector<48x4xf32>
    %687 = tpu.matmul %25, %672, %cst_137 {dimension_numbers = #tpu.dot_dimension_numbers<[1], [0], [0], [1], [0, 0, 1, 1], [], []>} : vector<48x16xf32>, vector<16x4xf32>, vector<48x4xf32> -> vector<48x4xf32>
    %688 = arith.addf %687, %24 : vector<48x4xf32>
    %689 = vector.extract_strided_slice %686 {offsets = [0, 0], sizes = [16, 4], strides = [1, 1]} : vector<48x4xf32> to vector<16x4xf32>
    %690 = vector.extract_strided_slice %688 {offsets = [0, 0], sizes = [16, 4], strides = [1, 1]} : vector<48x4xf32> to vector<16x4xf32>
    %691 = arith.addf %689, %690 : vector<16x4xf32>
    %692 = arith.negf %691 : vector<16x4xf32>
    %693 = math.exp %692 : vector<16x4xf32>
    %cst_138 = arith.constant 1.000000e+00 : f32
    %694 = vector.broadcast %cst_138 : f32 to vector<16x4xf32>
    %695 = arith.addf %694, %693 : vector<16x4xf32>
    %696 = arith.divf %694, %695 : vector<16x4xf32>
    %697 = vector.extract_strided_slice %686 {offsets = [16, 0], sizes = [16, 4], strides = [1, 1]} : vector<48x4xf32> to vector<16x4xf32>
    %698 = vector.extract_strided_slice %688 {offsets = [16, 0], sizes = [16, 4], strides = [1, 1]} : vector<48x4xf32> to vector<16x4xf32>
    %699 = arith.addf %697, %698 : vector<16x4xf32>
    %700 = arith.negf %699 : vector<16x4xf32>
    %701 = math.exp %700 : vector<16x4xf32>
    %cst_139 = arith.constant 1.000000e+00 : f32
    %702 = vector.broadcast %cst_139 : f32 to vector<16x4xf32>
    %703 = arith.addf %702, %701 : vector<16x4xf32>
    %704 = arith.divf %702, %703 : vector<16x4xf32>
    %705 = vector.extract_strided_slice %686 {offsets = [32, 0], sizes = [16, 4], strides = [1, 1]} : vector<48x4xf32> to vector<16x4xf32>
    %706 = vector.extract_strided_slice %688 {offsets = [32, 0], sizes = [16, 4], strides = [1, 1]} : vector<48x4xf32> to vector<16x4xf32>
    %707 = arith.mulf %696, %706 : vector<16x4xf32>
    %708 = arith.addf %705, %707 : vector<16x4xf32>
    %709 = math.tanh %708 : vector<16x4xf32>
    %cst_140 = arith.constant 1.000000e+00 : f32
    %710 = vector.broadcast %cst_140 : f32 to vector<16x4xf32>
    %711 = arith.subf %710, %704 : vector<16x4xf32>
    %712 = arith.mulf %711, %709 : vector<16x4xf32>
    %713 = arith.mulf %704, %672 : vector<16x4xf32>
    %714 = arith.addf %712, %713 : vector<16x4xf32>
    %c16 = arith.constant 16 : index
    %c0_141 = arith.constant 0 : index
    %715 = vector.load %arg0[%c16, %c0_141] : memref<24x4xf32, #tpu.memory_space<vmem>>, vector<1x4xf32>
    %716 = arith.subf %715, %211 : vector<1x4xf32>
    %717 = arith.mulf %8, %716 : vector<1x4xf32>
    %718 = arith.mulf %13, %677 : vector<1x4xf32>
    %719 = arith.addf %717, %718 : vector<1x4xf32>
    %720 = arith.subf %715, %719 : vector<1x4xf32>
    %721 = arith.mulf %11, %720 : vector<1x4xf32>
    %722 = arith.mulf %15, %211 : vector<1x4xf32>
    %723 = arith.addf %721, %722 : vector<1x4xf32>
    %724 = arith.subf %715, %723 : vector<1x4xf32>
    %725 = arith.subf %724, %719 : vector<1x4xf32>
    %726 = vector.broadcast %725 : vector<1x4xf32> to vector<48x4xf32>
    %727 = arith.mulf %18, %726 : vector<48x4xf32>
    %728 = arith.addf %727, %21 : vector<48x4xf32>
    %cst_142 = arith.constant dense<0.000000e+00> : vector<48x4xf32>
    %729 = tpu.matmul %25, %714, %cst_142 {dimension_numbers = #tpu.dot_dimension_numbers<[1], [0], [0], [1], [0, 0, 1, 1], [], []>} : vector<48x16xf32>, vector<16x4xf32>, vector<48x4xf32> -> vector<48x4xf32>
    %730 = arith.addf %729, %24 : vector<48x4xf32>
    %731 = vector.extract_strided_slice %728 {offsets = [0, 0], sizes = [16, 4], strides = [1, 1]} : vector<48x4xf32> to vector<16x4xf32>
    %732 = vector.extract_strided_slice %730 {offsets = [0, 0], sizes = [16, 4], strides = [1, 1]} : vector<48x4xf32> to vector<16x4xf32>
    %733 = arith.addf %731, %732 : vector<16x4xf32>
    %734 = arith.negf %733 : vector<16x4xf32>
    %735 = math.exp %734 : vector<16x4xf32>
    %cst_143 = arith.constant 1.000000e+00 : f32
    %736 = vector.broadcast %cst_143 : f32 to vector<16x4xf32>
    %737 = arith.addf %736, %735 : vector<16x4xf32>
    %738 = arith.divf %736, %737 : vector<16x4xf32>
    %739 = vector.extract_strided_slice %728 {offsets = [16, 0], sizes = [16, 4], strides = [1, 1]} : vector<48x4xf32> to vector<16x4xf32>
    %740 = vector.extract_strided_slice %730 {offsets = [16, 0], sizes = [16, 4], strides = [1, 1]} : vector<48x4xf32> to vector<16x4xf32>
    %741 = arith.addf %739, %740 : vector<16x4xf32>
    %742 = arith.negf %741 : vector<16x4xf32>
    %743 = math.exp %742 : vector<16x4xf32>
    %cst_144 = arith.constant 1.000000e+00 : f32
    %744 = vector.broadcast %cst_144 : f32 to vector<16x4xf32>
    %745 = arith.addf %744, %743 : vector<16x4xf32>
    %746 = arith.divf %744, %745 : vector<16x4xf32>
    %747 = vector.extract_strided_slice %728 {offsets = [32, 0], sizes = [16, 4], strides = [1, 1]} : vector<48x4xf32> to vector<16x4xf32>
    %748 = vector.extract_strided_slice %730 {offsets = [32, 0], sizes = [16, 4], strides = [1, 1]} : vector<48x4xf32> to vector<16x4xf32>
    %749 = arith.mulf %738, %748 : vector<16x4xf32>
    %750 = arith.addf %747, %749 : vector<16x4xf32>
    %751 = math.tanh %750 : vector<16x4xf32>
    %cst_145 = arith.constant 1.000000e+00 : f32
    %752 = vector.broadcast %cst_145 : f32 to vector<16x4xf32>
    %753 = arith.subf %752, %746 : vector<16x4xf32>
    %754 = arith.mulf %753, %751 : vector<16x4xf32>
    %755 = arith.mulf %746, %714 : vector<16x4xf32>
    %756 = arith.addf %754, %755 : vector<16x4xf32>
    %c17 = arith.constant 17 : index
    %c0_146 = arith.constant 0 : index
    %757 = vector.load %arg0[%c17, %c0_146] : memref<24x4xf32, #tpu.memory_space<vmem>>, vector<1x4xf32>
    %758 = arith.subf %757, %254 : vector<1x4xf32>
    %759 = arith.mulf %8, %758 : vector<1x4xf32>
    %760 = arith.mulf %13, %719 : vector<1x4xf32>
    %761 = arith.addf %759, %760 : vector<1x4xf32>
    %762 = arith.subf %757, %761 : vector<1x4xf32>
    %763 = arith.mulf %11, %762 : vector<1x4xf32>
    %764 = arith.mulf %15, %254 : vector<1x4xf32>
    %765 = arith.addf %763, %764 : vector<1x4xf32>
    %766 = arith.subf %757, %765 : vector<1x4xf32>
    %767 = arith.subf %766, %761 : vector<1x4xf32>
    %768 = vector.broadcast %767 : vector<1x4xf32> to vector<48x4xf32>
    %769 = arith.mulf %18, %768 : vector<48x4xf32>
    %770 = arith.addf %769, %21 : vector<48x4xf32>
    %cst_147 = arith.constant dense<0.000000e+00> : vector<48x4xf32>
    %771 = tpu.matmul %25, %756, %cst_147 {dimension_numbers = #tpu.dot_dimension_numbers<[1], [0], [0], [1], [0, 0, 1, 1], [], []>} : vector<48x16xf32>, vector<16x4xf32>, vector<48x4xf32> -> vector<48x4xf32>
    %772 = arith.addf %771, %24 : vector<48x4xf32>
    %773 = vector.extract_strided_slice %770 {offsets = [0, 0], sizes = [16, 4], strides = [1, 1]} : vector<48x4xf32> to vector<16x4xf32>
    %774 = vector.extract_strided_slice %772 {offsets = [0, 0], sizes = [16, 4], strides = [1, 1]} : vector<48x4xf32> to vector<16x4xf32>
    %775 = arith.addf %773, %774 : vector<16x4xf32>
    %776 = arith.negf %775 : vector<16x4xf32>
    %777 = math.exp %776 : vector<16x4xf32>
    %cst_148 = arith.constant 1.000000e+00 : f32
    %778 = vector.broadcast %cst_148 : f32 to vector<16x4xf32>
    %779 = arith.addf %778, %777 : vector<16x4xf32>
    %780 = arith.divf %778, %779 : vector<16x4xf32>
    %781 = vector.extract_strided_slice %770 {offsets = [16, 0], sizes = [16, 4], strides = [1, 1]} : vector<48x4xf32> to vector<16x4xf32>
    %782 = vector.extract_strided_slice %772 {offsets = [16, 0], sizes = [16, 4], strides = [1, 1]} : vector<48x4xf32> to vector<16x4xf32>
    %783 = arith.addf %781, %782 : vector<16x4xf32>
    %784 = arith.negf %783 : vector<16x4xf32>
    %785 = math.exp %784 : vector<16x4xf32>
    %cst_149 = arith.constant 1.000000e+00 : f32
    %786 = vector.broadcast %cst_149 : f32 to vector<16x4xf32>
    %787 = arith.addf %786, %785 : vector<16x4xf32>
    %788 = arith.divf %786, %787 : vector<16x4xf32>
    %789 = vector.extract_strided_slice %770 {offsets = [32, 0], sizes = [16, 4], strides = [1, 1]} : vector<48x4xf32> to vector<16x4xf32>
    %790 = vector.extract_strided_slice %772 {offsets = [32, 0], sizes = [16, 4], strides = [1, 1]} : vector<48x4xf32> to vector<16x4xf32>
    %791 = arith.mulf %780, %790 : vector<16x4xf32>
    %792 = arith.addf %789, %791 : vector<16x4xf32>
    %793 = math.tanh %792 : vector<16x4xf32>
    %cst_150 = arith.constant 1.000000e+00 : f32
    %794 = vector.broadcast %cst_150 : f32 to vector<16x4xf32>
    %795 = arith.subf %794, %788 : vector<16x4xf32>
    %796 = arith.mulf %795, %793 : vector<16x4xf32>
    %797 = arith.mulf %788, %756 : vector<16x4xf32>
    %798 = arith.addf %796, %797 : vector<16x4xf32>
    %c18 = arith.constant 18 : index
    %c0_151 = arith.constant 0 : index
    %799 = vector.load %arg0[%c18, %c0_151] : memref<24x4xf32, #tpu.memory_space<vmem>>, vector<1x4xf32>
    %800 = arith.subf %799, %297 : vector<1x4xf32>
    %801 = arith.mulf %8, %800 : vector<1x4xf32>
    %802 = arith.mulf %13, %761 : vector<1x4xf32>
    %803 = arith.addf %801, %802 : vector<1x4xf32>
    %804 = arith.subf %799, %803 : vector<1x4xf32>
    %805 = arith.mulf %11, %804 : vector<1x4xf32>
    %806 = arith.mulf %15, %297 : vector<1x4xf32>
    %807 = arith.addf %805, %806 : vector<1x4xf32>
    %808 = arith.subf %799, %807 : vector<1x4xf32>
    %809 = arith.subf %808, %803 : vector<1x4xf32>
    %810 = vector.broadcast %809 : vector<1x4xf32> to vector<48x4xf32>
    %811 = arith.mulf %18, %810 : vector<48x4xf32>
    %812 = arith.addf %811, %21 : vector<48x4xf32>
    %cst_152 = arith.constant dense<0.000000e+00> : vector<48x4xf32>
    %813 = tpu.matmul %25, %798, %cst_152 {dimension_numbers = #tpu.dot_dimension_numbers<[1], [0], [0], [1], [0, 0, 1, 1], [], []>} : vector<48x16xf32>, vector<16x4xf32>, vector<48x4xf32> -> vector<48x4xf32>
    %814 = arith.addf %813, %24 : vector<48x4xf32>
    %815 = vector.extract_strided_slice %812 {offsets = [0, 0], sizes = [16, 4], strides = [1, 1]} : vector<48x4xf32> to vector<16x4xf32>
    %816 = vector.extract_strided_slice %814 {offsets = [0, 0], sizes = [16, 4], strides = [1, 1]} : vector<48x4xf32> to vector<16x4xf32>
    %817 = arith.addf %815, %816 : vector<16x4xf32>
    %818 = arith.negf %817 : vector<16x4xf32>
    %819 = math.exp %818 : vector<16x4xf32>
    %cst_153 = arith.constant 1.000000e+00 : f32
    %820 = vector.broadcast %cst_153 : f32 to vector<16x4xf32>
    %821 = arith.addf %820, %819 : vector<16x4xf32>
    %822 = arith.divf %820, %821 : vector<16x4xf32>
    %823 = vector.extract_strided_slice %812 {offsets = [16, 0], sizes = [16, 4], strides = [1, 1]} : vector<48x4xf32> to vector<16x4xf32>
    %824 = vector.extract_strided_slice %814 {offsets = [16, 0], sizes = [16, 4], strides = [1, 1]} : vector<48x4xf32> to vector<16x4xf32>
    %825 = arith.addf %823, %824 : vector<16x4xf32>
    %826 = arith.negf %825 : vector<16x4xf32>
    %827 = math.exp %826 : vector<16x4xf32>
    %cst_154 = arith.constant 1.000000e+00 : f32
    %828 = vector.broadcast %cst_154 : f32 to vector<16x4xf32>
    %829 = arith.addf %828, %827 : vector<16x4xf32>
    %830 = arith.divf %828, %829 : vector<16x4xf32>
    %831 = vector.extract_strided_slice %812 {offsets = [32, 0], sizes = [16, 4], strides = [1, 1]} : vector<48x4xf32> to vector<16x4xf32>
    %832 = vector.extract_strided_slice %814 {offsets = [32, 0], sizes = [16, 4], strides = [1, 1]} : vector<48x4xf32> to vector<16x4xf32>
    %833 = arith.mulf %822, %832 : vector<16x4xf32>
    %834 = arith.addf %831, %833 : vector<16x4xf32>
    %835 = math.tanh %834 : vector<16x4xf32>
    %cst_155 = arith.constant 1.000000e+00 : f32
    %836 = vector.broadcast %cst_155 : f32 to vector<16x4xf32>
    %837 = arith.subf %836, %830 : vector<16x4xf32>
    %838 = arith.mulf %837, %835 : vector<16x4xf32>
    %839 = arith.mulf %830, %798 : vector<16x4xf32>
    %840 = arith.addf %838, %839 : vector<16x4xf32>
    %c19 = arith.constant 19 : index
    %c0_156 = arith.constant 0 : index
    %841 = vector.load %arg0[%c19, %c0_156] : memref<24x4xf32, #tpu.memory_space<vmem>>, vector<1x4xf32>
    %842 = arith.subf %841, %340 : vector<1x4xf32>
    %843 = arith.mulf %8, %842 : vector<1x4xf32>
    %844 = arith.mulf %13, %803 : vector<1x4xf32>
    %845 = arith.addf %843, %844 : vector<1x4xf32>
    %846 = arith.subf %841, %845 : vector<1x4xf32>
    %847 = arith.mulf %11, %846 : vector<1x4xf32>
    %848 = arith.mulf %15, %340 : vector<1x4xf32>
    %849 = arith.addf %847, %848 : vector<1x4xf32>
    %850 = arith.subf %841, %849 : vector<1x4xf32>
    %851 = arith.subf %850, %845 : vector<1x4xf32>
    %852 = vector.broadcast %851 : vector<1x4xf32> to vector<48x4xf32>
    %853 = arith.mulf %18, %852 : vector<48x4xf32>
    %854 = arith.addf %853, %21 : vector<48x4xf32>
    %cst_157 = arith.constant dense<0.000000e+00> : vector<48x4xf32>
    %855 = tpu.matmul %25, %840, %cst_157 {dimension_numbers = #tpu.dot_dimension_numbers<[1], [0], [0], [1], [0, 0, 1, 1], [], []>} : vector<48x16xf32>, vector<16x4xf32>, vector<48x4xf32> -> vector<48x4xf32>
    %856 = arith.addf %855, %24 : vector<48x4xf32>
    %857 = vector.extract_strided_slice %854 {offsets = [0, 0], sizes = [16, 4], strides = [1, 1]} : vector<48x4xf32> to vector<16x4xf32>
    %858 = vector.extract_strided_slice %856 {offsets = [0, 0], sizes = [16, 4], strides = [1, 1]} : vector<48x4xf32> to vector<16x4xf32>
    %859 = arith.addf %857, %858 : vector<16x4xf32>
    %860 = arith.negf %859 : vector<16x4xf32>
    %861 = math.exp %860 : vector<16x4xf32>
    %cst_158 = arith.constant 1.000000e+00 : f32
    %862 = vector.broadcast %cst_158 : f32 to vector<16x4xf32>
    %863 = arith.addf %862, %861 : vector<16x4xf32>
    %864 = arith.divf %862, %863 : vector<16x4xf32>
    %865 = vector.extract_strided_slice %854 {offsets = [16, 0], sizes = [16, 4], strides = [1, 1]} : vector<48x4xf32> to vector<16x4xf32>
    %866 = vector.extract_strided_slice %856 {offsets = [16, 0], sizes = [16, 4], strides = [1, 1]} : vector<48x4xf32> to vector<16x4xf32>
    %867 = arith.addf %865, %866 : vector<16x4xf32>
    %868 = arith.negf %867 : vector<16x4xf32>
    %869 = math.exp %868 : vector<16x4xf32>
    %cst_159 = arith.constant 1.000000e+00 : f32
    %870 = vector.broadcast %cst_159 : f32 to vector<16x4xf32>
    %871 = arith.addf %870, %869 : vector<16x4xf32>
    %872 = arith.divf %870, %871 : vector<16x4xf32>
    %873 = vector.extract_strided_slice %854 {offsets = [32, 0], sizes = [16, 4], strides = [1, 1]} : vector<48x4xf32> to vector<16x4xf32>
    %874 = vector.extract_strided_slice %856 {offsets = [32, 0], sizes = [16, 4], strides = [1, 1]} : vector<48x4xf32> to vector<16x4xf32>
    %875 = arith.mulf %864, %874 : vector<16x4xf32>
    %876 = arith.addf %873, %875 : vector<16x4xf32>
    %877 = math.tanh %876 : vector<16x4xf32>
    %cst_160 = arith.constant 1.000000e+00 : f32
    %878 = vector.broadcast %cst_160 : f32 to vector<16x4xf32>
    %879 = arith.subf %878, %872 : vector<16x4xf32>
    %880 = arith.mulf %879, %877 : vector<16x4xf32>
    %881 = arith.mulf %872, %840 : vector<16x4xf32>
    %882 = arith.addf %880, %881 : vector<16x4xf32>
    %c20 = arith.constant 20 : index
    %c0_161 = arith.constant 0 : index
    %883 = vector.load %arg0[%c20, %c0_161] : memref<24x4xf32, #tpu.memory_space<vmem>>, vector<1x4xf32>
    %884 = arith.subf %883, %383 : vector<1x4xf32>
    %885 = arith.mulf %8, %884 : vector<1x4xf32>
    %886 = arith.mulf %13, %845 : vector<1x4xf32>
    %887 = arith.addf %885, %886 : vector<1x4xf32>
    %888 = arith.subf %883, %887 : vector<1x4xf32>
    %889 = arith.mulf %11, %888 : vector<1x4xf32>
    %890 = arith.mulf %15, %383 : vector<1x4xf32>
    %891 = arith.addf %889, %890 : vector<1x4xf32>
    %892 = arith.subf %883, %891 : vector<1x4xf32>
    %893 = arith.subf %892, %887 : vector<1x4xf32>
    %894 = vector.broadcast %893 : vector<1x4xf32> to vector<48x4xf32>
    %895 = arith.mulf %18, %894 : vector<48x4xf32>
    %896 = arith.addf %895, %21 : vector<48x4xf32>
    %cst_162 = arith.constant dense<0.000000e+00> : vector<48x4xf32>
    %897 = tpu.matmul %25, %882, %cst_162 {dimension_numbers = #tpu.dot_dimension_numbers<[1], [0], [0], [1], [0, 0, 1, 1], [], []>} : vector<48x16xf32>, vector<16x4xf32>, vector<48x4xf32> -> vector<48x4xf32>
    %898 = arith.addf %897, %24 : vector<48x4xf32>
    %899 = vector.extract_strided_slice %896 {offsets = [0, 0], sizes = [16, 4], strides = [1, 1]} : vector<48x4xf32> to vector<16x4xf32>
    %900 = vector.extract_strided_slice %898 {offsets = [0, 0], sizes = [16, 4], strides = [1, 1]} : vector<48x4xf32> to vector<16x4xf32>
    %901 = arith.addf %899, %900 : vector<16x4xf32>
    %902 = arith.negf %901 : vector<16x4xf32>
    %903 = math.exp %902 : vector<16x4xf32>
    %cst_163 = arith.constant 1.000000e+00 : f32
    %904 = vector.broadcast %cst_163 : f32 to vector<16x4xf32>
    %905 = arith.addf %904, %903 : vector<16x4xf32>
    %906 = arith.divf %904, %905 : vector<16x4xf32>
    %907 = vector.extract_strided_slice %896 {offsets = [16, 0], sizes = [16, 4], strides = [1, 1]} : vector<48x4xf32> to vector<16x4xf32>
    %908 = vector.extract_strided_slice %898 {offsets = [16, 0], sizes = [16, 4], strides = [1, 1]} : vector<48x4xf32> to vector<16x4xf32>
    %909 = arith.addf %907, %908 : vector<16x4xf32>
    %910 = arith.negf %909 : vector<16x4xf32>
    %911 = math.exp %910 : vector<16x4xf32>
    %cst_164 = arith.constant 1.000000e+00 : f32
    %912 = vector.broadcast %cst_164 : f32 to vector<16x4xf32>
    %913 = arith.addf %912, %911 : vector<16x4xf32>
    %914 = arith.divf %912, %913 : vector<16x4xf32>
    %915 = vector.extract_strided_slice %896 {offsets = [32, 0], sizes = [16, 4], strides = [1, 1]} : vector<48x4xf32> to vector<16x4xf32>
    %916 = vector.extract_strided_slice %898 {offsets = [32, 0], sizes = [16, 4], strides = [1, 1]} : vector<48x4xf32> to vector<16x4xf32>
    %917 = arith.mulf %906, %916 : vector<16x4xf32>
    %918 = arith.addf %915, %917 : vector<16x4xf32>
    %919 = math.tanh %918 : vector<16x4xf32>
    %cst_165 = arith.constant 1.000000e+00 : f32
    %920 = vector.broadcast %cst_165 : f32 to vector<16x4xf32>
    %921 = arith.subf %920, %914 : vector<16x4xf32>
    %922 = arith.mulf %921, %919 : vector<16x4xf32>
    %923 = arith.mulf %914, %882 : vector<16x4xf32>
    %924 = arith.addf %922, %923 : vector<16x4xf32>
    %c21 = arith.constant 21 : index
    %c0_166 = arith.constant 0 : index
    %925 = vector.load %arg0[%c21, %c0_166] : memref<24x4xf32, #tpu.memory_space<vmem>>, vector<1x4xf32>
    %926 = arith.subf %925, %426 : vector<1x4xf32>
    %927 = arith.mulf %8, %926 : vector<1x4xf32>
    %928 = arith.mulf %13, %887 : vector<1x4xf32>
    %929 = arith.addf %927, %928 : vector<1x4xf32>
    %930 = arith.subf %925, %929 : vector<1x4xf32>
    %931 = arith.mulf %11, %930 : vector<1x4xf32>
    %932 = arith.mulf %15, %426 : vector<1x4xf32>
    %933 = arith.addf %931, %932 : vector<1x4xf32>
    %934 = arith.subf %925, %933 : vector<1x4xf32>
    %935 = arith.subf %934, %929 : vector<1x4xf32>
    %936 = vector.broadcast %935 : vector<1x4xf32> to vector<48x4xf32>
    %937 = arith.mulf %18, %936 : vector<48x4xf32>
    %938 = arith.addf %937, %21 : vector<48x4xf32>
    %cst_167 = arith.constant dense<0.000000e+00> : vector<48x4xf32>
    %939 = tpu.matmul %25, %924, %cst_167 {dimension_numbers = #tpu.dot_dimension_numbers<[1], [0], [0], [1], [0, 0, 1, 1], [], []>} : vector<48x16xf32>, vector<16x4xf32>, vector<48x4xf32> -> vector<48x4xf32>
    %940 = arith.addf %939, %24 : vector<48x4xf32>
    %941 = vector.extract_strided_slice %938 {offsets = [0, 0], sizes = [16, 4], strides = [1, 1]} : vector<48x4xf32> to vector<16x4xf32>
    %942 = vector.extract_strided_slice %940 {offsets = [0, 0], sizes = [16, 4], strides = [1, 1]} : vector<48x4xf32> to vector<16x4xf32>
    %943 = arith.addf %941, %942 : vector<16x4xf32>
    %944 = arith.negf %943 : vector<16x4xf32>
    %945 = math.exp %944 : vector<16x4xf32>
    %cst_168 = arith.constant 1.000000e+00 : f32
    %946 = vector.broadcast %cst_168 : f32 to vector<16x4xf32>
    %947 = arith.addf %946, %945 : vector<16x4xf32>
    %948 = arith.divf %946, %947 : vector<16x4xf32>
    %949 = vector.extract_strided_slice %938 {offsets = [16, 0], sizes = [16, 4], strides = [1, 1]} : vector<48x4xf32> to vector<16x4xf32>
    %950 = vector.extract_strided_slice %940 {offsets = [16, 0], sizes = [16, 4], strides = [1, 1]} : vector<48x4xf32> to vector<16x4xf32>
    %951 = arith.addf %949, %950 : vector<16x4xf32>
    %952 = arith.negf %951 : vector<16x4xf32>
    %953 = math.exp %952 : vector<16x4xf32>
    %cst_169 = arith.constant 1.000000e+00 : f32
    %954 = vector.broadcast %cst_169 : f32 to vector<16x4xf32>
    %955 = arith.addf %954, %953 : vector<16x4xf32>
    %956 = arith.divf %954, %955 : vector<16x4xf32>
    %957 = vector.extract_strided_slice %938 {offsets = [32, 0], sizes = [16, 4], strides = [1, 1]} : vector<48x4xf32> to vector<16x4xf32>
    %958 = vector.extract_strided_slice %940 {offsets = [32, 0], sizes = [16, 4], strides = [1, 1]} : vector<48x4xf32> to vector<16x4xf32>
    %959 = arith.mulf %948, %958 : vector<16x4xf32>
    %960 = arith.addf %957, %959 : vector<16x4xf32>
    %961 = math.tanh %960 : vector<16x4xf32>
    %cst_170 = arith.constant 1.000000e+00 : f32
    %962 = vector.broadcast %cst_170 : f32 to vector<16x4xf32>
    %963 = arith.subf %962, %956 : vector<16x4xf32>
    %964 = arith.mulf %963, %961 : vector<16x4xf32>
    %965 = arith.mulf %956, %924 : vector<16x4xf32>
    %966 = arith.addf %964, %965 : vector<16x4xf32>
    %c22 = arith.constant 22 : index
    %c0_171 = arith.constant 0 : index
    %967 = vector.load %arg0[%c22, %c0_171] : memref<24x4xf32, #tpu.memory_space<vmem>>, vector<1x4xf32>
    %968 = arith.subf %967, %469 : vector<1x4xf32>
    %969 = arith.mulf %8, %968 : vector<1x4xf32>
    %970 = arith.mulf %13, %929 : vector<1x4xf32>
    %971 = arith.addf %969, %970 : vector<1x4xf32>
    %972 = arith.subf %967, %971 : vector<1x4xf32>
    %973 = arith.mulf %11, %972 : vector<1x4xf32>
    %974 = arith.mulf %15, %469 : vector<1x4xf32>
    %975 = arith.addf %973, %974 : vector<1x4xf32>
    %976 = arith.subf %967, %975 : vector<1x4xf32>
    %977 = arith.subf %976, %971 : vector<1x4xf32>
    %978 = vector.broadcast %977 : vector<1x4xf32> to vector<48x4xf32>
    %979 = arith.mulf %18, %978 : vector<48x4xf32>
    %980 = arith.addf %979, %21 : vector<48x4xf32>
    %cst_172 = arith.constant dense<0.000000e+00> : vector<48x4xf32>
    %981 = tpu.matmul %25, %966, %cst_172 {dimension_numbers = #tpu.dot_dimension_numbers<[1], [0], [0], [1], [0, 0, 1, 1], [], []>} : vector<48x16xf32>, vector<16x4xf32>, vector<48x4xf32> -> vector<48x4xf32>
    %982 = arith.addf %981, %24 : vector<48x4xf32>
    %983 = vector.extract_strided_slice %980 {offsets = [0, 0], sizes = [16, 4], strides = [1, 1]} : vector<48x4xf32> to vector<16x4xf32>
    %984 = vector.extract_strided_slice %982 {offsets = [0, 0], sizes = [16, 4], strides = [1, 1]} : vector<48x4xf32> to vector<16x4xf32>
    %985 = arith.addf %983, %984 : vector<16x4xf32>
    %986 = arith.negf %985 : vector<16x4xf32>
    %987 = math.exp %986 : vector<16x4xf32>
    %cst_173 = arith.constant 1.000000e+00 : f32
    %988 = vector.broadcast %cst_173 : f32 to vector<16x4xf32>
    %989 = arith.addf %988, %987 : vector<16x4xf32>
    %990 = arith.divf %988, %989 : vector<16x4xf32>
    %991 = vector.extract_strided_slice %980 {offsets = [16, 0], sizes = [16, 4], strides = [1, 1]} : vector<48x4xf32> to vector<16x4xf32>
    %992 = vector.extract_strided_slice %982 {offsets = [16, 0], sizes = [16, 4], strides = [1, 1]} : vector<48x4xf32> to vector<16x4xf32>
    %993 = arith.addf %991, %992 : vector<16x4xf32>
    %994 = arith.negf %993 : vector<16x4xf32>
    %995 = math.exp %994 : vector<16x4xf32>
    %cst_174 = arith.constant 1.000000e+00 : f32
    %996 = vector.broadcast %cst_174 : f32 to vector<16x4xf32>
    %997 = arith.addf %996, %995 : vector<16x4xf32>
    %998 = arith.divf %996, %997 : vector<16x4xf32>
    %999 = vector.extract_strided_slice %980 {offsets = [32, 0], sizes = [16, 4], strides = [1, 1]} : vector<48x4xf32> to vector<16x4xf32>
    %1000 = vector.extract_strided_slice %982 {offsets = [32, 0], sizes = [16, 4], strides = [1, 1]} : vector<48x4xf32> to vector<16x4xf32>
    %1001 = arith.mulf %990, %1000 : vector<16x4xf32>
    %1002 = arith.addf %999, %1001 : vector<16x4xf32>
    %1003 = math.tanh %1002 : vector<16x4xf32>
    %cst_175 = arith.constant 1.000000e+00 : f32
    %1004 = vector.broadcast %cst_175 : f32 to vector<16x4xf32>
    %1005 = arith.subf %1004, %998 : vector<16x4xf32>
    %1006 = arith.mulf %1005, %1003 : vector<16x4xf32>
    %1007 = arith.mulf %998, %966 : vector<16x4xf32>
    %1008 = arith.addf %1006, %1007 : vector<16x4xf32>
    %c23 = arith.constant 23 : index
    %c0_176 = arith.constant 0 : index
    %1009 = vector.load %arg0[%c23, %c0_176] : memref<24x4xf32, #tpu.memory_space<vmem>>, vector<1x4xf32>
    %1010 = arith.subf %1009, %512 : vector<1x4xf32>
    %1011 = arith.mulf %8, %1010 : vector<1x4xf32>
    %1012 = arith.mulf %13, %971 : vector<1x4xf32>
    %1013 = arith.addf %1011, %1012 : vector<1x4xf32>
    %1014 = arith.subf %1009, %1013 : vector<1x4xf32>
    %1015 = arith.mulf %11, %1014 : vector<1x4xf32>
    %1016 = arith.mulf %15, %512 : vector<1x4xf32>
    %1017 = arith.addf %1015, %1016 : vector<1x4xf32>
    %1018 = arith.subf %1009, %1017 : vector<1x4xf32>
    %1019 = arith.subf %1018, %1013 : vector<1x4xf32>
    %1020 = vector.broadcast %1019 : vector<1x4xf32> to vector<48x4xf32>
    %1021 = arith.mulf %18, %1020 : vector<48x4xf32>
    %1022 = arith.addf %1021, %21 : vector<48x4xf32>
    %cst_177 = arith.constant dense<0.000000e+00> : vector<48x4xf32>
    %1023 = tpu.matmul %25, %1008, %cst_177 {dimension_numbers = #tpu.dot_dimension_numbers<[1], [0], [0], [1], [0, 0, 1, 1], [], []>} : vector<48x16xf32>, vector<16x4xf32>, vector<48x4xf32> -> vector<48x4xf32>
    %1024 = arith.addf %1023, %24 : vector<48x4xf32>
    %1025 = vector.extract_strided_slice %1022 {offsets = [0, 0], sizes = [16, 4], strides = [1, 1]} : vector<48x4xf32> to vector<16x4xf32>
    %1026 = vector.extract_strided_slice %1024 {offsets = [0, 0], sizes = [16, 4], strides = [1, 1]} : vector<48x4xf32> to vector<16x4xf32>
    %1027 = arith.addf %1025, %1026 : vector<16x4xf32>
    %1028 = arith.negf %1027 : vector<16x4xf32>
    %1029 = math.exp %1028 : vector<16x4xf32>
    %cst_178 = arith.constant 1.000000e+00 : f32
    %1030 = vector.broadcast %cst_178 : f32 to vector<16x4xf32>
    %1031 = arith.addf %1030, %1029 : vector<16x4xf32>
    %1032 = arith.divf %1030, %1031 : vector<16x4xf32>
    %1033 = vector.extract_strided_slice %1022 {offsets = [16, 0], sizes = [16, 4], strides = [1, 1]} : vector<48x4xf32> to vector<16x4xf32>
    %1034 = vector.extract_strided_slice %1024 {offsets = [16, 0], sizes = [16, 4], strides = [1, 1]} : vector<48x4xf32> to vector<16x4xf32>
    %1035 = arith.addf %1033, %1034 : vector<16x4xf32>
    %1036 = arith.negf %1035 : vector<16x4xf32>
    %1037 = math.exp %1036 : vector<16x4xf32>
    %cst_179 = arith.constant 1.000000e+00 : f32
    %1038 = vector.broadcast %cst_179 : f32 to vector<16x4xf32>
    %1039 = arith.addf %1038, %1037 : vector<16x4xf32>
    %1040 = arith.divf %1038, %1039 : vector<16x4xf32>
    %1041 = vector.extract_strided_slice %1022 {offsets = [32, 0], sizes = [16, 4], strides = [1, 1]} : vector<48x4xf32> to vector<16x4xf32>
    %1042 = vector.extract_strided_slice %1024 {offsets = [32, 0], sizes = [16, 4], strides = [1, 1]} : vector<48x4xf32> to vector<16x4xf32>
    %1043 = arith.mulf %1032, %1042 : vector<16x4xf32>
    %1044 = arith.addf %1041, %1043 : vector<16x4xf32>
    %1045 = math.tanh %1044 : vector<16x4xf32>
    %cst_180 = arith.constant 1.000000e+00 : f32
    %1046 = vector.broadcast %cst_180 : f32 to vector<16x4xf32>
    %1047 = arith.subf %1046, %1040 : vector<16x4xf32>
    %1048 = arith.mulf %1047, %1045 : vector<16x4xf32>
    %1049 = arith.mulf %1040, %1008 : vector<16x4xf32>
    %1050 = arith.addf %1048, %1049 : vector<16x4xf32>
    %c0_181 = arith.constant 0 : index
    %c0_182 = arith.constant 0 : index
    %1051 = vector.load %arg7[%c0_181, %c0_182] : memref<12x16xf32, #tpu.memory_space<vmem>>, vector<12x16xf32>
    %cst_183 = arith.constant dense<0.000000e+00> : vector<12x4xf32>
    %1052 = tpu.matmul %1051, %1050, %cst_183 {dimension_numbers = #tpu.dot_dimension_numbers<[1], [0], [0], [1], [0, 0, 1, 1], [], []>} : vector<12x16xf32>, vector<16x4xf32>, vector<12x4xf32> -> vector<12x4xf32>
    %c0_184 = arith.constant 0 : index
    %c0_185 = arith.constant 0 : index
    %1053 = vector.load %arg8[%c0_184, %c0_185] : memref<12x1xf32, #tpu.memory_space<vmem>>, vector<12x1xf32>
    %1054 = vector.shape_cast %1053 : vector<12x1xf32> to vector<12x1xf32>
    %1055 = vector.broadcast %1054 : vector<12x1xf32> to vector<12x4xf32>
    %1056 = arith.addf %1052, %1055 : vector<12x4xf32>
    %c0_186 = arith.constant 0 : index
    %c0_187 = arith.constant 0 : index
    %1057 = vector.load %arg10[%c0_186, %c0_187] : memref<12x4xf32, #tpu.memory_space<vmem>>, vector<12x4xf32>
    %1058 = vector.broadcast %1013 : vector<1x4xf32> to vector<12x4xf32>
    %1059 = arith.addf %1058, %1057 : vector<12x4xf32>
    %1060 = arith.addf %1059, %1056 : vector<12x4xf32>
    %c0_188 = arith.constant 0 : index
    %c0_189 = arith.constant 0 : index
    %1061 = vector.load %arg9[%c0_188, %c0_189] : memref<12x4xf32, #tpu.memory_space<vmem>>, vector<12x4xf32>
    tpu.vector_store %arg9[%c0_188, %c0_189], %1060 {strides = array<i32>} : memref<12x4xf32, #tpu.memory_space<vmem>>, vector<12x4xf32>,
    return
  }
}

</mosaic_0001>

<bundles_post_ra>
// kernel: es_rnn_forward.1
= control target key start
LH: loop header
LB: loop body
LE: loop exit
PB: predicated region body
PF: predicated region fallthrough
CT: control target
= control target key end

     0   :  { %vm192_vm0 = vcmask 130048   ;;  %v5782_v0 = vmov 0.0   ;;  %v5783_v1 = vmov 0   ;;  %vm172_vm1 = vcmask 24576   ;;  %s7648_s4 = inlined_call_operand.vmem [shape: f32[48,16], index: 4, kind: input, shape index: {}]   ;;  %s7649_s3 = inlined_call_operand.vmem [shape: f32[48,1], index: 3, kind: input, shape index: {}]   ;;  %s7650_s2 = inlined_call_operand.vmem [shape: f32[2,1], index: 2, kind: input, shape index: {}]   ;;  %s7651_s6 = inlined_call_operand.vmem [shape: f32[48,1], index: 6, kind: input, shape index: {}]   ;;  %s7652_s5 = inlined_call_operand.vmem [shape: f32[48,1], index: 5, kind: input, shape index: {}]   ;;  %s7653_s8 = inlined_call_operand.vmem [shape: f32[12,1], index: 8, kind: input, shape index: {}]   ;;  %s7654_s1 = inlined_call_operand.vmem [shape: f32[12,4], index: 1, kind: input, shape index: {}]   ;;  %s7655_s0 = inlined_call_operand.vmem [shape: f32[24,4], index: 0, kind: input, shape index: {}]   ;;  %s7656_s7 = inlined_call_operand.vmem [shape: f32[12,16], index: 7, kind: input, shape index: {}]   ;;  %s7657_s9 = inlined_call_operand.vmem [shape: f32[12,4], index: 9, kind: output, shape index: {}]  }
   0x1   :  { %4857 = vmatprep.subr.mxu0 %v5782_v0  ;;  %5272 = vset.pattern.permute.xlu0 %v5783_v1  ;;  %v5837_v2 = vld [vmem:[%s7648_s4] sm:$0xff]  ;;  %v5845_v4 = vld [vmem:[%s7648_s4 + $0x8] sm:$0xff]  ;;  %v5852_v5 = vld [vmem:[%s7648_s4 + $0x10] sm:$0xff]  ;;  %vm363_vm2 = vcmask 25601   ;;  %vm4413_vm3 = vcmask 27648   ;;  %vm4411_vm4 = vcmask 31744  }
   0x2   :  { %v45_v3 = vld [vmem:[%s7649_s3] sm:$0xff]  ;;  %4858 = vmatpush3.msra.mxu0 %v5782_v0  ;;  %4859 = vmatprep.mubr.msk.f32.mxu0 %vm192_vm0, %v5837_v2  ;;  %v46_v6 = vld [vmem:[%s7649_s3 + $0x8] sm:$0xff]  ;;  %v5864_v7 = vld [vmem:[%s7648_s4 + $0x18] sm:$0xff] }
   0x3   :  { %53 = vperm.xlu0 %5272, %v45_v3   ;;  %4860 = vmatmul.mubr.msk.f32.vlgmr.msra.gmra.mrb[0].mxu0 %vm192_vm0, %v5845_v4  ;;  %v5869_v8 = vld [vmem:[%s7648_s4 + $0x20] sm:$0xff]  ;;  %v5889_v13 = vld [vmem:[%s7648_s4 + $0x28] sm:$0xff]  ;;  %v47_v15 = vld [vmem:[%s7649_s3 + $0x10] sm:$0xff] }
   0x4   :  { %4862 = vmatprep.mubr.msk.f32.mxu0 %vm192_vm0, %v5852_v5  ;;  %5273 = vset.pattern.permute.xlu1 %v5783_v1  ;;  %v32_v9 = vld [vmem:[%s7650_s2] sm:$0x3]  ;;  %v82_v14 = vld [vmem:[%s7652_s5 + $0x8] sm:$0xff]  ;;  %v83_v17 = vld [vmem:[%s7652_s5 + $0x10] sm:$0xff] }
   0x5   :  { %4872 = vmatprep.mubr.msk.f32.mxu1 %vm192_vm0, %v5837_v2  ;;  %v81_v10 = vld [vmem:[%s7652_s5] sm:$0xff]  ;;  %v4419_v11 = vmul.f32 -1.442695, %v32_v9  ;;  %v118_v16 = vld [vmem:[%s7651_s6 + $0x8] sm:$0xff]  ;;  %v48_v18 = vld [vmem:[%s7649_s3 + $0x18] sm:$0xff] }
   0x6   :  { %v117_v12 = vld [vmem:[%s7651_s6] sm:$0xff]  ;;  %89 = vperm.xlu1 %5273, %v81_v10   ;;  %v119_v20 = vld [vmem:[%s7651_s6 + $0x10] sm:$0xff]  ;;  %v84_v21 = vld [vmem:[%s7652_s5 + $0x18] sm:$0xff] }
   0x7   :  { %58 = vperm.xlu0 %5272, %v46_v6   ;;  %4863 = vmatmul.mubr.msk.f32.gmra.mrb[2].mxu0 %vm192_vm0, %v5864_v7  ;;  %5274 = vpow2.f32 %v4419_v11  ;;  %v49_v23 = vld [vmem:[%s7649_s3 + $0x20] sm:$0xff]  ;;  %v120_v24 = vld [vmem:[%s7651_s6 + $0x18] sm:$0xff]  ;;  %v50_v26 = vld [vmem:[%s7649_s3 + $0x28] sm:$0xff] }
   0x8   :  { %4865 = vmatprep.mubr.msk.f32.mxu0 %vm192_vm0, %v5869_v8  ;;  %v121_v25 = vld [vmem:[%s7651_s6 + $0x20] sm:$0xff]  ;;  %v122_v28 = vld [vmem:[%s7651_s6 + $0x28] sm:$0xff] }
   0x9   :  { %v85_v27 = vld [vmem:[%s7652_s5 + $0x20] sm:$0xff]  ;;  %v86_v30 = vld [vmem:[%s7652_s5 + $0x28] sm:$0xff] }
   0xa   :  { %94 = vperm.xlu1 %5273, %v82_v14   ;;  %v4309_v31 = vld [vmem:[%s7653_s8 + $0x8] sm:$0xf]  ;;  %v4308_v32 = vld [vmem:[%s7653_s8] sm:$0xff] }
   0xb   :  { %125 = vperm.xlu0 %5272, %v117_v12   ;;  %4866 = vmatmul.mubr.msk.f32.gmra.mrb[4].mxu0 %vm192_vm0, %v5889_v13  ;;  %v5946_v33 = vld [vmem:[%s7654_s1] sm:$0x1]  ;;  %v160_v42 = vld [vmem:[%s7654_s1 + $0x1] sm:$0x1]  ;;  %v161_v46 = vld [vmem:[%s7654_s1 + $0x2] sm:$0x1] }
   0xc   :  { %4885 = vmatprep.mubr.msk.f32.mxu0 %vm192_vm0, %v5837_v2  ;;  %7703 = vst [vmem:[#allocation3_spill] sm:$0xff] %v5946_v33  ;;  %173 = vst.msk [vmem:[#allocation2] sm:$0x1] %vm172_vm1, %v5946_v33  ;;  %v348_v43 = vld [vmem:[%s7655_s0 + $0x1] sm:$0x1]  ;;  %v359_v57 = vrot.slane %v160_v42, 7 }
   0xd   :  { %v349_v45 = vsub.f32 %v348_v43, %v160_v42  ;;  %v523_v47 = vld [vmem:[%s7655_s0 + $0x2] sm:$0x1]  ;;  %v5984_v49 = vld [vmem:[%s7655_s0] sm:$0x1]  ;;  %v162_v53 = vld [vmem:[%s7654_s1 + $0x3] sm:$0x1] }
   0xe   :  { %130 = vperm.xlu1 %5273, %v118_v16   ;;  %v524_v52 = vsub.f32 %v523_v47, %v161_v46  ;;  %v697_v54 = vld [vmem:[%s7655_s0 + $0x3] sm:$0x1]  ;;  %v163_v60 = vld [vmem:[%s7654_s1 + $0x4] sm:$0x1]  ;;  %v534_v0 = vrot.slane %v161_v46, 7 }
   0xf   :  { %63 = vperm.xlu0 %5272, %v47_v15   ;;  %v698_v59 = vsub.f32 %v697_v54, %v162_v53  ;;  %v6007_v61 = vld [vmem:[%s7655_s0 + $0x4] sm:$0x1]  ;;  %v708_v15 = vrot.slane %v162_v53, 7 }
  0x10   :  { %v872_v1 = vsub.f32 %v6007_v61, %v163_v60 }
  0x11   :  { %v5275_v19 = vpop.eup %5274 }
  0x12   :  { %68 = vperm.xlu1 %5273, %v48_v18   ;;  %v36_v22 = vadd.f32 1.0, %v5275_v19 }
  0x13   :  { %99 = vperm.xlu0 %5272, %v83_v17  }
  0x14   :  { %5276 = vrcp.f32 %v36_v22  ;;  %v6033_v22 = vld [vmem:[%s7655_s0 + $0x5] sm:$0x1] }
  0x16   :  { %104 = vperm.xlu1 %5273, %v84_v21   ;;  %v164_v21 = vld [vmem:[%s7654_s1 + $0x5] sm:$0x1] }
  0x17   :  { %135 = vperm.xlu0 %5272, %v119_v20  }
  0x1a   :  { %140 = vperm.xlu1 %5273, %v120_v24  }
  0x1b   :  { %73 = vperm.xlu0 %5272, %v49_v23  }
  0x1e   :  { %78 = vperm.xlu1 %5273, %v50_v26   ;;  %v5277_v29 = vpop.eup %5276 }
  0x1f   :  { %145 = vperm.xlu0 %5272, %v121_v25  }
  0x22   :  { %150 = vperm.xlu1 %5273, %v122_v28   ;;  %v1046_v28 = vsub.f32 %v6033_v22, %v164_v21 }
  0x23   :  { %109 = vperm.xlu0 %5272, %v85_v27  }
  0x26   :  { %114 = vperm.xlu1 %5273, %v86_v30  }
  0x27   :  { %41 = vperm.xlu0 %5272, %v5277_v29  }
  0x2a   :  { %4312 = vperm.xlu1 %5273, %v4308_v32  }
  0x2b   :  { %4317 = vperm.xlu0 %5272, %v4309_v31  }
  0x82   :  { %v5949_v34 = vpop.permute.xlu0 %53 }
  0x86   :  { %v5951_v35 = vpop.permute.xlu0 %58 }
  0x8a   :  { %v5953_v36 = vpop.permute.xlu0 %125 }
  0x8e   :  { %v5955_v37 = vpop.permute.xlu0 %63 }
  0x92   :  { %v5957_v38 = vpop.permute.xlu0 %99 }
  0x96   :  { %v5959_v39 = vpop.permute.xlu0 %135 }
  0x9a   :  { %v5961_v40 = vpop.permute.xlu0 %73 }
  0x9e   :  { %v5963_v41 = vpop.permute.xlu0 %145 }
  0xa2   :  { %v5971_v44 = vpop.permute.xlu0 %109 }
  0xa6   :  { %v5979_v48 = vpop.permute.xlu0 %41 }
  0xa7   :  { %v5987_v50 = vsub.f32 1.0, %v5979_v48  ;;  %v350_v51 = vmul.f32 %v349_v45, %v5979_v48  ;;  %v525_v58 = vmul.f32 %v524_v52, %v5979_v48  ;;  %v699_v10 = vmul.f32 %v698_v59, %v5979_v48  ;;  %v165_v59 = vld [vmem:[%s7654_s1 + $0x6] sm:$0x1] }
  0xa8   :  { %v873_v16 = vmul.f32 %v872_v1, %v5979_v48 }
  0xa9   :  { %v351_v55 = vmul.f32 %v5984_v49, %v5987_v50  ;;  %v361_v6 = vmul.f32 %v359_v57, %v5987_v50  ;;  %v536_v19 = vmul.f32 %v534_v0, %v5987_v50  ;;  %v710_v27 = vmul.f32 %v708_v15, %v5987_v50 }
  0xaa   :  { %v1056_v15 = vrot.slane %v164_v21, 7 }
  0xab   :  { %v5998_v56 = vadd.f32 %v351_v55, %v350_v51  ;;  %v1047_v55 = vmul.f32 %v1046_v28, %v5979_v48 }
  0xad   :  { %v353_v62 = vsub.f32 %v348_v43, %v5998_v56  ;;  %v526_v63 = vmul.f32 %v5998_v56, %v5987_v50 }
  0xaf   :  { %v355_v3 = vrot.slane %v353_v62, 7  ;;  %v6014_v9 = vadd.f32 %v526_v63, %v525_v58  ;;  %v6069_v58 = vpop.permute.xlu1 %89 }
  0xb1   :  { %7704 = vst [vmem:[#allocation4_spill] sm:$0xff] %v6014_v9  ;;  %v357_v11 = vmul.f32 %v355_v3, %v5979_v48  ;;  %v528_v12 = vsub.f32 %v523_v47, %v6014_v9  ;;  %v700_v14 = vmul.f32 %v6014_v9, %v5987_v50 }
  0xb3   :  { %v6022_v17 = vadd.f32 %v361_v6, %v357_v11  ;;  %v530_v18 = vrot.slane %v528_v12, 7  ;;  %v6025_v20 = vadd.f32 %v700_v14, %v699_v10  ;;  %v6093_v11 = vpop.permute.xlu1 %94  ;;  %v176_v12 = vlaneseq }
  0xb5   :  { %7705 = vst [vmem:[#allocation5_spill] sm:$0xff] %v6025_v20  ;;  %v7662_v23 = vrot.slane %v6022_v17, 1  ;;  %v532_v24 = vmul.f32 %v530_v18, %v5979_v48  ;;  %v702_v25 = vsub.f32 %v697_v54, %v6025_v20  ;;  %v874_v26 = vmul.f32 %v6025_v20, %v5987_v50  ;;  %364 = vst.msk [vmem:[#allocation2] sm:$0x2] %vm363_vm2, %v6022_v17 }
  0xb7   :  { %v6046_v29 = vsub.f32 %v348_v43, %v7662_v23  ;;  %v6048_v30 = vadd.f32 %v536_v19, %v532_v24  ;;  %v704_v31 = vrot.slane %v702_v25, 7  ;;  %v6050_v32 = vadd.f32 %v874_v26, %v873_v16  ;;  %v166_v24 = vld [vmem:[%s7654_s1 + $0x7] sm:$0x1] }
  0xb8   :  { %v882_v43 = vrot.slane %v163_v60, 7  ;;  %v6077_v60 = vld [vmem:[%s7655_s0 + $0x6] sm:$0x1]  ;;  %v6110_v25 = vld [vmem:[%s7655_s0 + $0x7] sm:$0x1] }
  0xb9   :  { %7706 = vst [vmem:[#allocation6_spill] sm:$0xff] %v6050_v32  ;;  %v7661_v45 = vrot.slane %v6048_v30, 1  ;;  %v706_v46 = vmul.f32 %v704_v31, %v5979_v48  ;;  %v876_v51 = vsub.f32 %v6007_v61, %v6050_v32  ;;  %538 = vst.msk [vmem:[#allocation2 + $0x1] sm:$0x2] %vm363_vm2, %v6048_v30  ;;  %v1048_v57 = vmul.f32 %v6050_v32, %v5987_v50 }
  0xba   :  { %v884_v0 = vmul.f32 %v882_v43, %v5987_v50  ;;  %v1220_v3 = vsub.f32 %v6077_v60, %v165_v59  ;;  %v1394_v28 = vsub.f32 %v6110_v25, %v166_v24  ;;  %v174_v31 = vsub.f32 %v5984_v49, %v5946_v33  ;;  %v6121_v43 = vpop.permute.xlu1 %130 }
  0xbb   :  { %v6062_v52 = vsub.f32 %v523_v47, %v7661_v45  ;;  %v6064_v53 = vadd.f32 %v710_v27, %v706_v46  ;;  %v878_v47 = vrot.slane %v876_v51, 7  ;;  %v6085_v1 = vadd.f32 %v1048_v57, %v1047_v55 }
  0xbc   :  { %v1221_v19 = vmul.f32 %v1220_v3, %v5979_v48  ;;  %v1058_v27 = vmul.f32 %v1056_v15, %v5987_v50  ;;  %v177_v46 = vshrl.u32 %v176_v12, 7  ;;  %v175_v12 = vsub.f32 %v174_v31, %v5984_v49 }
  0xbd   :  { %7707 = vst [vmem:[#allocation7_spill] sm:$0xff] %v6062_v52  ;;  %712 = vst.msk [vmem:[#allocation2 + $0x2] sm:$0x2] %vm363_vm2, %v6064_v53  ;;  %v7660_v63 = vrot.slane %v6064_v53, 1  ;;  %v880_v10 = vmul.f32 %v878_v47, %v5979_v48  ;;  %v1050_v14 = vsub.f32 %v6033_v22, %v6085_v1  ;;  %v1230_v47 = vrot.slane %v165_v59, 7 }
  0xbe   :  { %7708 = vst [vmem:[#allocation8_spill] sm:$0xff] %v6085_v1  ;;  %v6144_v59 = vld [vmem:[%s7654_s1 + $0x8] sm:$0x1] }
  0xbf   :  { %v6090_v6 = vsub.f32 %v697_v54, %v7660_v63  ;;  %v6099_v18 = vadd.f32 %v884_v0, %v880_v10  ;;  %v1222_v54 = vmul.f32 %v6085_v1, %v5987_v50  ;;  %v1052_v26 = vrot.slane %v1050_v14, 7 }
  0xc0   :  { %v1395_v10 = vmul.f32 %v1394_v28, %v5979_v48  ;;  %v6135_v14 = vsub.s32 0, %v177_v46 }
  0xc1   :  { %7709 = vst [vmem:[#allocation9_spill] sm:$0xff] %v6090_v6  ;;  %v7659_v21 = vrot.slane %v6099_v18, 1  ;;  %886 = vst.msk [vmem:[#allocation2 + $0x3] sm:$0x2] %vm363_vm2, %v6099_v18  ;;  %v6119_v51 = vadd.f32 %v1222_v54, %v1221_v19  ;;  %v1054_v57 = vmul.f32 %v1052_v26, %v5979_v48  ;;  %v6149_v19 = vld [vmem:[%s7655_s0 + $0x8] sm:$0x1]  ;;  %v1232_v26 = vmul.f32 %v1230_v47, %v5987_v50 }
  0xc2   :  { %v1568_v31 = vsub.f32 %v6149_v19, %v6144_v59  ;;  %v6162_v46 = vrot.slane %v175_v12, %v6135_v14 }
  0xc3   :  { %7710 = vst [vmem:[#allocation10_spill] sm:$0xff] %v6119_v51  ;;  %v6126_v55 = vsub.f32 %v6007_v61, %v7659_v21  ;;  %v6131_v3 = vadd.f32 %v1058_v27, %v1054_v57  ;;  %v1224_v15 = vsub.f32 %v6077_v60, %v6119_v51  ;;  %v1396_v61 = vmul.f32 %v6119_v51, %v5987_v50  ;;  %v6155_v27 = vpop.permute.xlu1 %68 }
  0xc4   :  { %v1569_v16 = vmul.f32 %v1568_v31, %v5979_v48 }
  0xc5   :  { %7711 = vst [vmem:[#allocation11_spill] sm:$0xff] %v6126_v55  ;;  %v7658_v49 = vrot.slane %v6131_v3, 1  ;;  %1060 = vst.msk [vmem:[#allocation2 + $0x4] sm:$0x2] %vm363_vm2, %v6131_v3  ;;  %v1226_v54 = vrot.slane %v1224_v15, 7  ;;  %v6157_v28 = vadd.f32 %v1396_v61, %v1395_v10  ;;  %v1404_v10 = vrot.slane %v166_v24, 7 }
  0xc6   :  { %v6190_v24 = vld [vmem:[%s7655_s0 + $0x9] sm:$0x1]  ;;  %v1578_v55 = vrot.slane %v6144_v59, 7 }
  0xc7   :  { %7712 = vst [vmem:[#allocation12_spill] sm:$0xff] %v6157_v28  ;;  %v6167_v57 = vsub.f32 %v6033_v22, %v7658_v49  ;;  %v1228_v0 = vmul.f32 %v1226_v54, %v5979_v48  ;;  %v1398_v61 = vsub.f32 %v6110_v25, %v6157_v28  ;;  %v1570_v12 = vmul.f32 %v6157_v28, %v5987_v50  ;;  %v6185_v54 = vld [vmem:[%s7654_s1 + $0x9] sm:$0x1] }
  0xc8   :  { %v181_v22 = vmul.f32 %v6162_v46, %v5951_v35  ;;  %v1406_v47 = vmul.f32 %v1404_v10, %v5987_v50  ;;  %v1742_v45 = vsub.f32 %v6190_v24, %v6185_v54  ;;  %v183_v10 = vmul.f32 %v6162_v46, %v6155_v27 }
  0xc9   :  { %7713 = vst [vmem:[#allocation13_spill] sm:$0xff] %v6167_v57  ;;  %v6172_v15 = vadd.f32 %v1232_v26, %v1228_v0  ;;  %v6194_v0 = vpop.permute.xlu1 %104  ;;  %v180_v26 = vmul.f32 %v6162_v46, %v5949_v34  ;;  %v1400_v31 = vrot.slane %v1398_v61, 7  ;;  %v6205_v63 = vadd.f32 %v1570_v12, %v1569_v16 }
  0xca   :  { %v187_v23 = vadd.f32 %v181_v22, %v6093_v11  ;;  %v6229_v22 = vld [vmem:[%s7655_s0 + $0xa] sm:$0x1]  ;;  %v189_v12 = vadd.f32 %v183_v10, %v6194_v0 }
  0xcb   :  { %v7665_v62 = vrot.slane %v6172_v15, 1  ;;  %1234 = vst.msk [vmem:[#allocation2 + $0x5] sm:$0x2] %vm363_vm2, %v6172_v15  ;;  %v1402_v21 = vmul.f32 %v1400_v31, %v5979_v48  ;;  %7715 = vst [vmem:[#allocation15_spill] sm:$0xff] %v6205_v63  ;;  %v186_v57 = vadd.f32 %v180_v26, %v6069_v58  ;;  %v182_v31 = vmul.f32 %v6162_v46, %v5955_v37 }
  0xcd   :  { %v6202_v49 = vsub.f32 %v6077_v60, %v7665_v62  ;;  %v6219_v62 = vadd.f32 %v1406_v47, %v1402_v21  ;;  %v6231_v26 = vpop.permute.xlu1 %140  ;;  %v1744_v21 = vmul.f32 %v6205_v63, %v5987_v50 }
  0xce   :  { %7716 = vst [vmem:[#allocation16_spill] sm:$0xff] %v6231_v26 }
  0xcf   :  { %7714 = vst [vmem:[#allocation14_spill] sm:$0xff] %v6202_v49  ;;  %1408 = vst.msk [vmem:[#allocation2 + $0x6] sm:$0x2] %vm363_vm2, %v6219_v62  ;;  %v7676_v10 = vrot.slane %v6219_v62, 1 }
  0xd6   :  { %v4861_v42 = vpop.f32.mrb[0].mxu0 }
  0xd7   :  { %v283_v1 = vadd.f32 %v4861_v42, %v6121_v43  ;;  %v277_v61 = vpop.f32.mrb[1].mxu0  ;;  %v6224_v42 = vld [vmem:[%s7654_s1 + $0xa] sm:$0x1] }
  0xd8   :  { %v278_v60 = vadd.f32 %v277_v61, %v5953_v36 }
  0xd9   :  { %v307_v16 = vadd.f32 %v283_v1, %v187_v23  ;;  %v1572_v23 = vsub.f32 %v6149_v19, %v6205_v63  ;;  %v1743_v1 = vmul.f32 %v1742_v45, %v5979_v48  ;;  %v1916_v45 = vsub.f32 %v6229_v22, %v6224_v42 }
  0xda   :  { %v306_v61 = vadd.f32 %v278_v60, %v186_v57  ;;  %v4864_v32 = vpop.f32.mrb[2].mxu0  ;;  %v188_v60 = vadd.f32 %v182_v31, %v5957_v38 }
  0xdb   :  { %v4427_v47 = vmul.f32 -1.442695, %v307_v16  ;;  %v293_v51 = vadd.f32 %v4864_v32, %v6231_v26  ;;  %v287_v49 = vpop.f32.mrb[3].mxu0  ;;  %v1574_v9 = vrot.slane %v1572_v23, 7  ;;  %v6248_v59 = vadd.f32 %v1744_v21, %v1743_v1 }
  0xdc   :  { %v4426_v57 = vmul.f32 -1.442695, %v306_v61  ;;  %v288_v20 = vadd.f32 %v287_v49, %v5959_v39  ;;  %v1580_v61 = vmul.f32 %v1578_v55, %v5987_v50  ;;  %v1917_v31 = vmul.f32 %v1916_v45, %v5979_v48  ;;  %v6255_v49 = vld [vmem:[%s7654_s1 + $0xb] sm:$0x1] }
  0xdd   :  { %5278 = vpow2.f32 %v4427_v47  ;;  %v321_v16 = vadd.f32 %v293_v51, %v189_v12  ;;  %7717 = vst [vmem:[#allocation17_spill] sm:$0xff] %v6248_v59  ;;  %v6260_v51 = vld [vmem:[%s7655_s0 + $0xb] sm:$0x1]  ;;  %v6265_v12 = vsub.f32 %v6110_v25, %v7676_v10  ;;  %v1576_v55 = vmul.f32 %v1574_v9, %v5979_v48 }
  0xde   :  { %5280 = vpow2.f32 %v4426_v57  ;;  %v320_v32 = vadd.f32 %v288_v20, %v188_v60  ;;  %v4867_v6 = vpop.f32.mrb[4].mxu0  ;;  %v1746_v23 = vsub.f32 %v6190_v24, %v6248_v59  ;;  %v1918_v1 = vmul.f32 %v6248_v59, %v5987_v50 }
  0xdf   :  { %v297_v52 = vpop.f32.mrb[5].mxu0  ;;  %v4429_v26 = vmul.f32 -1.442695, %v321_v16  ;;  %7718 = vst [vmem:[#allocation18_spill] sm:$0xff] %v6265_v12  ;;  %v1752_v47 = vrot.slane %v6185_v54, 7  ;;  %v2090_v57 = vsub.f32 %v6260_v51, %v6255_v49  ;;  %v6277_v60 = vadd.f32 %v1580_v61, %v1576_v55  ;;  %v6288_v61 = vpop.permute.xlu1 %78 }
  0xe0   :  { %v4428_v20 = vmul.f32 -1.442695, %v320_v32  ;;  %v1748_v25 = vrot.slane %v1746_v23, 7  ;;  %v6279_v45 = vadd.f32 %v1918_v1, %v1917_v31 }
  0xe1   :  { %5282 = vpow2.f32 %v4429_v26  ;;  %v7678_v9 = vrot.slane %v6277_v60, 1  ;;  %1582 = vst.msk [vmem:[#allocation2 + $0x7] sm:$0x2] %vm363_vm2, %v6277_v60  ;;  %v1754_v54 = vmul.f32 %v1752_v47, %v5987_v50  ;;  %v1926_v47 = vrot.slane %v6224_v42, 7 }
  0xe2   :  { %5284 = vpow2.f32 %v4428_v20  ;;  %v1750_v32 = vmul.f32 %v1748_v25, %v5979_v48  ;;  %v1920_v21 = vsub.f32 %v6229_v22, %v6279_v45  ;;  %v2091_v20 = vmul.f32 %v2090_v57, %v5979_v48 }
  0xe3   :  { %v6293_v31 = vsub.f32 %v6149_v19, %v7678_v9  ;;  %v2092_v23 = vmul.f32 %v6279_v45, %v5987_v50 }
  0xe4   :  { %v6301_v10 = vadd.f32 %v1754_v54, %v1750_v32 }
  0xe5   :  { %7719 = vst [vmem:[#allocation19_spill] sm:$0xff] %v6293_v31  ;;  %v6303_v28 = vadd.f32 %v2092_v23, %v2091_v20  ;;  %v185_v23 = vmul.f32 %v6162_v46, %v6288_v61 }
  0xe6   :  { %v7681_v19 = vrot.slane %v6301_v10, 1  ;;  %1756 = vst.msk [vmem:[#allocation2 + $0x8] sm:$0x2] %vm363_vm2, %v6301_v10 }
  0xe7   :  { %v5279_v16 = vpop.eup %5278  ;;  %7720 = vst [vmem:[#allocation20_spill] sm:$0xff] %v6303_v28  ;;  %v2094_v32 = vsub.f32 %v6260_v51, %v6303_v28 }
  0xe8   :  { %v5281_v26 = vpop.eup %5280  ;;  %v315_v55 = vadd.f32 1.0, %v5279_v16  ;;  %v1922_v16 = vrot.slane %v1920_v21, 7  ;;  %v2263_v21 = vld [vmem:[%s7655_s0 + $0xc] sm:$0x1]  ;;  %v6320_v54 = vsub.f32 %v6190_v24, %v7681_v19 }
  0xe9   :  { %v314_v1 = vadd.f32 1.0, %v5281_v26  ;;  %v2264_v63 = vsub.f32 %v2263_v21, %v5946_v33  ;;  %v2096_v19 = vrot.slane %v2094_v32, 7  ;;  %v2436_v32 = vld [vmem:[%s7655_s0 + $0xd] sm:$0x1] }
  0xea   :  { %5286 = vrcp.f32 %v315_v55  ;;  %v1924_v57 = vmul.f32 %v1922_v16, %v5979_v48  ;;  %v6309_v55 = vpop.permute.xlu1 %150  ;;  %7721 = vst [vmem:[#allocation21_spill] sm:$0xff] %v6320_v54 }
  0xeb   :  { %5288 = vrcp.f32 %v314_v1  ;;  %v5283_v26 = vpop.eup %5282  ;;  %v1928_v1 = vmul.f32 %v1926_v47, %v5987_v50  ;;  %v184_v47 = vmul.f32 %v6162_v46, %v5961_v40  ;;  %v303_v31 = vadd.f32 %v4867_v6, %v6309_v55 }
  0xec   :  { %v5285_v42 = vpop.eup %5284  ;;  %v329_v20 = vadd.f32 1.0, %v5283_v26  ;;  %v2266_v46 = vmul.f32 %v6303_v28, %v5987_v50  ;;  %v2100_v6 = vrot.slane %v6255_v49, 7  ;;  %v2776_v28 = vld [vmem:[%s7655_s0 + $0xf] sm:$0x1] }
  0xed   :  { %v6324_v16 = vadd.f32 %v1928_v1, %v1924_v57  ;;  %v328_v25 = vadd.f32 1.0, %v5285_v42  ;;  %v298_v42 = vadd.f32 %v297_v52, %v5963_v41  ;;  %v190_v24 = vadd.f32 %v184_v47, %v5971_v44 }
  0xee   :  { %v6335_v57 = vpop.permute.xlu1 %114  ;;  %5290 = vrcp.f32 %v329_v20  ;;  %v2265_v52 = vmul.f32 %v2264_v63, %v5979_v48 }
  0xef   :  { %1930 = vst.msk [vmem:[#allocation2 + $0x9] sm:$0x2] %vm363_vm2, %v6324_v16  ;;  %v191_v21 = vadd.f32 %v185_v23, %v6335_v57  ;;  %5292 = vrcp.f32 %v328_v25  ;;  %v7722_v54 = vrot.slane %v6324_v16, 1  ;;  %v2102_v25 = vmul.f32 %v2100_v6, %v5987_v50 }
  0xf0   :  { %v6353_v49 = vadd.f32 %v2266_v46, %v2265_v52 }
  0xf1   :  { %v6350_v20 = vsub.f32 %v6229_v22, %v7722_v54 }
  0xf2   :  { %7723 = vst [vmem:[#allocation22_spill] sm:$0xff] %v6353_v49 }
  0xf4   :  { %v5287_v26 = vpop.eup %5286 }
  0xf5   :  { %v5289_v1 = vpop.eup %5288  ;;  %v335_v9 = vmul.f32 %v5287_v26, %v303_v31  ;;  %v2098_v31 = vmul.f32 %v2096_v19, %v5979_v48  ;;  %v7724_v26 = vrot.slane %v6022_v17, 1  ;;  %v2439_v19 = vmul.f32 %v6353_v49, %v5987_v50 }
  0xf6   :  { %v334_v33 = vmul.f32 %v5289_v1, %v298_v42 }
  0xf7   :  { %v337_v59 = vadd.f32 %v335_v9, %v191_v21  ;;  %v2437_v12 = vsub.f32 %v2436_v32, %v7724_v26  ;;  %v6360_v9 = vadd.f32 %v2102_v25, %v2098_v31 }
  0xf8   :  { %v336_v23 = vadd.f32 %v334_v33, %v190_v24  ;;  %v2606_v33 = vld [vmem:[%s7655_s0 + $0xe] sm:$0x1]  ;;  %v5291_v47 = vpop.eup %5290  ;;  %v7725_v24 = vrot.slane %v6048_v30, 1 }
  0xf9   :  { %5294 = vtanh.f32 %v337_v59  ;;  %v2438_v22 = vmul.f32 %v2437_v12, %v5979_v48  ;;  %v7686_v54 = vrot.slane %v6360_v9, 1  ;;  %2104 = vst.msk [vmem:[#allocation2 + $0xa] sm:$0x2] %vm363_vm2, %v6360_v9  ;;  %v5293_v46 = vpop.eup %5292  ;;  %v341_v1 = vsub.f32 1.0, %v5291_v47 }
  0xfa   :  { %5296 = vtanh.f32 %v336_v23  ;;  %v2607_v42 = vsub.f32 %v2606_v33, %v7725_v24  ;;  %v340_v52 = vsub.f32 1.0, %v5293_v46  ;;  %v344_v63 = vmul.f32 0.0, %v5293_v46 }
  0xfb   :  { %v6371_v59 = vadd.f32 %v2439_v19, %v2438_v22  ;;  %v6378_v12 = vsub.f32 %v6260_v51, %v7686_v54  ;;  %v345_v19 = vmul.f32 0.0, %v5291_v47  ;;  %v7727_v46 = vrot.slane %v6064_v53, 1 }
  0xfc   :  { %v2608_v23 = vmul.f32 %v2607_v42, %v5979_v48 }
  0xfd   :  { %7726 = vst [vmem:[#allocation23_spill] sm:$0xff] %v6378_v12  ;;  %v2441_v31 = vsub.f32 %v2436_v32, %v6371_v59  ;;  %v2609_v26 = vmul.f32 %v6371_v59, %v5987_v50 }
  0xff   :  { %v6386_v51 = vadd.f32 %v2609_v26, %v2608_v23  ;;  %v2443_v49 = vrot.slane %v2441_v31, 7  ;;  %v7728_v26 = vrot.slane %v6099_v18, 1 }
 0x101   :  { %v2445_v12 = vmul.f32 %v2443_v49, %v5979_v48  ;;  %v2611_v47 = vsub.f32 %v2606_v33, %v6386_v51 }
 0x103   :  { %v5295_v6 = vpop.eup %5294  ;;  %v2613_v23 = vrot.slane %v2611_v47, 7 }
 0x104   :  { %v5297_v25 = vpop.eup %5296  ;;  %v343_v22 = vmul.f32 %v5295_v6, %v341_v1  ;;  %v2777_v1 = vsub.f32 %v2776_v28, %v7727_v46  ;;  %v2446_v6 = vmul.f32 %v6022_v17, %v5987_v50 }
 0x105   :  { %v342_v24 = vmul.f32 %v5297_v25, %v340_v52  ;;  %v2779_v52 = vmul.f32 %v6386_v51, %v5987_v50  ;;  %v2615_v17 = vmul.f32 %v2613_v23, %v5979_v48 }
 0x106   :  { %v6388_v54 = vadd.f32 %v345_v19, %v343_v22  ;;  %v2447_v31 = vadd.f32 %v2446_v6, %v2445_v12  ;;  %v2778_v49 = vmul.f32 %v2777_v1, %v5979_v48  ;;  %v2616_v19 = vmul.f32 %v6048_v30, %v5987_v50  ;;  %v3116_v1 = vld [vmem:[%s7655_s0 + $0x11] sm:$0x1] }
 0x107   :  { %v6390_v21 = vadd.f32 %v344_v63, %v342_v24  ;;  %v2946_v63 = vld [vmem:[%s7655_s0 + $0x10] sm:$0x1] }
 0x108   :  { %v2947_v25 = vsub.f32 %v2946_v63, %v7728_v26  ;;  %v2449_v22 = vrot.slane %v2447_v31, 1  ;;  %v6418_v24 = vadd.f32 %v2779_v52, %v2778_v49  ;;  %v7729_v31 = vrot.slane %v6131_v3, 1 }
 0x109   :  { %v5174_v42 = vpack.c.bf16 %v6388_v54, %v6390_v21 }
 0x10a   :  { %v6420_v12 = vsub.f32 %v2436_v32, %v2449_v22  ;;  %v2781_v47 = vsub.f32 %v2776_v28, %v6418_v24  ;;  %v2948_v46 = vmul.f32 %v2947_v25, %v5979_v48  ;;  %v3117_v23 = vsub.f32 %v3116_v1, %v7729_v31 }
 0x10b   :  { %5175 = vmatprep.subr.bf16.mxu1 %v5174_v42 }
 0x10c   :  { %5177 = vmatpush3.bf16.msra.mxu1 %v5174_v42  ;;  %v2617_v42 = vadd.f32 %v2616_v19, %v2615_v17  ;;  %v2783_v32 = vrot.slane %v2781_v47, 7  ;;  %v3118_v22 = vmul.f32 %v3117_v23, %v5979_v48 }
 0x10e   :  { %v2619_v30 = vrot.slane %v2617_v42, 1  ;;  %v2785_v49 = vmul.f32 %v2783_v32, %v5979_v48  ;;  %v7730_v42 = vrot.slane %v6172_v15, 1 }
 0x10f   :  { %4873 = vmatmul.mubr.msk.f32.vlgmr.msra.gmra.mrb[0].mxu1 %vm192_vm0, %v5845_v4  ;;  %v2949_v4 = vmul.f32 %v6418_v24, %v5987_v50 }
 0x110   :  { %4875 = vmatprep.mubr.msk.f32.mxu1 %vm192_vm0, %v5852_v5  ;;  %v6437_v52 = vsub.f32 %v2606_v33, %v2619_v30 }
 0x111   :  { %v6435_v6 = vadd.f32 %v2949_v4, %v2948_v46  ;;  %v2956_v4 = vmul.f32 %v6099_v18, %v5987_v50  ;;  %v7732_v18 = vrot.slane %v6219_v62, 1 }
 0x113   :  { %4876 = vmatmul.mubr.msk.f32.gmra.mrb[2].mxu1 %vm192_vm0, %v5864_v7  ;;  %v2786_v7 = vmul.f32 %v6064_v53, %v5987_v50  ;;  %v2951_v26 = vsub.f32 %v2946_v63, %v6435_v6  ;;  %v3286_v53 = vld [vmem:[%s7655_s0 + $0x12] sm:$0x1] }
 0x114   :  { %4878 = vmatprep.mubr.msk.f32.mxu1 %vm192_vm0, %v5869_v8  ;;  %v3119_v8 = vmul.f32 %v6435_v6, %v5987_v50  ;;  %v3287_v47 = vsub.f32 %v3286_v53, %v7730_v42 }
 0x115   :  { %v2787_v25 = vadd.f32 %v2786_v7, %v2785_v49 }
 0x116   :  { %v6457_v19 = vadd.f32 %v3119_v8, %v3118_v22  ;;  %v3288_v23 = vmul.f32 %v3287_v47, %v5979_v48 }
 0x117   :  { %4879 = vmatmul.mubr.msk.f32.gmra.mrb[4].mxu1 %vm192_vm0, %v5889_v13  ;;  %v2789_v17 = vrot.slane %v2787_v25, 1  ;;  %v2953_v13 = vrot.slane %v2951_v26, 7 }
 0x118   :  { %4898 = vmatprep.mubr.msk.f32.mxu1 %vm192_vm0, %v5837_v2  ;;  %v3121_v31 = vsub.f32 %v3116_v1, %v6457_v19  ;;  %v3289_v49 = vmul.f32 %v6457_v19, %v5987_v50 }
 0x119   :  { %v6461_v46 = vsub.f32 %v2776_v28, %v2789_v17  ;;  %v2955_v2 = vmul.f32 %v2953_v13, %v5979_v48  ;;  %v3456_v28 = vld [vmem:[%s7655_s0 + $0x13] sm:$0x1]  ;;  %v3126_v13 = vmul.f32 %v6131_v3, %v5987_v50  ;;  %v7734_v3 = vrot.slane %v6277_v60, 1 }
 0x11a   :  { %v3123_v26 = vrot.slane %v3121_v31, 7  ;;  %v6475_v8 = vadd.f32 %v3289_v49, %v3288_v23  ;;  %v3457_v25 = vsub.f32 %v3456_v28, %v7732_v18 }
 0x11b   :  { %v2957_v32 = vadd.f32 %v2956_v4, %v2955_v2 }
 0x11c   :  { %7731 = vst [vmem:[#allocation24_spill] sm:$0xff] %v6475_v8  ;;  %v3125_v17 = vmul.f32 %v3123_v26, %v5979_v48  ;;  %v3291_v2 = vsub.f32 %v3286_v53, %v6475_v8  ;;  %v3458_v4 = vmul.f32 %v3457_v25, %v5979_v48  ;;  %v3296_v25 = vmul.f32 %v6172_v15, %v5987_v50 }
 0x11d   :  { %v2959_v7 = vrot.slane %v2957_v32, 1  ;;  %v3459_v32 = vmul.f32 %v6475_v8, %v5987_v50  ;;  %v7736_v15 = vrot.slane %v6301_v10, 1 }
 0x11e   :  { %v3127_v47 = vadd.f32 %v3126_v13, %v3125_v17  ;;  %v3293_v23 = vrot.slane %v3291_v2, 7 }
 0x11f   :  { %v6479_v22 = vsub.f32 %v2946_v63, %v2959_v7  ;;  %v3626_v63 = vld [vmem:[%s7655_s0 + $0x14] sm:$0x1]  ;;  %v6493_v49 = vadd.f32 %v3459_v32, %v3458_v4 }
 0x120   :  { %v3129_v31 = vrot.slane %v3127_v47, 1  ;;  %v3627_v7 = vsub.f32 %v3626_v63, %v7734_v3  ;;  %v3295_v18 = vmul.f32 %v3293_v23, %v5979_v48 }
 0x121   :  { %7733 = vst [vmem:[#allocation25_spill] sm:$0xff] %v6493_v49  ;;  %v3461_v42 = vsub.f32 %v3456_v28, %v6493_v49  ;;  %v3629_v2 = vmul.f32 %v6493_v49, %v5987_v50 }
 0x122   :  { %v6497_v26 = vsub.f32 %v3116_v1, %v3129_v31  ;;  %v3297_v13 = vadd.f32 %v3296_v25, %v3295_v18  ;;  %v3628_v47 = vmul.f32 %v3627_v7, %v5979_v48  ;;  %v3796_v1 = vld [vmem:[%s7655_s0 + $0x15] sm:$0x1]  ;;  %v3466_v7 = vmul.f32 %v6219_v62, %v5987_v50 }
 0x123   :  { %v3463_v32 = vrot.slane %v3461_v42, 7  ;;  %v3797_v23 = vsub.f32 %v3796_v1, %v7736_v15  ;;  %v7738_v62 = vrot.slane %v6324_v16, 1 }
 0x124   :  { %v3299_v4 = vrot.slane %v3297_v13, 1  ;;  %v6511_v31 = vadd.f32 %v3629_v2, %v3628_v47 }
 0x125   :  { %v3465_v18 = vmul.f32 %v3463_v32, %v5979_v48  ;;  %v3798_v42 = vmul.f32 %v3797_v23, %v5979_v48  ;;  %v3636_v23 = vmul.f32 %v6277_v60, %v5987_v50  ;;  %v7741_v60 = vrot.slane %v6360_v9, 1 }
 0x126   :  { %7735 = vst [vmem:[#allocation26_spill] sm:$0xff] %v6511_v31  ;;  %v6515_v3 = vsub.f32 %v3286_v53, %v3299_v4  ;;  %v3631_v30 = vsub.f32 %v3626_v63, %v6511_v31  ;;  %v3799_v13 = vmul.f32 %v6511_v31, %v5987_v50  ;;  %v3966_v53 = vld [vmem:[%s7655_s0 + $0x16] sm:$0x1] }
 0x127   :  { %v3467_v17 = vadd.f32 %v3466_v7, %v3465_v18  ;;  %v3967_v32 = vsub.f32 %v3966_v53, %v7738_v62 }
 0x128   :  { %v3633_v2 = vrot.slane %v3631_v30, 7  ;;  %v6529_v4 = vadd.f32 %v3799_v13, %v3798_v42 }
 0x129   :  { %v3469_v47 = vrot.slane %v3467_v17, 1  ;;  %v3968_v30 = vmul.f32 %v3967_v32, %v5979_v48  ;;  %v3806_v32 = vmul.f32 %v6301_v10, %v5987_v50  ;;  %v3976_v10 = vmul.f32 %v6324_v16, %v5987_v50 }
 0x12a   :  { %7737 = vst [vmem:[#allocation27_spill] sm:$0xff] %v6529_v4  ;;  %v3635_v18 = vmul.f32 %v3633_v2, %v5979_v48  ;;  %v3801_v33 = vsub.f32 %v3796_v1, %v6529_v4  ;;  %v3969_v17 = vmul.f32 %v6529_v4, %v5987_v50 }
 0x12b   :  { %v6533_v15 = vsub.f32 %v3456_v28, %v3469_v47  ;;  %v4136_v28 = vld [vmem:[%s7655_s0 + $0x17] sm:$0x1] }
 0x12c   :  { %v3637_v25 = vadd.f32 %v3636_v23, %v3635_v18  ;;  %v3803_v13 = vrot.slane %v3801_v33, 7  ;;  %v6547_v47 = vadd.f32 %v3969_v17, %v3968_v30  ;;  %v4137_v2 = vsub.f32 %v4136_v28, %v7741_v60 }
 0x12d   :  { %7739 = vst [vmem:[#allocation28_spill] sm:$0xff] %v6533_v15 }
 0x12e   :  { %v3639_v42 = vrot.slane %v3637_v25, 1  ;;  %7740 = vst [vmem:[#allocation29_spill] sm:$0xff] %v6547_v47  ;;  %v3805_v18 = vmul.f32 %v3803_v13, %v5979_v48  ;;  %v3971_v5 = vsub.f32 %v3966_v53, %v6547_v47  ;;  %v4138_v33 = vmul.f32 %v4137_v2, %v5979_v48 }
 0x12f   :  { %v4139_v25 = vmul.f32 %v6547_v47, %v5987_v50 }
 0x130   :  { %v6551_v62 = vsub.f32 %v3626_v63, %v3639_v42  ;;  %v3807_v7 = vadd.f32 %v3806_v32, %v3805_v18  ;;  %v3973_v17 = vrot.slane %v3971_v5, 7 }
 0x131   :  { %v6562_v63 = vadd.f32 %v4139_v25, %v4138_v33 }
 0x132   :  { %7742 = vst [vmem:[#allocation30_spill] sm:$0xff] %v6551_v62  ;;  %v3809_v30 = vrot.slane %v3807_v7, 1  ;;  %v3975_v13 = vmul.f32 %v3973_v17, %v5979_v48 }
 0x133   :  { %7743 = vst [vmem:[#allocation31_spill] sm:$0xff] %v6562_v63  ;;  %v4141_v2 = vsub.f32 %v4136_v28, %v6562_v63 }
 0x134   :  { %v6564_v42 = vsub.f32 %v3796_v1, %v3809_v30  ;;  %v3977_v18 = vadd.f32 %v3976_v10, %v3975_v13  ;;  %v4146_v1 = vmul.f32 %v6360_v9, %v5987_v50  ;;  %v7748_v30 = vld [vmem:[#allocation16_spill] sm:$0xff] }
 0x135   :  { %v4143_v23 = vrot.slane %v4141_v2, 7 }
 0x136   :  { %7744 = vst [vmem:[#allocation32_spill] sm:$0xff] %v6564_v42  ;;  %v3979_v32 = vrot.slane %v3977_v18, 1 }
 0x137   :  { %v4145_v5 = vmul.f32 %v4143_v23, %v5979_v48 }
 0x138   :  { %v6572_v31 = vsub.f32 %v3966_v53, %v3979_v32  ;;  %v7747_v53 = vsub.f32 %v6046_v29, %v5998_v56 }
 0x139   :  { %v4147_v33 = vadd.f32 %v4146_v1, %v4145_v5 }
 0x13a   :  { %7745 = vst [vmem:[#allocation33_spill] sm:$0xff] %v6572_v31  ;;  %v373_v17 = vrot.slane %v7747_v53, %v6135_v14 }
 0x13b   :  { %v4149_v16 = vrot.slane %v4147_v33, 1 }
 0x13c   :  { %v375_v23 = vmul.f32 %v373_v17, %v5951_v35  ;;  %v374_v13 = vmul.f32 %v373_v17, %v5949_v34  ;;  %v376_v1 = vmul.f32 %v373_v17, %v5955_v37 }
 0x13d   :  { %v6579_v25 = vsub.f32 %v4136_v28, %v4149_v16  ;;  %v377_v28 = vmul.f32 %v373_v17, %v6155_v27 }
 0x13e   :  { %v381_v10 = vadd.f32 %v375_v23, %v6093_v11  ;;  %v380_v32 = vadd.f32 %v374_v13, %v6069_v58 }
 0x13f   :  { %7746 = vst [vmem:[#allocation34_spill] sm:$0xff] %v6579_v25  ;;  %v383_v53 = vadd.f32 %v377_v28, %v6194_v0 }
 0x1e2   :  { %v4874_v9 = vpop.f32.mrb[0].mxu1 }
 0x1e3   :  { %v458_v18 = vadd.f32 %v4874_v9, %v6121_v43  ;;  %v452_v2 = vpop.f32.mrb[1].mxu1  ;;  %v382_v9 = vadd.f32 %v376_v1, %v5957_v38 }
 0x1e4   :  { %v453_v5 = vadd.f32 %v452_v2, %v5953_v36 }
 0x1e5   :  { %v482_v56 = vadd.f32 %v458_v18, %v381_v10 }
 0x1e6   :  { %v481_v29 = vadd.f32 %v453_v5, %v380_v32  ;;  %v4877_v33 = vpop.f32.mrb[2].mxu1 }
 0x1e7   :  { %v4437_v16 = vmul.f32 -1.442695, %v482_v56  ;;  %v468_v7 = vadd.f32 %v4877_v33, %v7748_v30  ;;  %v462_v23 = vpop.f32.mrb[3].mxu1 }
 0x1e8   :  { %v4436_v60 = vmul.f32 -1.442695, %v481_v29  ;;  %v463_v63 = vadd.f32 %v462_v23, %v5959_v39 }
 0x1e9   :  { %5298 = vpow2.f32 %v4437_v16  ;;  %v496_v13 = vadd.f32 %v468_v7, %v383_v53  ;;  %v379_v16 = vmul.f32 %v373_v17, %v6288_v61 }
 0x1ea   :  { %5300 = vpow2.f32 %v4436_v60  ;;  %v495_v2 = vadd.f32 %v463_v63, %v382_v9  ;;  %v4880_v25 = vpop.f32.mrb[4].mxu1  ;;  %v378_v63 = vmul.f32 %v373_v17, %v5961_v40 }
 0x1eb   :  { %v472_v47 = vpop.f32.mrb[5].mxu1  ;;  %v4439_v10 = vmul.f32 -1.442695, %v496_v13  ;;  %v478_v60 = vadd.f32 %v4880_v25, %v6309_v55  ;;  %v385_v13 = vadd.f32 %v379_v16, %v6335_v57 }
 0x1ec   :  { %v4438_v18 = vmul.f32 -1.442695, %v495_v2  ;;  %v473_v23 = vadd.f32 %v472_v47, %v5963_v41 }
 0x1ed   :  { %5302 = vpow2.f32 %v4439_v10  ;;  %v384_v10 = vadd.f32 %v378_v63, %v5971_v44 }
 0x1ee   :  { %5304 = vpow2.f32 %v4438_v18 }
 0x1f3   :  { %v5299_v32 = vpop.eup %5298 }
 0x1f4   :  { %v5301_v28 = vpop.eup %5300  ;;  %v490_v5 = vadd.f32 1.0, %v5299_v32 }
 0x1f5   :  { %v489_v56 = vadd.f32 1.0, %v5301_v28 }
 0x1f6   :  { %5306 = vrcp.f32 %v490_v5 }
 0x1f7   :  { %5308 = vrcp.f32 %v489_v56  ;;  %v5303_v29 = vpop.eup %5302 }
 0x1f8   :  { %v5305_v1 = vpop.eup %5304  ;;  %v504_v33 = vadd.f32 1.0, %v5303_v29 }
 0x1f9   :  { %v503_v7 = vadd.f32 1.0, %v5305_v1 }
 0x1fa   :  { %5310 = vrcp.f32 %v504_v33 }
 0x1fb   :  { %5312 = vrcp.f32 %v503_v7 }
 0x200   :  { %v5307_v53 = vpop.eup %5306 }
 0x201   :  { %v5309_v9 = vpop.eup %5308  ;;  %v510_v2 = vmul.f32 %v5307_v53, %v478_v60  ;;  %v6616_v53 = vld [vmem:[%s7648_s4 + $0x8] sm:$0xff] }
 0x202   :  { %v509_v18 = vmul.f32 %v5309_v9, %v473_v23  ;;  %v6644_v23 = vld [vmem:[%s7648_s4 + $0x28] sm:$0xff]  ;;  %v6651_v9 = vld [vmem:[%s7648_s4] sm:$0xff] }
 0x203   :  { %v512_v32 = vadd.f32 %v510_v2, %v385_v13  ;;  %v7749_v13 = vld [vmem:[#allocation7_spill] sm:$0xff]  ;;  %v7750_v2 = vld [vmem:[#allocation4_spill] sm:$0xff] }
 0x204   :  { %v511_v28 = vadd.f32 %v509_v18, %v384_v10  ;;  %v5311_v5 = vpop.eup %5310  ;;  %v7751_v10 = vsub.f32 %v7749_v13, %v7750_v2 }
 0x205   :  { %5314 = vtanh.f32 %v512_v32  ;;  %v5313_v17 = vpop.eup %5312  ;;  %v516_v56 = vsub.f32 1.0, %v5311_v5  ;;  %v520_v33 = vmul.f32 %v5311_v5, %v6388_v54  ;;  %v6623_v54 = vld [vmem:[%s7648_s4 + $0x10] sm:$0xff] }
 0x206   :  { %5316 = vtanh.f32 %v511_v28  ;;  %v515_v29 = vsub.f32 1.0, %v5313_v17  ;;  %v519_v16 = vmul.f32 %v5313_v17, %v6390_v21  ;;  %v6630_v21 = vld [vmem:[%s7648_s4 + $0x18] sm:$0xff]  ;;  %v547_v18 = vrot.slane %v7751_v10, %v6135_v14 }
 0x208   :  { %v549_v32 = vmul.f32 %v547_v18, %v5951_v35  ;;  %v548_v28 = vmul.f32 %v547_v18, %v5949_v34 }
 0x20a   :  { %v555_v17 = vadd.f32 %v549_v32, %v6093_v11 }
 0x20f   :  { %v5315_v25 = vpop.eup %5314 }
 0x210   :  { %v5317_v1 = vpop.eup %5316  ;;  %v518_v47 = vmul.f32 %v5315_v25, %v516_v56 }
 0x211   :  { %v517_v31 = vmul.f32 %v5317_v1, %v515_v29  ;;  %v551_v29 = vmul.f32 %v547_v18, %v6155_v27  ;;  %v554_v1 = vadd.f32 %v548_v28, %v6069_v58 }
 0x212   :  { %v6607_v7 = vadd.f32 %v520_v33, %v518_v47  ;;  %v550_v33 = vmul.f32 %v547_v18, %v5955_v37 }
 0x213   :  { %v6609_v63 = vadd.f32 %v519_v16, %v517_v31  ;;  %v6637_v31 = vld [vmem:[%s7648_s4 + $0x20] sm:$0xff]  ;;  %v557_v10 = vadd.f32 %v551_v29, %v6194_v0 }
 0x215   :  { %v5178_v60 = vpack.c.bf16 %v6607_v7, %v6609_v63 }
 0x217   :  { %5179 = vmatprep.subr.bf16.mxu0 %v5178_v60 }
 0x218   :  { %5181 = vmatpush3.bf16.msra.mxu0 %v5178_v60 }
 0x21b   :  { %4886 = vmatmul.mubr.msk.f32.vlgmr.msra.gmra.mrb[6].mxu0 %vm192_vm0, %v6616_v53 }
 0x21c   :  { %4888 = vmatprep.mubr.msk.f32.mxu0 %vm192_vm0, %v6623_v54 }
 0x21f   :  { %4889 = vmatmul.mubr.msk.f32.gmra.mrb[8].mxu0 %vm192_vm0, %v6630_v21 }
 0x220   :  { %4891 = vmatprep.mubr.msk.f32.mxu0 %vm192_vm0, %v6637_v31 }
 0x223   :  { %4892 = vmatmul.mubr.msk.f32.gmra.mrb[10].mxu0 %vm192_vm0, %v6644_v23 }
 0x224   :  { %4911 = vmatprep.mubr.msk.f32.mxu0 %vm192_vm0, %v6651_v9 }
 0x2ee   :  { %v4887_v5 = vpop.f32.mrb[6].mxu0 }
 0x2ef   :  { %v632_v56 = vadd.f32 %v4887_v5, %v6121_v43  ;;  %v626_v25 = vpop.f32.mrb[7].mxu0  ;;  %v556_v5 = vadd.f32 %v550_v33, %v5957_v38 }
 0x2f0   :  { %v627_v47 = vadd.f32 %v626_v25, %v5953_v36 }
 0x2f1   :  { %v656_v16 = vadd.f32 %v632_v56, %v555_v17 }
 0x2f2   :  { %v655_v60 = vadd.f32 %v627_v47, %v554_v1  ;;  %v4890_v13 = vpop.f32.mrb[8].mxu0 }
 0x2f3   :  { %v4447_v2 = vmul.f32 -1.442695, %v656_v16  ;;  %v642_v4 = vadd.f32 %v4890_v13, %v7748_v30  ;;  %v636_v32 = vpop.f32.mrb[9].mxu0 }
 0x2f4   :  { %v4446_v42 = vmul.f32 -1.442695, %v655_v60  ;;  %v637_v62 = vadd.f32 %v636_v32, %v5959_v39 }
 0x2f5   :  { %5318 = vpow2.f32 %v4447_v2  ;;  %v670_v28 = vadd.f32 %v642_v4, %v557_v10  ;;  %v553_v2 = vmul.f32 %v547_v18, %v6288_v61 }
 0x2f6   :  { %5320 = vpow2.f32 %v4446_v42  ;;  %v669_v25 = vadd.f32 %v637_v62, %v556_v5  ;;  %v4893_v49 = vpop.f32.mrb[10].mxu0  ;;  %v552_v62 = vmul.f32 %v547_v18, %v5961_v40 }
 0x2f7   :  { %v646_v15 = vpop.f32.mrb[11].mxu0  ;;  %v4449_v17 = vmul.f32 -1.442695, %v670_v28  ;;  %v652_v42 = vadd.f32 %v4893_v49, %v6309_v55  ;;  %v559_v28 = vadd.f32 %v553_v2, %v6335_v57 }
 0x2f8   :  { %v4448_v56 = vmul.f32 -1.442695, %v669_v25  ;;  %v647_v32 = vadd.f32 %v646_v15, %v5963_v41 }
 0x2f9   :  { %5322 = vpow2.f32 %v4449_v17  ;;  %v558_v17 = vadd.f32 %v552_v62, %v5971_v44 }
 0x2fa   :  { %5324 = vpow2.f32 %v4448_v56 }
 0x2ff   :  { %v5319_v1 = vpop.eup %5318 }
 0x300   :  { %v5321_v29 = vpop.eup %5320  ;;  %v664_v47 = vadd.f32 1.0, %v5319_v1 }
 0x301   :  { %v663_v16 = vadd.f32 1.0, %v5321_v29 }
 0x302   :  { %5326 = vrcp.f32 %v664_v47 }
 0x303   :  { %5328 = vrcp.f32 %v663_v16  ;;  %v5323_v60 = vpop.eup %5322 }
 0x304   :  { %v5325_v33 = vpop.eup %5324  ;;  %v678_v13 = vadd.f32 1.0, %v5323_v60 }
 0x305   :  { %v677_v4 = vadd.f32 1.0, %v5325_v33 }
 0x306   :  { %5330 = vrcp.f32 %v678_v13 }
 0x307   :  { %5332 = vrcp.f32 %v677_v4 }
 0x30c   :  { %v5327_v10 = vpop.eup %5326 }
 0x30d   :  { %v5329_v5 = vpop.eup %5328  ;;  %v684_v25 = vmul.f32 %v5327_v10, %v652_v42 }
 0x30e   :  { %v683_v56 = vmul.f32 %v5329_v5, %v647_v32 }
 0x30f   :  { %v686_v1 = vadd.f32 %v684_v25, %v559_v28 }
 0x310   :  { %v685_v29 = vadd.f32 %v683_v56, %v558_v17  ;;  %v5331_v47 = vpop.eup %5330 }
 0x311   :  { %5334 = vtanh.f32 %v686_v1  ;;  %v5333_v18 = vpop.eup %5332  ;;  %v690_v16 = vsub.f32 1.0, %v5331_v47  ;;  %v694_v13 = vmul.f32 %v5331_v47, %v6607_v7  ;;  %v7753_v7 = vld [vmem:[#allocation5_spill] sm:$0xff] }
 0x312   :  { %5336 = vtanh.f32 %v685_v29  ;;  %v689_v60 = vsub.f32 1.0, %v5333_v18  ;;  %v693_v2 = vmul.f32 %v5333_v18, %v6609_v63 }
 0x31b   :  { %v5335_v49 = vpop.eup %5334 }
 0x31c   :  { %v5337_v33 = vpop.eup %5336  ;;  %v692_v15 = vmul.f32 %v5335_v49, %v690_v16 }
 0x31d   :  { %v691_v8 = vmul.f32 %v5337_v33, %v689_v60 }
 0x31e   :  { %v6679_v4 = vadd.f32 %v694_v13, %v692_v15 }
 0x31f   :  { %v6681_v62 = vadd.f32 %v693_v2, %v691_v8  ;;  %v7752_v8 = vld [vmem:[#allocation9_spill] sm:$0xff] }
 0x320   :  { %v7754_v63 = vsub.f32 %v7752_v8, %v7753_v7 }
 0x321   :  { %v5182_v42 = vpack.c.bf16 %v6679_v4, %v6681_v62 }
 0x322   :  { %v721_v10 = vrot.slane %v7754_v63, %v6135_v14 }
 0x323   :  { %5183 = vmatprep.subr.bf16.mxu1 %v5182_v42 }
 0x324   :  { %5185 = vmatpush3.bf16.msra.mxu1 %v5182_v42  ;;  %v723_v32 = vmul.f32 %v721_v10, %v5951_v35  ;;  %v722_v5 = vmul.f32 %v721_v10, %v5949_v34  ;;  %v725_v1 = vmul.f32 %v721_v10, %v6155_v27  ;;  %v724_v18 = vmul.f32 %v721_v10, %v5955_v37 }
 0x326   :  { %v729_v25 = vadd.f32 %v723_v32, %v6093_v11  ;;  %v728_v29 = vadd.f32 %v722_v5, %v6069_v58  ;;  %v731_v15 = vadd.f32 %v725_v1, %v6194_v0  ;;  %v730_v8 = vadd.f32 %v724_v18, %v5957_v38 }
 0x327   :  { %4899 = vmatmul.mubr.msk.f32.vlgmr.msra.gmra.mrb[6].mxu1 %vm192_vm0, %v6616_v53 }
 0x328   :  { %4901 = vmatprep.mubr.msk.f32.mxu1 %vm192_vm0, %v6623_v54 }
 0x32b   :  { %4902 = vmatmul.mubr.msk.f32.gmra.mrb[8].mxu1 %vm192_vm0, %v6630_v21 }
 0x32c   :  { %4904 = vmatprep.mubr.msk.f32.mxu1 %vm192_vm0, %v6637_v31 }
 0x32f   :  { %4905 = vmatmul.mubr.msk.f32.gmra.mrb[10].mxu1 %vm192_vm0, %v6644_v23 }
 0x330   :  { %4924 = vmatprep.mubr.msk.f32.mxu1 %vm192_vm0, %v6651_v9 }
 0x3fa   :  { %v4900_v28 = vpop.f32.mrb[6].mxu1 }
 0x3fb   :  { %v806_v17 = vadd.f32 %v4900_v28, %v6121_v43  ;;  %v800_v56 = vpop.f32.mrb[7].mxu1 }
 0x3fc   :  { %v801_v47 = vadd.f32 %v800_v56, %v5953_v36 }
 0x3fd   :  { %v830_v16 = vadd.f32 %v806_v17, %v729_v25 }
 0x3fe   :  { %v829_v49 = vadd.f32 %v801_v47, %v728_v29  ;;  %v4903_v60 = vpop.f32.mrb[8].mxu1 }
 0x3ff   :  { %v4457_v33 = vmul.f32 -1.442695, %v830_v16  ;;  %v816_v13 = vadd.f32 %v4903_v60, %v7748_v30  ;;  %v810_v2 = vpop.f32.mrb[9].mxu1  ;;  %v727_v60 = vmul.f32 %v721_v10, %v6288_v61 }
 0x400   :  { %v4456_v42 = vmul.f32 -1.442695, %v829_v49  ;;  %v811_v7 = vadd.f32 %v810_v2, %v5959_v39 }
 0x401   :  { %5338 = vpow2.f32 %v4457_v33  ;;  %v844_v63 = vadd.f32 %v816_v13, %v731_v15  ;;  %v726_v15 = vmul.f32 %v721_v10, %v5961_v40 }
 0x402   :  { %5340 = vpow2.f32 %v4456_v42  ;;  %v843_v32 = vadd.f32 %v811_v7, %v730_v8  ;;  %v4906_v5 = vpop.f32.mrb[10].mxu1  ;;  %v733_v7 = vadd.f32 %v727_v60, %v6335_v57 }
 0x403   :  { %v820_v28 = vpop.f32.mrb[11].mxu1  ;;  %v4459_v25 = vmul.f32 -1.442695, %v844_v63  ;;  %v826_v13 = vadd.f32 %v4906_v5, %v6309_v55 }
 0x404   :  { %v4458_v17 = vmul.f32 -1.442695, %v843_v32  ;;  %v821_v42 = vadd.f32 %v820_v28, %v5963_v41  ;;  %v732_v32 = vadd.f32 %v726_v15, %v5971_v44 }
 0x405   :  { %5342 = vpow2.f32 %v4459_v25 }
 0x406   :  { %5344 = vpow2.f32 %v4458_v17 }
 0x40b   :  { %v5339_v56 = vpop.eup %5338 }
 0x40c   :  { %v5341_v1 = vpop.eup %5340  ;;  %v838_v29 = vadd.f32 1.0, %v5339_v56 }
 0x40d   :  { %v837_v47 = vadd.f32 1.0, %v5341_v1 }
 0x40e   :  { %5346 = vrcp.f32 %v838_v29 }
 0x40f   :  { %5348 = vrcp.f32 %v837_v47  ;;  %v5343_v16 = vpop.eup %5342 }
 0x410   :  { %v5345_v18 = vpop.eup %5344  ;;  %v852_v49 = vadd.f32 1.0, %v5343_v16 }
 0x411   :  { %v851_v33 = vadd.f32 1.0, %v5345_v18 }
 0x412   :  { %5350 = vrcp.f32 %v852_v49 }
 0x413   :  { %5352 = vrcp.f32 %v851_v33 }
 0x418   :  { %v5347_v2 = vpop.eup %5346 }
 0x419   :  { %v5349_v8 = vpop.eup %5348  ;;  %v858_v63 = vmul.f32 %v5347_v2, %v826_v13 }
 0x41a   :  { %v857_v25 = vmul.f32 %v5349_v8, %v821_v42 }
 0x41b   :  { %v860_v17 = vadd.f32 %v858_v63, %v733_v7 }
 0x41c   :  { %v859_v56 = vadd.f32 %v857_v25, %v732_v32  ;;  %v5351_v1 = vpop.eup %5350 }
 0x41d   :  { %5354 = vtanh.f32 %v860_v17  ;;  %v5353_v10 = vpop.eup %5352  ;;  %v864_v29 = vsub.f32 1.0, %v5351_v1  ;;  %v868_v18 = vmul.f32 %v5351_v1, %v6679_v4  ;;  %v7755_v4 = vld [vmem:[#allocation11_spill] sm:$0xff] }
 0x41e   :  { %5356 = vtanh.f32 %v859_v56  ;;  %v863_v47 = vsub.f32 1.0, %v5353_v10  ;;  %v867_v60 = vmul.f32 %v5353_v10, %v6681_v62  ;;  %v7756_v62 = vld [vmem:[#allocation6_spill] sm:$0xff] }
 0x41f   :  { %v7757_v2 = vsub.f32 %v7755_v4, %v7756_v62 }
 0x421   :  { %v895_v42 = vrot.slane %v7757_v2, %v6135_v14 }
 0x423   :  { %v897_v8 = vmul.f32 %v895_v42, %v5951_v35  ;;  %v896_v7 = vmul.f32 %v895_v42, %v5949_v34  ;;  %v899_v56 = vmul.f32 %v895_v42, %v6155_v27 }
 0x425   :  { %v903_v32 = vadd.f32 %v897_v8, %v6093_v11  ;;  %v902_v1 = vadd.f32 %v896_v7, %v6069_v58 }
 0x427   :  { %v5355_v5 = vpop.eup %5354 }
 0x428   :  { %v5357_v16 = vpop.eup %5356  ;;  %v866_v28 = vmul.f32 %v5355_v5, %v864_v29  ;;  %v898_v29 = vmul.f32 %v895_v42, %v5955_v37 }
 0x429   :  { %v865_v49 = vmul.f32 %v5357_v16, %v863_v47 }
 0x42a   :  { %v6721_v33 = vadd.f32 %v868_v18, %v866_v28  ;;  %v905_v18 = vadd.f32 %v899_v56, %v6194_v0  ;;  %v904_v4 = vadd.f32 %v898_v29, %v5957_v38 }
 0x42b   :  { %v6723_v15 = vadd.f32 %v867_v60, %v865_v49 }
 0x42d   :  { %v5186_v13 = vpack.c.bf16 %v6721_v33, %v6723_v15 }
 0x42f   :  { %5187 = vmatprep.subr.bf16.mxu0 %v5186_v13 }
 0x430   :  { %5189 = vmatpush3.bf16.msra.mxu0 %v5186_v13 }
 0x433   :  { %4912 = vmatmul.mubr.msk.f32.vlgmr.msra.gmra.mrb[12].mxu0 %vm192_vm0, %v6616_v53 }
 0x434   :  { %4914 = vmatprep.mubr.msk.f32.mxu0 %vm192_vm0, %v6623_v54 }
 0x437   :  { %4915 = vmatmul.mubr.msk.f32.gmra.mrb[14].mxu0 %vm192_vm0, %v6630_v21 }
 0x438   :  { %4917 = vmatprep.mubr.msk.f32.mxu0 %vm192_vm0, %v6637_v31 }
 0x43b   :  { %4918 = vmatmul.mubr.msk.f32.gmra.mrb[16].mxu0 %vm192_vm0, %v6644_v23 }
 0x43c   :  { %4937 = vmatprep.mubr.msk.f32.mxu0 %vm192_vm0, %v6651_v9 }
 0x506   :  { %v4913_v63 = vpop.f32.mrb[12].mxu0 }
 0x507   :  { %v980_v25 = vadd.f32 %v4913_v63, %v6121_v43  ;;  %v974_v17 = vpop.f32.mrb[13].mxu0 }
 0x508   :  { %v975_v10 = vadd.f32 %v974_v17, %v5953_v36 }
 0x509   :  { %v1004_v5 = vadd.f32 %v980_v25, %v903_v32 }
 0x50a   :  { %v1003_v47 = vadd.f32 %v975_v10, %v902_v1  ;;  %v4916_v16 = vpop.f32.mrb[14].mxu0 }
 0x50b   :  { %v4467_v28 = vmul.f32 -1.442695, %v1004_v5  ;;  %v990_v49 = vadd.f32 %v4916_v16, %v7748_v30  ;;  %v984_v60 = vpop.f32.mrb[15].mxu0  ;;  %v901_v16 = vmul.f32 %v895_v42, %v6288_v61 }
 0x50c   :  { %v4466_v13 = vmul.f32 -1.442695, %v1003_v47  ;;  %v985_v62 = vadd.f32 %v984_v60, %v5959_v39 }
 0x50d   :  { %5358 = vpow2.f32 %v4467_v28  ;;  %v1018_v2 = vadd.f32 %v990_v49, %v905_v18  ;;  %v900_v18 = vmul.f32 %v895_v42, %v5961_v40 }
 0x50e   :  { %5360 = vpow2.f32 %v4466_v13  ;;  %v1017_v8 = vadd.f32 %v985_v62, %v904_v4  ;;  %v4919_v7 = vpop.f32.mrb[16].mxu0  ;;  %v907_v62 = vadd.f32 %v901_v16, %v6335_v57 }
 0x50f   :  { %v994_v63 = vpop.f32.mrb[17].mxu0  ;;  %v4469_v32 = vmul.f32 -1.442695, %v1018_v2  ;;  %v1000_v49 = vadd.f32 %v4919_v7, %v6309_v55 }
 0x510   :  { %v4468_v25 = vmul.f32 -1.442695, %v1017_v8  ;;  %v995_v13 = vadd.f32 %v994_v63, %v5963_v41  ;;  %v906_v8 = vadd.f32 %v900_v18, %v5971_v44 }
 0x511   :  { %5362 = vpow2.f32 %v4469_v32 }
 0x512   :  { %5364 = vpow2.f32 %v4468_v25 }
 0x517   :  { %v5359_v17 = vpop.eup %5358 }
 0x518   :  { %v5361_v56 = vpop.eup %5360  ;;  %v1012_v1 = vadd.f32 1.0, %v5359_v17 }
 0x519   :  { %v1011_v10 = vadd.f32 1.0, %v5361_v56 }
 0x51a   :  { %5366 = vrcp.f32 %v1012_v1 }
 0x51b   :  { %5368 = vrcp.f32 %v1011_v10  ;;  %v5363_v5 = vpop.eup %5362 }
 0x51c   :  { %v5365_v29 = vpop.eup %5364  ;;  %v1026_v47 = vadd.f32 1.0, %v5363_v5 }
 0x51d   :  { %v1025_v28 = vadd.f32 1.0, %v5365_v29 }
 0x51e   :  { %5370 = vrcp.f32 %v1026_v47 }
 0x51f   :  { %5372 = vrcp.f32 %v1025_v28 }
 0x524   :  { %v5367_v60 = vpop.eup %5366 }
 0x525   :  { %v5369_v4 = vpop.eup %5368  ;;  %v1032_v2 = vmul.f32 %v5367_v60, %v1000_v49 }
 0x526   :  { %v1031_v32 = vmul.f32 %v5369_v4, %v995_v13 }
 0x527   :  { %v1034_v25 = vadd.f32 %v1032_v2, %v907_v62 }
 0x528   :  { %v1033_v17 = vadd.f32 %v1031_v32, %v906_v8  ;;  %v5371_v56 = vpop.eup %5370 }
 0x529   :  { %5374 = vtanh.f32 %v1034_v25  ;;  %v5373_v42 = vpop.eup %5372  ;;  %v1038_v1 = vsub.f32 1.0, %v5371_v56  ;;  %v1042_v29 = vmul.f32 %v5371_v56, %v6721_v33  ;;  %v7758_v33 = vld [vmem:[#allocation13_spill] sm:$0xff] }
 0x52a   :  { %5376 = vtanh.f32 %v1033_v17  ;;  %v1037_v10 = vsub.f32 1.0, %v5373_v42  ;;  %v1041_v16 = vmul.f32 %v5373_v42, %v6723_v15  ;;  %v7759_v15 = vld [vmem:[#allocation8_spill] sm:$0xff] }
 0x52b   :  { %v7760_v60 = vsub.f32 %v7758_v33, %v7759_v15 }
 0x52d   :  { %v1069_v13 = vrot.slane %v7760_v60, %v6135_v14 }
 0x52f   :  { %v1071_v4 = vmul.f32 %v1069_v13, %v5951_v35  ;;  %v1070_v62 = vmul.f32 %v1069_v13, %v5949_v34  ;;  %v1073_v17 = vmul.f32 %v1069_v13, %v6155_v27 }
 0x531   :  { %v1077_v8 = vadd.f32 %v1071_v4, %v6093_v11  ;;  %v1076_v56 = vadd.f32 %v1070_v62, %v6069_v58 }
 0x533   :  { %v5375_v7 = vpop.eup %5374 }
 0x534   :  { %v5377_v5 = vpop.eup %5376  ;;  %v1040_v63 = vmul.f32 %v5375_v7, %v1038_v1  ;;  %v1072_v1 = vmul.f32 %v1069_v13, %v5955_v37 }
 0x535   :  { %v1039_v47 = vmul.f32 %v5377_v5, %v1037_v10 }
 0x536   :  { %v6763_v28 = vadd.f32 %v1042_v29, %v1040_v63  ;;  %v1079_v29 = vadd.f32 %v1073_v17, %v6194_v0  ;;  %v1078_v33 = vadd.f32 %v1072_v1, %v5957_v38 }
 0x537   :  { %v6765_v18 = vadd.f32 %v1041_v16, %v1039_v47 }
 0x539   :  { %v5190_v49 = vpack.c.bf16 %v6763_v28, %v6765_v18 }
 0x53b   :  { %5191 = vmatprep.subr.bf16.mxu1 %v5190_v49 }
 0x53c   :  { %5193 = vmatpush3.bf16.msra.mxu1 %v5190_v49 }
 0x53f   :  { %4925 = vmatmul.mubr.msk.f32.vlgmr.msra.gmra.mrb[12].mxu1 %vm192_vm0, %v6616_v53 }
 0x540   :  { %4927 = vmatprep.mubr.msk.f32.mxu1 %vm192_vm0, %v6623_v54 }
 0x543   :  { %4928 = vmatmul.mubr.msk.f32.gmra.mrb[14].mxu1 %vm192_vm0, %v6630_v21 }
 0x544   :  { %4930 = vmatprep.mubr.msk.f32.mxu1 %vm192_vm0, %v6637_v31 }
 0x547   :  { %4931 = vmatmul.mubr.msk.f32.gmra.mrb[16].mxu1 %vm192_vm0, %v6644_v23 }
 0x548   :  { %4950 = vmatprep.mubr.msk.f32.mxu1 %vm192_vm0, %v6651_v9 }
 0x612   :  { %v4926_v2 = vpop.f32.mrb[12].mxu1 }
 0x613   :  { %v1154_v32 = vadd.f32 %v4926_v2, %v6121_v43  ;;  %v1148_v25 = vpop.f32.mrb[13].mxu1 }
 0x614   :  { %v1149_v42 = vadd.f32 %v1148_v25, %v5953_v36 }
 0x615   :  { %v1178_v7 = vadd.f32 %v1154_v32, %v1077_v8 }
 0x616   :  { %v1177_v10 = vadd.f32 %v1149_v42, %v1076_v56  ;;  %v4929_v5 = vpop.f32.mrb[14].mxu1 }
 0x617   :  { %v4477_v63 = vmul.f32 -1.442695, %v1178_v7  ;;  %v1164_v47 = vadd.f32 %v4929_v5, %v7748_v30  ;;  %v1158_v16 = vpop.f32.mrb[15].mxu1  ;;  %v1075_v5 = vmul.f32 %v1069_v13, %v6288_v61 }
 0x618   :  { %v4476_v49 = vmul.f32 -1.442695, %v1177_v10  ;;  %v1159_v15 = vadd.f32 %v1158_v16, %v5959_v39 }
 0x619   :  { %5378 = vpow2.f32 %v4477_v63  ;;  %v1192_v60 = vadd.f32 %v1164_v47, %v1079_v29  ;;  %v1074_v29 = vmul.f32 %v1069_v13, %v5961_v40 }
 0x61a   :  { %5380 = vpow2.f32 %v4476_v49  ;;  %v1191_v4 = vadd.f32 %v1159_v15, %v1078_v33  ;;  %v4932_v62 = vpop.f32.mrb[16].mxu1  ;;  %v1081_v15 = vadd.f32 %v1075_v5, %v6335_v57 }
 0x61b   :  { %v1168_v2 = vpop.f32.mrb[17].mxu1  ;;  %v4479_v8 = vmul.f32 -1.442695, %v1192_v60  ;;  %v1174_v47 = vadd.f32 %v4932_v62, %v6309_v55 }
 0x61c   :  { %v4478_v32 = vmul.f32 -1.442695, %v1191_v4  ;;  %v1169_v49 = vadd.f32 %v1168_v2, %v5963_v41  ;;  %v1080_v4 = vadd.f32 %v1074_v29, %v5971_v44 }
 0x61d   :  { %5382 = vpow2.f32 %v4479_v8 }
 0x61e   :  { %5384 = vpow2.f32 %v4478_v32 }
 0x623   :  { %v5379_v25 = vpop.eup %5378 }
 0x624   :  { %v5381_v17 = vpop.eup %5380  ;;  %v1186_v56 = vadd.f32 1.0, %v5379_v25 }
 0x625   :  { %v1185_v42 = vadd.f32 1.0, %v5381_v17 }
 0x626   :  { %5386 = vrcp.f32 %v1186_v56 }
 0x627   :  { %5388 = vrcp.f32 %v1185_v42  ;;  %v5383_v7 = vpop.eup %5382 }
 0x628   :  { %v5385_v1 = vpop.eup %5384  ;;  %v1200_v10 = vadd.f32 1.0, %v5383_v7 }
 0x629   :  { %v1199_v63 = vadd.f32 1.0, %v5385_v1 }
 0x62a   :  { %5390 = vrcp.f32 %v1200_v10 }
 0x62b   :  { %5392 = vrcp.f32 %v1199_v63 }
 0x630   :  { %v5387_v16 = vpop.eup %5386 }
 0x631   :  { %v5389_v33 = vpop.eup %5388  ;;  %v1206_v60 = vmul.f32 %v5387_v16, %v1174_v47 }
 0x632   :  { %v1205_v8 = vmul.f32 %v5389_v33, %v1169_v49 }
 0x633   :  { %v1208_v32 = vadd.f32 %v1206_v60, %v1081_v15 }
 0x634   :  { %v1207_v25 = vadd.f32 %v1205_v8, %v1080_v4  ;;  %v5391_v17 = vpop.eup %5390 }
 0x635   :  { %5394 = vtanh.f32 %v1208_v32  ;;  %v5393_v13 = vpop.eup %5392  ;;  %v1212_v56 = vsub.f32 1.0, %v5391_v17  ;;  %v1216_v1 = vmul.f32 %v5391_v17, %v6763_v28  ;;  %v7761_v28 = vld [vmem:[#allocation14_spill] sm:$0xff] }
 0x636   :  { %5396 = vtanh.f32 %v1207_v25  ;;  %v1211_v42 = vsub.f32 1.0, %v5393_v13  ;;  %v1215_v5 = vmul.f32 %v5393_v13, %v6765_v18  ;;  %v7762_v18 = vld [vmem:[#allocation10_spill] sm:$0xff] }
 0x637   :  { %v7763_v16 = vsub.f32 %v7761_v28, %v7762_v18 }
 0x639   :  { %v1243_v49 = vrot.slane %v7763_v16, %v6135_v14 }
 0x63b   :  { %v1245_v33 = vmul.f32 %v1243_v49, %v5951_v35  ;;  %v1244_v15 = vmul.f32 %v1243_v49, %v5949_v34  ;;  %v1247_v25 = vmul.f32 %v1243_v49, %v6155_v27 }
 0x63d   :  { %v1251_v4 = vadd.f32 %v1245_v33, %v6093_v11  ;;  %v1250_v17 = vadd.f32 %v1244_v15, %v6069_v58 }
 0x63f   :  { %v5395_v62 = vpop.eup %5394 }
 0x640   :  { %v5397_v7 = vpop.eup %5396  ;;  %v1214_v2 = vmul.f32 %v5395_v62, %v1212_v56  ;;  %v1246_v56 = vmul.f32 %v1243_v49, %v5955_v37 }
 0x641   :  { %v1213_v10 = vmul.f32 %v5397_v7, %v1211_v42 }
 0x642   :  { %v6805_v63 = vadd.f32 %v1216_v1, %v1214_v2  ;;  %v1253_v1 = vadd.f32 %v1247_v25, %v6194_v0  ;;  %v1252_v28 = vadd.f32 %v1246_v56, %v5957_v38 }
 0x643   :  { %v6807_v29 = vadd.f32 %v1215_v5, %v1213_v10 }
 0x645   :  { %v5194_v47 = vpack.c.bf16 %v6805_v63, %v6807_v29 }
 0x647   :  { %5195 = vmatprep.subr.bf16.mxu0 %v5194_v47 }
 0x648   :  { %5197 = vmatpush3.bf16.msra.mxu0 %v5194_v47 }
 0x64b   :  { %4938 = vmatmul.mubr.msk.f32.vlgmr.msra.gmra.mrb[18].mxu0 %vm192_vm0, %v6616_v53 }
 0x64c   :  { %4940 = vmatprep.mubr.msk.f32.mxu0 %vm192_vm0, %v6623_v54 }
 0x64f   :  { %4941 = vmatmul.mubr.msk.f32.gmra.mrb[20].mxu0 %vm192_vm0, %v6630_v21 }
 0x650   :  { %4943 = vmatprep.mubr.msk.f32.mxu0 %vm192_vm0, %v6637_v31 }
 0x653   :  { %4944 = vmatmul.mubr.msk.f32.gmra.mrb[22].mxu0 %vm192_vm0, %v6644_v23 }
 0x654   :  { %4963 = vmatprep.mubr.msk.f32.mxu0 %vm192_vm0, %v6651_v9 }
 0x71e   :  { %v4939_v60 = vpop.f32.mrb[18].mxu0 }
 0x71f   :  { %v1328_v8 = vadd.f32 %v4939_v60, %v6121_v43  ;;  %v1322_v32 = vpop.f32.mrb[19].mxu0 }
 0x720   :  { %v1323_v13 = vadd.f32 %v1322_v32, %v5953_v36 }
 0x721   :  { %v1352_v62 = vadd.f32 %v1328_v8, %v1251_v4 }
 0x722   :  { %v1351_v42 = vadd.f32 %v1323_v13, %v1250_v17  ;;  %v4942_v7 = vpop.f32.mrb[20].mxu0 }
 0x723   :  { %v4487_v2 = vmul.f32 -1.442695, %v1352_v62  ;;  %v1338_v10 = vadd.f32 %v4942_v7, %v7748_v30  ;;  %v1332_v5 = vpop.f32.mrb[21].mxu0  ;;  %v1249_v7 = vmul.f32 %v1243_v49, %v6288_v61 }
 0x724   :  { %v4486_v47 = vmul.f32 -1.442695, %v1351_v42  ;;  %v1333_v18 = vadd.f32 %v1332_v5, %v5959_v39 }
 0x725   :  { %5398 = vpow2.f32 %v4487_v2  ;;  %v1366_v16 = vadd.f32 %v1338_v10, %v1253_v1  ;;  %v1248_v1 = vmul.f32 %v1243_v49, %v5961_v40 }
 0x726   :  { %5400 = vpow2.f32 %v4486_v47  ;;  %v1365_v33 = vadd.f32 %v1333_v18, %v1252_v28  ;;  %v4945_v15 = vpop.f32.mrb[22].mxu0  ;;  %v1255_v18 = vadd.f32 %v1249_v7, %v6335_v57 }
 0x727   :  { %v1342_v60 = vpop.f32.mrb[23].mxu0  ;;  %v4489_v4 = vmul.f32 -1.442695, %v1366_v16  ;;  %v1348_v10 = vadd.f32 %v4945_v15, %v6309_v55 }
 0x728   :  { %v4488_v8 = vmul.f32 -1.442695, %v1365_v33  ;;  %v1343_v47 = vadd.f32 %v1342_v60, %v5963_v41  ;;  %v1254_v33 = vadd.f32 %v1248_v1, %v5971_v44 }
 0x729   :  { %5402 = vpow2.f32 %v4489_v4 }
 0x72a   :  { %5404 = vpow2.f32 %v4488_v8 }
 0x72f   :  { %v5399_v32 = vpop.eup %5398 }
 0x730   :  { %v5401_v25 = vpop.eup %5400  ;;  %v1360_v17 = vadd.f32 1.0, %v5399_v32 }
 0x731   :  { %v1359_v13 = vadd.f32 1.0, %v5401_v25 }
 0x732   :  { %5406 = vrcp.f32 %v1360_v17 }
 0x733   :  { %5408 = vrcp.f32 %v1359_v13  ;;  %v5403_v62 = vpop.eup %5402 }
 0x734   :  { %v5405_v56 = vpop.eup %5404  ;;  %v1374_v42 = vadd.f32 1.0, %v5403_v62 }
 0x735   :  { %v1373_v2 = vadd.f32 1.0, %v5405_v56 }
 0x736   :  { %5410 = vrcp.f32 %v1374_v42 }
 0x737   :  { %5412 = vrcp.f32 %v1373_v2 }
 0x73c   :  { %v5407_v5 = vpop.eup %5406 }
 0x73d   :  { %v5409_v28 = vpop.eup %5408  ;;  %v1380_v16 = vmul.f32 %v5407_v5, %v1348_v10 }
 0x73e   :  { %v1379_v4 = vmul.f32 %v5409_v28, %v1343_v47 }
 0x73f   :  { %v1382_v8 = vadd.f32 %v1380_v16, %v1255_v18 }
 0x740   :  { %v1381_v32 = vadd.f32 %v1379_v4, %v1254_v33  ;;  %v5411_v25 = vpop.eup %5410 }
 0x741   :  { %5414 = vtanh.f32 %v1382_v8  ;;  %v5413_v49 = vpop.eup %5412  ;;  %v1386_v17 = vsub.f32 1.0, %v5411_v25  ;;  %v1390_v56 = vmul.f32 %v5411_v25, %v6805_v63  ;;  %v7764_v63 = vld [vmem:[#allocation18_spill] sm:$0xff] }
 0x742   :  { %5416 = vtanh.f32 %v1381_v32  ;;  %v1385_v13 = vsub.f32 1.0, %v5413_v49  ;;  %v1389_v7 = vmul.f32 %v5413_v49, %v6807_v29  ;;  %v7765_v29 = vld [vmem:[#allocation12_spill] sm:$0xff] }
 0x743   :  { %v7766_v5 = vsub.f32 %v7764_v63, %v7765_v29 }
 0x745   :  { %v1417_v47 = vrot.slane %v7766_v5, %v6135_v14 }
 0x747   :  { %v1419_v28 = vmul.f32 %v1417_v47, %v5951_v35  ;;  %v1418_v18 = vmul.f32 %v1417_v47, %v5949_v34  ;;  %v1421_v32 = vmul.f32 %v1417_v47, %v6155_v27 }
 0x749   :  { %v1425_v33 = vadd.f32 %v1419_v28, %v6093_v11  ;;  %v1424_v25 = vadd.f32 %v1418_v18, %v6069_v58 }
 0x74b   :  { %v5415_v15 = vpop.eup %5414 }
 0x74c   :  { %v5417_v62 = vpop.eup %5416  ;;  %v1388_v60 = vmul.f32 %v5415_v15, %v1386_v17  ;;  %v1420_v17 = vmul.f32 %v1417_v47, %v5955_v37 }
 0x74d   :  { %v1387_v42 = vmul.f32 %v5417_v62, %v1385_v13 }
 0x74e   :  { %v6847_v2 = vadd.f32 %v1390_v56, %v1388_v60  ;;  %v1427_v56 = vadd.f32 %v1421_v32, %v6194_v0  ;;  %v1426_v63 = vadd.f32 %v1420_v17, %v5957_v38 }
 0x74f   :  { %v6849_v1 = vadd.f32 %v1389_v7, %v1387_v42 }
 0x751   :  { %v5198_v10 = vpack.c.bf16 %v6847_v2, %v6849_v1 }
 0x753   :  { %5199 = vmatprep.subr.bf16.mxu1 %v5198_v10 }
 0x754   :  { %5201 = vmatpush3.bf16.msra.mxu1 %v5198_v10 }
 0x757   :  { %4951 = vmatmul.mubr.msk.f32.vlgmr.msra.gmra.mrb[18].mxu1 %vm192_vm0, %v6616_v53 }
 0x758   :  { %4953 = vmatprep.mubr.msk.f32.mxu1 %vm192_vm0, %v6623_v54 }
 0x75b   :  { %4954 = vmatmul.mubr.msk.f32.gmra.mrb[20].mxu1 %vm192_vm0, %v6630_v21 }
 0x75c   :  { %4956 = vmatprep.mubr.msk.f32.mxu1 %vm192_vm0, %v6637_v31 }
 0x75f   :  { %4957 = vmatmul.mubr.msk.f32.gmra.mrb[22].mxu1 %vm192_vm0, %v6644_v23 }
 0x760   :  { %4976 = vmatprep.mubr.msk.f32.mxu1 %vm192_vm0, %v6651_v9 }
 0x82a   :  { %v4952_v16 = vpop.f32.mrb[18].mxu1 }
 0x82b   :  { %v1502_v4 = vadd.f32 %v4952_v16, %v6121_v43  ;;  %v1496_v8 = vpop.f32.mrb[19].mxu1 }
 0x82c   :  { %v1497_v49 = vadd.f32 %v1496_v8, %v5953_v36 }
 0x82d   :  { %v1526_v15 = vadd.f32 %v1502_v4, %v1425_v33 }
 0x82e   :  { %v1525_v13 = vadd.f32 %v1497_v49, %v1424_v25  ;;  %v4955_v62 = vpop.f32.mrb[20].mxu1 }
 0x82f   :  { %v4497_v60 = vmul.f32 -1.442695, %v1526_v15  ;;  %v1512_v42 = vadd.f32 %v4955_v62, %v7748_v30  ;;  %v1506_v7 = vpop.f32.mrb[21].mxu1  ;;  %v1423_v62 = vmul.f32 %v1417_v47, %v6288_v61 }
 0x830   :  { %v4496_v10 = vmul.f32 -1.442695, %v1525_v13  ;;  %v1507_v29 = vadd.f32 %v1506_v7, %v5959_v39 }
 0x831   :  { %5418 = vpow2.f32 %v4497_v60  ;;  %v1540_v5 = vadd.f32 %v1512_v42, %v1427_v56  ;;  %v1422_v56 = vmul.f32 %v1417_v47, %v5961_v40 }
 0x832   :  { %5420 = vpow2.f32 %v4496_v10  ;;  %v1539_v28 = vadd.f32 %v1507_v29, %v1426_v63  ;;  %v4958_v18 = vpop.f32.mrb[22].mxu1  ;;  %v1429_v29 = vadd.f32 %v1423_v62, %v6335_v57 }
 0x833   :  { %v1516_v16 = vpop.f32.mrb[23].mxu1  ;;  %v4499_v33 = vmul.f32 -1.442695, %v1540_v5  ;;  %v1522_v42 = vadd.f32 %v4958_v18, %v6309_v55 }
 0x834   :  { %v4498_v4 = vmul.f32 -1.442695, %v1539_v28  ;;  %v1517_v10 = vadd.f32 %v1516_v16, %v5963_v41  ;;  %v1428_v28 = vadd.f32 %v1422_v56, %v5971_v44 }
 0x835   :  { %5422 = vpow2.f32 %v4499_v33 }
 0x836   :  { %5424 = vpow2.f32 %v4498_v4 }
 0x83b   :  { %v5419_v8 = vpop.eup %5418 }
 0x83c   :  { %v5421_v32 = vpop.eup %5420  ;;  %v1534_v25 = vadd.f32 1.0, %v5419_v8 }
 0x83d   :  { %v1533_v49 = vadd.f32 1.0, %v5421_v32 }
 0x83e   :  { %5426 = vrcp.f32 %v1534_v25 }
 0x83f   :  { %5428 = vrcp.f32 %v1533_v49  ;;  %v5423_v15 = vpop.eup %5422 }
 0x840   :  { %v5425_v17 = vpop.eup %5424  ;;  %v1548_v13 = vadd.f32 1.0, %v5423_v15 }
 0x841   :  { %v1547_v60 = vadd.f32 1.0, %v5425_v17 }
 0x842   :  { %5430 = vrcp.f32 %v1548_v13 }
 0x843   :  { %5432 = vrcp.f32 %v1547_v60 }
 0x848   :  { %v5427_v7 = vpop.eup %5426 }
 0x849   :  { %v5429_v63 = vpop.eup %5428  ;;  %v1554_v5 = vmul.f32 %v5427_v7, %v1522_v42 }
 0x84a   :  { %v1553_v33 = vmul.f32 %v5429_v63, %v1517_v10 }
 0x84b   :  { %v1556_v4 = vadd.f32 %v1554_v5, %v1429_v29 }
 0x84c   :  { %v1555_v8 = vadd.f32 %v1553_v33, %v1428_v28  ;;  %v5431_v32 = vpop.eup %5430 }
 0x84d   :  { %5434 = vtanh.f32 %v1556_v4  ;;  %v5433_v47 = vpop.eup %5432  ;;  %v1560_v25 = vsub.f32 1.0, %v5431_v32  ;;  %v1564_v17 = vmul.f32 %v5431_v32, %v6847_v2  ;;  %v7767_v2 = vld [vmem:[#allocation19_spill] sm:$0xff] }
 0x84e   :  { %5436 = vtanh.f32 %v1555_v8  ;;  %v1559_v49 = vsub.f32 1.0, %v5433_v47  ;;  %v1563_v62 = vmul.f32 %v5433_v47, %v6849_v1  ;;  %v7768_v1 = vld [vmem:[#allocation15_spill] sm:$0xff] }
 0x84f   :  { %v7769_v7 = vsub.f32 %v7767_v2, %v7768_v1 }
 0x857   :  { %v5435_v18 = vpop.eup %5434 }
 0x858   :  { %v5437_v15 = vpop.eup %5436  ;;  %v1562_v16 = vmul.f32 %v5435_v18, %v1560_v25 }
 0x859   :  { %v1561_v13 = vmul.f32 %v5437_v15, %v1559_v49 }
 0x85a   :  { %v6889_v60 = vadd.f32 %v1564_v17, %v1562_v16 }
 0x85b   :  { %v6891_v56 = vadd.f32 %v1563_v62, %v1561_v13 }
 0x85d   :  { %v5202_v42 = vpack.c.bf16 %v6889_v60, %v6891_v56 }
 0x85f   :  { %5203 = vmatprep.subr.bf16.mxu0 %v5202_v42 }
 0x860   :  { %5205 = vmatpush3.bf16.msra.mxu0 %v5202_v42 }
 0x863   :  { %4964 = vmatmul.mubr.msk.f32.vlgmr.msra.gmra.mrb[24].mxu0 %vm192_vm0, %v6616_v53  ;;  %v1591_v53 = vrot.slane %v7769_v7, %v6135_v14 }
 0x864   :  { %4966 = vmatprep.mubr.msk.f32.mxu0 %vm192_vm0, %v6623_v54 }
 0x865   :  { %v1593_v10 = vmul.f32 %v1591_v53, %v5951_v35  ;;  %v1592_v54 = vmul.f32 %v1591_v53, %v5949_v34  ;;  %v1594_v28 = vmul.f32 %v1591_v53, %v5955_v37 }
 0x867   :  { %4967 = vmatmul.mubr.msk.f32.gmra.mrb[26].mxu0 %vm192_vm0, %v6630_v21  ;;  %v1599_v21 = vadd.f32 %v1593_v10, %v6093_v11  ;;  %v1598_v5 = vadd.f32 %v1592_v54, %v6069_v58  ;;  %v1600_v15 = vadd.f32 %v1594_v28, %v5957_v38 }
 0x868   :  { %4969 = vmatprep.mubr.msk.f32.mxu0 %vm192_vm0, %v6637_v31 }
 0x86b   :  { %4970 = vmatmul.mubr.msk.f32.gmra.mrb[28].mxu0 %vm192_vm0, %v6644_v23  ;;  %v1595_v23 = vmul.f32 %v1591_v53, %v6155_v27 }
 0x86c   :  { %4989 = vmatprep.mubr.msk.f32.mxu0 %vm192_vm0, %v6651_v9 }
 0x86d   :  { %v1601_v47 = vadd.f32 %v1595_v23, %v6194_v0  ;;  %v1597_v23 = vmul.f32 %v1591_v53, %v6288_v61 }
 0x936   :  { %v4965_v63 = vpop.f32.mrb[24].mxu0 }
 0x937   :  { %v1676_v31 = vadd.f32 %v4965_v63, %v6121_v43  ;;  %v1670_v29 = vpop.f32.mrb[25].mxu0 }
 0x938   :  { %v1671_v9 = vadd.f32 %v1670_v29, %v5953_v36 }
 0x939   :  { %v1700_v33 = vadd.f32 %v1676_v31, %v1599_v21 }
 0x93a   :  { %v1699_v4 = vadd.f32 %v1671_v9, %v1598_v5  ;;  %v4968_v8 = vpop.f32.mrb[26].mxu0  ;;  %v1596_v9 = vmul.f32 %v1591_v53, %v5961_v40 }
 0x93b   :  { %v4507_v32 = vmul.f32 -1.442695, %v1700_v33  ;;  %v1686_v25 = vadd.f32 %v4968_v8, %v7748_v30  ;;  %v1680_v18 = vpop.f32.mrb[27].mxu0 }
 0x93c   :  { %v4506_v49 = vmul.f32 -1.442695, %v1699_v4  ;;  %v1681_v16 = vadd.f32 %v1680_v18, %v5959_v39 }
 0x93d   :  { %5438 = vpow2.f32 %v4507_v32  ;;  %v1714_v17 = vadd.f32 %v1686_v25, %v1601_v47  ;;  %v1603_v32 = vadd.f32 %v1597_v23, %v6335_v57  ;;  %v1602_v25 = vadd.f32 %v1596_v9, %v5971_v44  ;;  %v6968_v23 = vld [vmem:[%s7648_s4 + $0x28] sm:$0xff]  ;;  %v7770_v9 = vld [vmem:[#allocation21_spill] sm:$0xff] }
 0x93e   :  { %5440 = vpow2.f32 %v4506_v49  ;;  %v1713_v13 = vadd.f32 %v1681_v16, %v1600_v15  ;;  %v4971_v62 = vpop.f32.mrb[28].mxu0 }
 0x93f   :  { %v1690_v42 = vpop.f32.mrb[29].mxu0  ;;  %v4509_v2 = vmul.f32 -1.442695, %v1714_v17  ;;  %v1696_v28 = vadd.f32 %v4971_v62, %v6309_v55 }
 0x940   :  { %v4508_v1 = vmul.f32 -1.442695, %v1713_v13  ;;  %v1691_v4 = vadd.f32 %v1690_v42, %v5963_v41 }
 0x941   :  { %5442 = vpow2.f32 %v4509_v2 }
 0x942   :  { %5444 = vpow2.f32 %v4508_v1 }
 0x947   :  { %v5439_v7 = vpop.eup %5438 }
 0x948   :  { %v5441_v10 = vpop.eup %5440  ;;  %v1708_v54 = vadd.f32 1.0, %v5439_v7 }
 0x949   :  { %v1707_v63 = vadd.f32 1.0, %v5441_v10 }
 0x94a   :  { %5446 = vrcp.f32 %v1708_v54 }
 0x94b   :  { %5448 = vrcp.f32 %v1707_v63  ;;  %v5443_v21 = vpop.eup %5442 }
 0x94c   :  { %v5445_v31 = vpop.eup %5444  ;;  %v1722_v29 = vadd.f32 1.0, %v5443_v21 }
 0x94d   :  { %v1721_v5 = vadd.f32 1.0, %v5445_v31  ;;  %v6940_v31 = vld [vmem:[%s7648_s4 + $0x8] sm:$0xff] }
 0x94e   :  { %5450 = vrcp.f32 %v1722_v29  ;;  %v6961_v29 = vld [vmem:[%s7648_s4 + $0x20] sm:$0xff] }
 0x94f   :  { %5452 = vrcp.f32 %v1721_v5  ;;  %v6975_v5 = vld [vmem:[%s7648_s4] sm:$0xff] }
 0x954   :  { %v5447_v33 = vpop.eup %5446 }
 0x955   :  { %v5449_v8 = vpop.eup %5448  ;;  %v1728_v47 = vmul.f32 %v5447_v33, %v1696_v28  ;;  %v7771_v28 = vld [vmem:[#allocation17_spill] sm:$0xff] }
 0x956   :  { %v1727_v18 = vmul.f32 %v5449_v8, %v1691_v4  ;;  %v7772_v33 = vsub.f32 %v7770_v9, %v7771_v28 }
 0x957   :  { %v1730_v49 = vadd.f32 %v1728_v47, %v1603_v32 }
 0x958   :  { %v1729_v15 = vadd.f32 %v1727_v18, %v1602_v25  ;;  %v5451_v16 = vpop.eup %5450  ;;  %v1765_v4 = vrot.slane %v7772_v33, %v6135_v14 }
 0x959   :  { %5454 = vtanh.f32 %v1730_v49  ;;  %v5453_v53 = vpop.eup %5452  ;;  %v1734_v17 = vsub.f32 1.0, %v5451_v16  ;;  %v1738_v1 = vmul.f32 %v5451_v16, %v6889_v60  ;;  %v6947_v60 = vld [vmem:[%s7648_s4 + $0x10] sm:$0xff] }
 0x95a   :  { %5456 = vtanh.f32 %v1729_v15  ;;  %v1733_v62 = vsub.f32 1.0, %v5453_v53  ;;  %v1737_v10 = vmul.f32 %v5453_v53, %v6891_v56  ;;  %v6954_v56 = vld [vmem:[%s7648_s4 + $0x18] sm:$0xff]  ;;  %v1767_v8 = vmul.f32 %v1765_v4, %v5951_v35 }
 0x95b   :  { %v1766_v32 = vmul.f32 %v1765_v4, %v5949_v34  ;;  %v1769_v15 = vmul.f32 %v1765_v4, %v6155_v27 }
 0x95c   :  { %v1773_v25 = vadd.f32 %v1767_v8, %v6093_v11 }
 0x95d   :  { %v1772_v16 = vadd.f32 %v1766_v32, %v6069_v58 }
 0x963   :  { %v5455_v13 = vpop.eup %5454 }
 0x964   :  { %v5457_v2 = vpop.eup %5456  ;;  %v1736_v42 = vmul.f32 %v5455_v13, %v1734_v17  ;;  %v1768_v17 = vmul.f32 %v1765_v4, %v5955_v37 }
 0x965   :  { %v1735_v7 = vmul.f32 %v5457_v2, %v1733_v62 }
 0x966   :  { %v6931_v54 = vadd.f32 %v1738_v1, %v1736_v42  ;;  %v1775_v1 = vadd.f32 %v1769_v15, %v6194_v0  ;;  %v1774_v9 = vadd.f32 %v1768_v17, %v5957_v38 }
 0x967   :  { %v6933_v63 = vadd.f32 %v1737_v10, %v1735_v7 }
 0x969   :  { %v5206_v21 = vpack.c.bf16 %v6931_v54, %v6933_v63 }
 0x96b   :  { %5207 = vmatprep.subr.bf16.mxu1 %v5206_v21 }
 0x96c   :  { %5209 = vmatpush3.bf16.msra.mxu1 %v5206_v21 }
 0x96f   :  { %4977 = vmatmul.mubr.msk.f32.vlgmr.msra.gmra.mrb[24].mxu1 %vm192_vm0, %v6940_v31 }
 0x970   :  { %4979 = vmatprep.mubr.msk.f32.mxu1 %vm192_vm0, %v6947_v60 }
 0x973   :  { %4980 = vmatmul.mubr.msk.f32.gmra.mrb[26].mxu1 %vm192_vm0, %v6954_v56 }
 0x974   :  { %4982 = vmatprep.mubr.msk.f32.mxu1 %vm192_vm0, %v6961_v29 }
 0x977   :  { %4983 = vmatmul.mubr.msk.f32.gmra.mrb[28].mxu1 %vm192_vm0, %v6968_v23 }
 0x978   :  { %5002 = vmatprep.mubr.msk.f32.mxu1 %vm192_vm0, %v6975_v5 }
 0xa42   :  { %v4978_v47 = vpop.f32.mrb[24].mxu1 }
 0xa43   :  { %v1850_v18 = vadd.f32 %v4978_v47, %v6121_v43  ;;  %v1844_v49 = vpop.f32.mrb[25].mxu1 }
 0xa44   :  { %v1845_v53 = vadd.f32 %v1844_v49, %v5953_v36 }
 0xa45   :  { %v1874_v13 = vadd.f32 %v1850_v18, %v1773_v25 }
 0xa46   :  { %v1873_v62 = vadd.f32 %v1845_v53, %v1772_v16  ;;  %v4981_v2 = vpop.f32.mrb[26].mxu1 }
 0xa47   :  { %v4517_v42 = vmul.f32 -1.442695, %v1874_v13  ;;  %v1860_v7 = vadd.f32 %v4981_v2, %v7748_v30  ;;  %v1854_v10 = vpop.f32.mrb[27].mxu1  ;;  %v1771_v2 = vmul.f32 %v1765_v4, %v6288_v61 }
 0xa48   :  { %v4516_v21 = vmul.f32 -1.442695, %v1873_v62  ;;  %v1855_v28 = vadd.f32 %v1854_v10, %v5959_v39 }
 0xa49   :  { %5458 = vpow2.f32 %v4517_v42  ;;  %v1888_v33 = vadd.f32 %v1860_v7, %v1775_v1  ;;  %v1770_v1 = vmul.f32 %v1765_v4, %v5961_v40 }
 0xa4a   :  { %5460 = vpow2.f32 %v4516_v21  ;;  %v1887_v8 = vadd.f32 %v1855_v28, %v1774_v9  ;;  %v4984_v32 = vpop.f32.mrb[28].mxu1  ;;  %v1777_v28 = vadd.f32 %v1771_v2, %v6335_v57 }
 0xa4b   :  { %v1864_v47 = vpop.f32.mrb[29].mxu1  ;;  %v4519_v25 = vmul.f32 -1.442695, %v1888_v33  ;;  %v1870_v7 = vadd.f32 %v4984_v32, %v6309_v55 }
 0xa4c   :  { %v4518_v18 = vmul.f32 -1.442695, %v1887_v8  ;;  %v1865_v21 = vadd.f32 %v1864_v47, %v5963_v41  ;;  %v1776_v8 = vadd.f32 %v1770_v1, %v5971_v44 }
 0xa4d   :  { %5462 = vpow2.f32 %v4519_v25 }
 0xa4e   :  { %5464 = vpow2.f32 %v4518_v18 }
 0xa53   :  { %v5459_v49 = vpop.eup %5458 }
 0xa54   :  { %v5461_v15 = vpop.eup %5460  ;;  %v1882_v16 = vadd.f32 1.0, %v5459_v49 }
 0xa55   :  { %v1881_v53 = vadd.f32 1.0, %v5461_v15 }
 0xa56   :  { %5466 = vrcp.f32 %v1882_v16 }
 0xa57   :  { %5468 = vrcp.f32 %v1881_v53  ;;  %v5463_v13 = vpop.eup %5462 }
 0xa58   :  { %v5465_v17 = vpop.eup %5464  ;;  %v1896_v62 = vadd.f32 1.0, %v5463_v13 }
 0xa59   :  { %v1895_v42 = vadd.f32 1.0, %v5465_v17 }
 0xa5a   :  { %5470 = vrcp.f32 %v1896_v62 }
 0xa5b   :  { %5472 = vrcp.f32 %v1895_v42 }
 0xa60   :  { %v5467_v10 = vpop.eup %5466 }
 0xa61   :  { %v5469_v9 = vpop.eup %5468  ;;  %v1902_v33 = vmul.f32 %v5467_v10, %v1870_v7 }
 0xa62   :  { %v1901_v25 = vmul.f32 %v5469_v9, %v1865_v21 }
 0xa63   :  { %v1904_v18 = vadd.f32 %v1902_v33, %v1777_v28 }
 0xa64   :  { %v1903_v49 = vadd.f32 %v1901_v25, %v1776_v8  ;;  %v5471_v15 = vpop.eup %5470 }
 0xa65   :  { %5474 = vtanh.f32 %v1904_v18  ;;  %v5473_v4 = vpop.eup %5472  ;;  %v1908_v16 = vsub.f32 1.0, %v5471_v15  ;;  %v1912_v17 = vmul.f32 %v5471_v15, %v6931_v54  ;;  %v7773_v54 = vsub.f32 %v6350_v20, %v6279_v45 }
 0xa66   :  { %5476 = vtanh.f32 %v1903_v49  ;;  %v1907_v53 = vsub.f32 1.0, %v5473_v4  ;;  %v1911_v2 = vmul.f32 %v5473_v4, %v6933_v63 }
 0xa67   :  { %v1939_v63 = vrot.slane %v7773_v54, %v6135_v14 }
 0xa69   :  { %v1941_v10 = vmul.f32 %v1939_v63, %v5951_v35  ;;  %v1940_v21 = vmul.f32 %v1939_v63, %v5949_v34  ;;  %v1943_v25 = vmul.f32 %v1939_v63, %v6155_v27  ;;  %v1942_v15 = vmul.f32 %v1939_v63, %v5955_v37 }
 0xa6b   :  { %v1947_v28 = vadd.f32 %v1941_v10, %v6093_v11  ;;  %v1946_v18 = vadd.f32 %v1940_v21, %v6069_v58 }
 0xa6f   :  { %v5475_v32 = vpop.eup %5474 }
 0xa70   :  { %v5477_v13 = vpop.eup %5476  ;;  %v1910_v47 = vmul.f32 %v5475_v32, %v1908_v16  ;;  %v1949_v32 = vadd.f32 %v1943_v25, %v6194_v0 }
 0xa71   :  { %v1909_v62 = vmul.f32 %v5477_v13, %v1907_v53 }
 0xa72   :  { %v7003_v42 = vadd.f32 %v1912_v17, %v1910_v47  ;;  %v1948_v17 = vadd.f32 %v1942_v15, %v5957_v38 }
 0xa73   :  { %v7005_v1 = vadd.f32 %v1911_v2, %v1909_v62 }
 0xa75   :  { %v5210_v7 = vpack.c.bf16 %v7003_v42, %v7005_v1 }
 0xa77   :  { %5211 = vmatprep.subr.bf16.mxu0 %v5210_v7 }
 0xa78   :  { %5213 = vmatpush3.bf16.msra.mxu0 %v5210_v7 }
 0xa7b   :  { %4990 = vmatmul.mubr.msk.f32.vlgmr.msra.gmra.mrb[30].mxu0 %vm192_vm0, %v6940_v31 }
 0xa7c   :  { %4992 = vmatprep.mubr.msk.f32.mxu0 %vm192_vm0, %v6947_v60 }
 0xa7f   :  { %4993 = vmatmul.mubr.msk.f32.gmra.mrb[32].mxu0 %vm192_vm0, %v6954_v56 }
 0xa80   :  { %4995 = vmatprep.mubr.msk.f32.mxu0 %vm192_vm0, %v6961_v29 }
 0xa83   :  { %4996 = vmatmul.mubr.msk.f32.gmra.mrb[34].mxu0 %vm192_vm0, %v6968_v23 }
 0xa84   :  { %5015 = vmatprep.mubr.msk.f32.mxu0 %vm192_vm0, %v6975_v5 }
 0xb4e   :  { %v4991_v9 = vpop.f32.mrb[30].mxu0 }
 0xb4f   :  { %v2024_v33 = vadd.f32 %v4991_v9, %v6121_v43  ;;  %v2018_v8 = vpop.f32.mrb[31].mxu0 }
 0xb50   :  { %v2019_v49 = vadd.f32 %v2018_v8, %v5953_v36 }
 0xb51   :  { %v2048_v45 = vadd.f32 %v2024_v33, %v1947_v28 }
 0xb52   :  { %v2047_v20 = vadd.f32 %v2019_v49, %v1946_v18  ;;  %v4994_v4 = vpop.f32.mrb[32].mxu0 }
 0xb53   :  { %v4527_v16 = vmul.f32 -1.442695, %v2048_v45  ;;  %v2034_v53 = vadd.f32 %v4994_v4, %v7748_v30  ;;  %v2028_v13 = vpop.f32.mrb[33].mxu0  ;;  %v1945_v45 = vmul.f32 %v1939_v63, %v6288_v61  ;;  %v1944_v4 = vmul.f32 %v1939_v63, %v5961_v40 }
 0xb54   :  { %v4526_v47 = vmul.f32 -1.442695, %v2047_v20  ;;  %v2029_v62 = vadd.f32 %v2028_v13, %v5959_v39 }
 0xb55   :  { %5478 = vpow2.f32 %v4527_v16  ;;  %v2062_v2 = vadd.f32 %v2034_v53, %v1949_v32 }
 0xb56   :  { %5480 = vpow2.f32 %v4526_v47  ;;  %v2061_v7 = vadd.f32 %v2029_v62, %v1948_v17  ;;  %v4997_v54 = vpop.f32.mrb[34].mxu0  ;;  %v1951_v47 = vadd.f32 %v1945_v45, %v6335_v57  ;;  %v1950_v62 = vadd.f32 %v1944_v4, %v5971_v44 }
 0xb57   :  { %v2038_v10 = vpop.f32.mrb[35].mxu0  ;;  %v4529_v21 = vmul.f32 -1.442695, %v2062_v2  ;;  %v2044_v16 = vadd.f32 %v4997_v54, %v6309_v55 }
 0xb58   :  { %v4528_v9 = vmul.f32 -1.442695, %v2061_v7  ;;  %v2039_v53 = vadd.f32 %v2038_v10, %v5963_v41 }
 0xb59   :  { %5482 = vpow2.f32 %v4529_v21 }
 0xb5a   :  { %5484 = vpow2.f32 %v4528_v9 }
 0xb5f   :  { %v5479_v28 = vpop.eup %5478 }
 0xb60   :  { %v5481_v33 = vpop.eup %5480  ;;  %v2056_v8 = vadd.f32 1.0, %v5479_v28 }
 0xb61   :  { %v2055_v25 = vadd.f32 1.0, %v5481_v33 }
 0xb62   :  { %5486 = vrcp.f32 %v2056_v8 }
 0xb63   :  { %5488 = vrcp.f32 %v2055_v25  ;;  %v5483_v18 = vpop.eup %5482 }
 0xb64   :  { %v5485_v49 = vpop.eup %5484  ;;  %v2070_v15 = vadd.f32 1.0, %v5483_v18 }
 0xb65   :  { %v2069_v20 = vadd.f32 1.0, %v5485_v49 }
 0xb66   :  { %5490 = vrcp.f32 %v2070_v15 }
 0xb67   :  { %5492 = vrcp.f32 %v2069_v20 }
 0xb6c   :  { %v5487_v32 = vpop.eup %5486 }
 0xb6d   :  { %v5489_v13 = vpop.eup %5488  ;;  %v2076_v17 = vmul.f32 %v5487_v32, %v2044_v16 }
 0xb6e   :  { %v2075_v2 = vmul.f32 %v5489_v13, %v2039_v53 }
 0xb6f   :  { %v2078_v7 = vadd.f32 %v2076_v17, %v1951_v47 }
 0xb70   :  { %v2077_v21 = vadd.f32 %v2075_v2, %v1950_v62  ;;  %v5491_v9 = vpop.eup %5490 }
 0xb71   :  { %5494 = vtanh.f32 %v2078_v7  ;;  %v5493_v63 = vpop.eup %5492  ;;  %v2082_v28 = vsub.f32 1.0, %v5491_v9  ;;  %v2086_v25 = vmul.f32 %v5491_v9, %v7003_v42  ;;  %v7774_v42 = vld [vmem:[#allocation23_spill] sm:$0xff] }
 0xb72   :  { %5496 = vtanh.f32 %v2077_v21  ;;  %v2081_v33 = vsub.f32 1.0, %v5493_v63  ;;  %v2085_v49 = vmul.f32 %v5493_v63, %v7005_v1  ;;  %v7775_v1 = vld [vmem:[#allocation20_spill] sm:$0xff] }
 0xb73   :  { %v7776_v4 = vsub.f32 %v7774_v42, %v7775_v1 }
 0xb75   :  { %v2113_v16 = vrot.slane %v7776_v4, %v6135_v14 }
 0xb77   :  { %v2115_v32 = vmul.f32 %v2113_v16, %v5951_v35  ;;  %v2114_v53 = vmul.f32 %v2113_v16, %v5949_v34  ;;  %v2117_v2 = vmul.f32 %v2113_v16, %v6155_v27  ;;  %v2116_v9 = vmul.f32 %v2113_v16, %v5955_v37 }
 0xb79   :  { %v2121_v47 = vadd.f32 %v2115_v32, %v6093_v11  ;;  %v2120_v7 = vadd.f32 %v2114_v53, %v6069_v58 }
 0xb7b   :  { %v5495_v54 = vpop.eup %5494 }
 0xb7c   :  { %v5497_v8 = vpop.eup %5496  ;;  %v2084_v10 = vmul.f32 %v5495_v54, %v2082_v28 }
 0xb7d   :  { %v2083_v18 = vmul.f32 %v5497_v8, %v2081_v33  ;;  %v2123_v8 = vadd.f32 %v2117_v2, %v6194_v0 }
 0xb7e   :  { %v7045_v15 = vadd.f32 %v2086_v25, %v2084_v10 }
 0xb7f   :  { %v7047_v45 = vadd.f32 %v2085_v49, %v2083_v18  ;;  %v2122_v49 = vadd.f32 %v2116_v9, %v5957_v38 }
 0xb81   :  { %v5214_v20 = vpack.c.bf16 %v7045_v15, %v7047_v45 }
 0xb83   :  { %5215 = vmatprep.subr.bf16.mxu1 %v5214_v20 }
 0xb84   :  { %5217 = vmatpush3.bf16.msra.mxu1 %v5214_v20 }
 0xb87   :  { %5003 = vmatmul.mubr.msk.f32.vlgmr.msra.gmra.mrb[30].mxu1 %vm192_vm0, %v6940_v31 }
 0xb88   :  { %5005 = vmatprep.mubr.msk.f32.mxu1 %vm192_vm0, %v6947_v60 }
 0xb8b   :  { %5006 = vmatmul.mubr.msk.f32.gmra.mrb[32].mxu1 %vm192_vm0, %v6954_v56 }
 0xb8c   :  { %5008 = vmatprep.mubr.msk.f32.mxu1 %vm192_vm0, %v6961_v29 }
 0xb8f   :  { %5009 = vmatmul.mubr.msk.f32.gmra.mrb[34].mxu1 %vm192_vm0, %v6968_v23 }
 0xb90   :  { %5028 = vmatprep.mubr.msk.f32.mxu1 %vm192_vm0, %v6975_v5 }
 0xc5a   :  { %v5004_v13 = vpop.f32.mrb[30].mxu1 }
 0xc5b   :  { %v2198_v17 = vadd.f32 %v5004_v13, %v6121_v43  ;;  %v2192_v62 = vpop.f32.mrb[31].mxu1 }
 0xc5c   :  { %v2193_v21 = vadd.f32 %v2192_v62, %v5953_v36 }
 0xc5d   :  { %v2222_v63 = vadd.f32 %v2198_v17, %v2121_v47 }
 0xc5e   :  { %v2221_v28 = vadd.f32 %v2193_v21, %v2120_v7  ;;  %v5007_v54 = vpop.f32.mrb[32].mxu1 }
 0xc5f   :  { %v4537_v33 = vmul.f32 -1.442695, %v2222_v63  ;;  %v2208_v10 = vadd.f32 %v5007_v54, %v7748_v30  ;;  %v2202_v25 = vpop.f32.mrb[33].mxu1  ;;  %v2119_v63 = vmul.f32 %v2113_v16, %v6288_v61  ;;  %v2118_v54 = vmul.f32 %v2113_v16, %v5961_v40 }
 0xc60   :  { %v4536_v18 = vmul.f32 -1.442695, %v2221_v28  ;;  %v2203_v20 = vadd.f32 %v2202_v25, %v5959_v39 }
 0xc61   :  { %5498 = vpow2.f32 %v4537_v33  ;;  %v2236_v42 = vadd.f32 %v2208_v10, %v2123_v8 }
 0xc62   :  { %5500 = vpow2.f32 %v4536_v18  ;;  %v2235_v1 = vadd.f32 %v2203_v20, %v2122_v49  ;;  %v5010_v4 = vpop.f32.mrb[34].mxu1  ;;  %v2125_v18 = vadd.f32 %v2119_v63, %v6335_v57  ;;  %v2124_v20 = vadd.f32 %v2118_v54, %v5971_v44 }
 0xc63   :  { %v2212_v32 = vpop.f32.mrb[35].mxu1  ;;  %v4539_v53 = vmul.f32 -1.442695, %v2236_v42  ;;  %v2218_v33 = vadd.f32 %v5010_v4, %v6309_v55 }
 0xc64   :  { %v4538_v13 = vmul.f32 -1.442695, %v2235_v1  ;;  %v2213_v10 = vadd.f32 %v2212_v32, %v5963_v41 }
 0xc65   :  { %5502 = vpow2.f32 %v4539_v53 }
 0xc66   :  { %5504 = vpow2.f32 %v4538_v13 }
 0xc6b   :  { %v5499_v47 = vpop.eup %5498 }
 0xc6c   :  { %v5501_v17 = vpop.eup %5500  ;;  %v2230_v62 = vadd.f32 1.0, %v5499_v47 }
 0xc6d   :  { %v2229_v2 = vadd.f32 1.0, %v5501_v17 }
 0xc6e   :  { %5506 = vrcp.f32 %v2230_v62 }
 0xc6f   :  { %5508 = vrcp.f32 %v2229_v2  ;;  %v5503_v7 = vpop.eup %5502 }
 0xc70   :  { %v5505_v21 = vpop.eup %5504  ;;  %v2244_v9 = vadd.f32 1.0, %v5503_v7 }
 0xc71   :  { %v2243_v28 = vadd.f32 1.0, %v5505_v21 }
 0xc72   :  { %5510 = vrcp.f32 %v2244_v9 }
 0xc73   :  { %5512 = vrcp.f32 %v2243_v28 }
 0xc78   :  { %v5507_v8 = vpop.eup %5506 }
 0xc79   :  { %v5509_v25 = vpop.eup %5508  ;;  %v2250_v49 = vmul.f32 %v5507_v8, %v2218_v33  ;;  %v7778_v8 = vld [vmem:[#allocation3_spill] sm:$0xff] }
 0xc7a   :  { %v2249_v42 = vmul.f32 %v5509_v25, %v2213_v10  ;;  %v2274_v10 = vrot.slane %v7778_v8, 7 }
 0xc7b   :  { %v2252_v1 = vadd.f32 %v2250_v49, %v2125_v18 }
 0xc7c   :  { %v2251_v53 = vadd.f32 %v2249_v42, %v2124_v20  ;;  %v5511_v13 = vpop.eup %5510  ;;  %v2276_v18 = vmul.f32 %v2274_v10, %v5987_v50 }
 0xc7d   :  { %5514 = vtanh.f32 %v2252_v1  ;;  %v5513_v16 = vpop.eup %5512  ;;  %v2256_v47 = vsub.f32 1.0, %v5511_v13  ;;  %v2260_v2 = vmul.f32 %v5511_v13, %v7045_v15  ;;  %v5770_v15 = vld [vmem:[%s7655_s0 + $0xc] sm:$0x1] }
 0xc7e   :  { %5516 = vtanh.f32 %v2251_v53  ;;  %v2255_v17 = vsub.f32 1.0, %v5513_v16  ;;  %v2259_v21 = vmul.f32 %v5513_v16, %v7047_v45  ;;  %v7777_v45 = vld [vmem:[#allocation22_spill] sm:$0xff] }
 0xc7f   :  { %v2268_v54 = vsub.f32 %v5770_v15, %v7777_v45 }
 0xc81   :  { %v2270_v33 = vrot.slane %v2268_v54, 7 }
 0xc83   :  { %v2272_v25 = vmul.f32 %v2270_v33, %v5979_v48 }
 0xc85   :  { %v2277_v49 = vadd.f32 %v2276_v18, %v2272_v25 }
 0xc87   :  { %v5515_v4 = vpop.eup %5514  ;;  %v2279_v20 = vrot.slane %v2277_v49, 1 }
 0xc88   :  { %v5517_v62 = vpop.eup %5516  ;;  %v2258_v32 = vmul.f32 %v5515_v4, %v2256_v47 }
 0xc89   :  { %v2257_v7 = vmul.f32 %v5517_v62, %v2255_v17  ;;  %v2281_v42 = vsub.f32 %v5770_v15, %v2279_v20 }
 0xc8a   :  { %v7087_v9 = vadd.f32 %v2260_v2, %v2258_v32 }
 0xc8b   :  { %v7089_v63 = vadd.f32 %v2259_v21, %v2257_v7  ;;  %v2282_v1 = vsub.f32 %v2281_v42, %v7777_v45 }
 0xc8d   :  { %v5218_v28 = vpack.c.bf16 %v7087_v9, %v7089_v63  ;;  %v2286_v53 = vrot.slane %v2282_v1, %v6135_v14 }
 0xc8f   :  { %5219 = vmatprep.subr.bf16.mxu0 %v5218_v28  ;;  %v2288_v13 = vmul.f32 %v2286_v53, %v5951_v35  ;;  %v2287_v16 = vmul.f32 %v2286_v53, %v5949_v34  ;;  %v2290_v48 = vmul.f32 %v2286_v53, %v6155_v27  ;;  %v2289_v2 = vmul.f32 %v2286_v53, %v5955_v37 }
 0xc90   :  { %5221 = vmatpush3.bf16.msra.mxu0 %v5218_v28 }
 0xc91   :  { %v2294_v4 = vadd.f32 %v2288_v13, %v6093_v11  ;;  %v2293_v50 = vadd.f32 %v2287_v16, %v6069_v58  ;;  %v2296_v45 = vadd.f32 %v2290_v48, %v6194_v0  ;;  %v2295_v10 = vadd.f32 %v2289_v2, %v5957_v38 }
 0xc93   :  { %5016 = vmatmul.mubr.msk.f32.vlgmr.msra.gmra.mrb[36].mxu0 %vm192_vm0, %v6940_v31 }
 0xc94   :  { %5018 = vmatprep.mubr.msk.f32.mxu0 %vm192_vm0, %v6947_v60 }
 0xc97   :  { %5019 = vmatmul.mubr.msk.f32.gmra.mrb[38].mxu0 %vm192_vm0, %v6954_v56 }
 0xc98   :  { %5021 = vmatprep.mubr.msk.f32.mxu0 %vm192_vm0, %v6961_v29 }
 0xc9b   :  { %5022 = vmatmul.mubr.msk.f32.gmra.mrb[40].mxu0 %vm192_vm0, %v6968_v23 }
 0xc9c   :  { %5041 = vmatprep.mubr.msk.f32.mxu0 %vm192_vm0, %v6975_v5 }
 0xd66   :  { %v5017_v47 = vpop.f32.mrb[36].mxu0 }
 0xd67   :  { %v2371_v17 = vadd.f32 %v5017_v47, %v6121_v43  ;;  %v2365_v62 = vpop.f32.mrb[37].mxu0 }
 0xd68   :  { %v2366_v32 = vadd.f32 %v2365_v62, %v5953_v36 }
 0xd69   :  { %v2395_v7 = vadd.f32 %v2371_v17, %v2294_v4 }
 0xd6a   :  { %v2394_v21 = vadd.f32 %v2366_v32, %v2293_v50  ;;  %v5020_v28 = vpop.f32.mrb[38].mxu0  ;;  %v2292_v32 = vmul.f32 %v2286_v53, %v6288_v61 }
 0xd6b   :  { %v4547_v15 = vmul.f32 -1.442695, %v2395_v7  ;;  %v2381_v54 = vadd.f32 %v5020_v28, %v7748_v30  ;;  %v2375_v33 = vpop.f32.mrb[39].mxu0  ;;  %v2291_v7 = vmul.f32 %v2286_v53, %v5961_v40 }
 0xd6c   :  { %v4546_v8 = vmul.f32 -1.442695, %v2394_v21  ;;  %v2376_v25 = vadd.f32 %v2375_v33, %v5959_v39 }
 0xd6d   :  { %5518 = vpow2.f32 %v4547_v15  ;;  %v2409_v18 = vadd.f32 %v2381_v54, %v2296_v45  ;;  %v2298_v54 = vadd.f32 %v2292_v32, %v6335_v57 }
 0xd6e   :  { %5520 = vpow2.f32 %v4546_v8  ;;  %v2408_v49 = vadd.f32 %v2376_v25, %v2295_v10  ;;  %v5023_v20 = vpop.f32.mrb[40].mxu0  ;;  %v2297_v8 = vadd.f32 %v2291_v7, %v5971_v44 }
 0xd6f   :  { %v2385_v42 = vpop.f32.mrb[41].mxu0  ;;  %v4549_v1 = vmul.f32 -1.442695, %v2409_v18  ;;  %v2391_v21 = vadd.f32 %v5023_v20, %v6309_v55 }
 0xd70   :  { %v4548_v13 = vmul.f32 -1.442695, %v2408_v49  ;;  %v2386_v15 = vadd.f32 %v2385_v42, %v5963_v41 }
 0xd71   :  { %5522 = vpow2.f32 %v4549_v1 }
 0xd72   :  { %5524 = vpow2.f32 %v4548_v13 }
 0xd77   :  { %v5519_v16 = vpop.eup %5518 }
 0xd78   :  { %v5521_v47 = vpop.eup %5520  ;;  %v2403_v4 = vadd.f32 1.0, %v5519_v16 }
 0xd79   :  { %v2402_v17 = vadd.f32 1.0, %v5521_v47 }
 0xd7a   :  { %5526 = vrcp.f32 %v2403_v4 }
 0xd7b   :  { %5528 = vrcp.f32 %v2402_v17  ;;  %v5523_v62 = vpop.eup %5522 }
 0xd7c   :  { %v5525_v48 = vpop.eup %5524  ;;  %v2417_v50 = vadd.f32 1.0, %v5523_v62 }
 0xd7d   :  { %v2416_v2 = vadd.f32 1.0, %v5525_v48 }
 0xd7e   :  { %5530 = vrcp.f32 %v2417_v50 }
 0xd7f   :  { %5532 = vrcp.f32 %v2416_v2 }
 0xd84   :  { %v5527_v28 = vpop.eup %5526 }
 0xd85   :  { %v5529_v45 = vpop.eup %5528  ;;  %v2423_v33 = vmul.f32 %v5527_v28, %v2391_v21 }
 0xd86   :  { %v2422_v10 = vmul.f32 %v5529_v45, %v2386_v15 }
 0xd87   :  { %v2425_v25 = vadd.f32 %v2423_v33, %v2298_v54 }
 0xd88   :  { %v2424_v18 = vadd.f32 %v2422_v10, %v2297_v8  ;;  %v5531_v49 = vpop.eup %5530 }
 0xd89   :  { %5534 = vtanh.f32 %v2425_v25  ;;  %v5533_v53 = vpop.eup %5532  ;;  %v2429_v1 = vsub.f32 1.0, %v5531_v49  ;;  %v2433_v47 = vmul.f32 %v5531_v49, %v7087_v9  ;;  %v7779_v9 = vsub.f32 %v6420_v12, %v6371_v59 }
 0xd8a   :  { %5536 = vtanh.f32 %v2424_v18  ;;  %v2428_v13 = vsub.f32 1.0, %v5533_v53  ;;  %v2432_v17 = vmul.f32 %v5533_v53, %v7089_v63 }
 0xd8b   :  { %v2456_v63 = vrot.slane %v7779_v9, %v6135_v14 }
 0xd8d   :  { %v2458_v32 = vmul.f32 %v2456_v63, %v5951_v35  ;;  %v2457_v2 = vmul.f32 %v2456_v63, %v5949_v34  ;;  %v2460_v45 = vmul.f32 %v2456_v63, %v6155_v27  ;;  %v2459_v8 = vmul.f32 %v2456_v63, %v5955_v37 }
 0xd8f   :  { %v2464_v21 = vadd.f32 %v2458_v32, %v6093_v11  ;;  %v2463_v54 = vadd.f32 %v2457_v2, %v6069_v58  ;;  %v2466_v18 = vadd.f32 %v2460_v45, %v6194_v0  ;;  %v2462_v45 = vmul.f32 %v2456_v63, %v6288_v61 }
 0xd93   :  { %v5535_v20 = vpop.eup %5534 }
 0xd94   :  { %v5537_v16 = vpop.eup %5536  ;;  %v2431_v42 = vmul.f32 %v5535_v20, %v2429_v1  ;;  %v2465_v20 = vadd.f32 %v2459_v8, %v5957_v38 }
 0xd95   :  { %v2430_v4 = vmul.f32 %v5537_v16, %v2428_v13 }
 0xd96   :  { %v7134_v62 = vadd.f32 %v2433_v47, %v2431_v42 }
 0xd97   :  { %v7136_v48 = vadd.f32 %v2432_v17, %v2430_v4 }
 0xd99   :  { %v5222_v50 = vpack.c.bf16 %v7134_v62, %v7136_v48 }
 0xd9b   :  { %5223 = vmatprep.subr.bf16.mxu1 %v5222_v50 }
 0xd9c   :  { %5225 = vmatpush3.bf16.msra.mxu1 %v5222_v50 }
 0xd9f   :  { %5029 = vmatmul.mubr.msk.f32.vlgmr.msra.gmra.mrb[36].mxu1 %vm192_vm0, %v6940_v31 }
 0xda0   :  { %5031 = vmatprep.mubr.msk.f32.mxu1 %vm192_vm0, %v6947_v60 }
 0xda3   :  { %5032 = vmatmul.mubr.msk.f32.gmra.mrb[38].mxu1 %vm192_vm0, %v6954_v56 }
 0xda4   :  { %5034 = vmatprep.mubr.msk.f32.mxu1 %vm192_vm0, %v6961_v29 }
 0xda7   :  { %5035 = vmatmul.mubr.msk.f32.gmra.mrb[40].mxu1 %vm192_vm0, %v6968_v23 }
 0xda8   :  { %5054 = vmatprep.mubr.msk.f32.mxu1 %vm192_vm0, %v6975_v5 }
 0xe72   :  { %v5030_v7 = vpop.f32.mrb[36].mxu1 }
 0xe73   :  { %v2541_v28 = vadd.f32 %v5030_v7, %v6121_v43  ;;  %v2535_v15 = vpop.f32.mrb[37].mxu1 }
 0xe74   :  { %v2536_v33 = vadd.f32 %v2535_v15, %v5953_v36 }
 0xe75   :  { %v2565_v59 = vadd.f32 %v2541_v28, %v2464_v21 }
 0xe76   :  { %v2564_v12 = vadd.f32 %v2536_v33, %v2463_v54  ;;  %v5033_v10 = vpop.f32.mrb[38].mxu1  ;;  %v2461_v33 = vmul.f32 %v2456_v63, %v5961_v40 }
 0xe77   :  { %v4557_v25 = vmul.f32 -1.442695, %v2565_v59  ;;  %v2551_v49 = vadd.f32 %v5033_v10, %v7748_v30  ;;  %v2545_v53 = vpop.f32.mrb[39].mxu1 }
 0xe78   :  { %v4556_v1 = vmul.f32 -1.442695, %v2564_v12  ;;  %v2546_v13 = vadd.f32 %v2545_v53, %v5959_v39 }
 0xe79   :  { %5538 = vpow2.f32 %v4557_v25  ;;  %v2579_v16 = vadd.f32 %v2551_v49, %v2466_v18  ;;  %v2468_v25 = vadd.f32 %v2462_v45, %v6335_v57  ;;  %v2467_v49 = vadd.f32 %v2461_v33, %v5971_v44 }
 0xe7a   :  { %5540 = vpow2.f32 %v4556_v1  ;;  %v2578_v42 = vadd.f32 %v2546_v13, %v2465_v20  ;;  %v5036_v47 = vpop.f32.mrb[40].mxu1 }
 0xe7b   :  { %v2555_v4 = vpop.f32.mrb[41].mxu1  ;;  %v4559_v17 = vmul.f32 -1.442695, %v2579_v16  ;;  %v2561_v8 = vadd.f32 %v5036_v47, %v6309_v55 }
 0xe7c   :  { %v4558_v50 = vmul.f32 -1.442695, %v2578_v42  ;;  %v2556_v12 = vadd.f32 %v2555_v4, %v5963_v41 }
 0xe7d   :  { %5542 = vpow2.f32 %v4559_v17 }
 0xe7e   :  { %5544 = vpow2.f32 %v4558_v50 }
 0xe83   :  { %v5539_v9 = vpop.eup %5538 }
 0xe84   :  { %v5541_v32 = vpop.eup %5540  ;;  %v2573_v2 = vadd.f32 1.0, %v5539_v9 }
 0xe85   :  { %v2572_v7 = vadd.f32 1.0, %v5541_v32 }
 0xe86   :  { %5546 = vrcp.f32 %v2573_v2 }
 0xe87   :  { %5548 = vrcp.f32 %v2572_v7  ;;  %v5543_v21 = vpop.eup %5542 }
 0xe88   :  { %v5545_v28 = vpop.eup %5544  ;;  %v2587_v15 = vadd.f32 1.0, %v5543_v21 }
 0xe89   :  { %v2586_v54 = vadd.f32 1.0, %v5545_v28 }
 0xe8a   :  { %5550 = vrcp.f32 %v2587_v15 }
 0xe8b   :  { %5552 = vrcp.f32 %v2586_v54 }
 0xe90   :  { %v5547_v59 = vpop.eup %5546 }
 0xe91   :  { %v5549_v10 = vpop.eup %5548  ;;  %v2593_v18 = vmul.f32 %v5547_v59, %v2561_v8 }
 0xe92   :  { %v2592_v53 = vmul.f32 %v5549_v10, %v2556_v12 }
 0xe93   :  { %v2595_v1 = vadd.f32 %v2593_v18, %v2468_v25 }
 0xe94   :  { %v2594_v20 = vadd.f32 %v2592_v53, %v2467_v49  ;;  %v5551_v13 = vpop.eup %5550 }
 0xe95   :  { %5554 = vtanh.f32 %v2595_v1  ;;  %v5553_v63 = vpop.eup %5552  ;;  %v2599_v16 = vsub.f32 1.0, %v5551_v13  ;;  %v2603_v50 = vmul.f32 %v5551_v13, %v7134_v62  ;;  %v7780_v62 = vsub.f32 %v6437_v52, %v6386_v51 }
 0xe96   :  { %5556 = vtanh.f32 %v2594_v20  ;;  %v2598_v47 = vsub.f32 1.0, %v5553_v63  ;;  %v2602_v32 = vmul.f32 %v5553_v63, %v7136_v48 }
 0xe97   :  { %v2626_v48 = vrot.slane %v7780_v62, %v6135_v14 }
 0xe99   :  { %v2628_v28 = vmul.f32 %v2626_v48, %v5951_v35  ;;  %v2627_v15 = vmul.f32 %v2626_v48, %v5949_v34  ;;  %v2630_v59 = vmul.f32 %v2626_v48, %v6155_v27  ;;  %v2629_v25 = vmul.f32 %v2626_v48, %v5955_v37 }
 0xe9b   :  { %v2634_v54 = vadd.f32 %v2628_v28, %v6093_v11  ;;  %v2633_v12 = vadd.f32 %v2627_v15, %v6069_v58  ;;  %v2636_v53 = vadd.f32 %v2630_v59, %v6194_v0  ;;  %v2635_v63 = vadd.f32 %v2629_v25, %v5957_v38 }
 0xe9c   :  { %v2631_v59 = vmul.f32 %v2626_v48, %v5961_v40 }
 0xe9f   :  { %v5555_v42 = vpop.eup %5554 }
 0xea0   :  { %v5557_v17 = vpop.eup %5556  ;;  %v2601_v4 = vmul.f32 %v5555_v42, %v2599_v16 }
 0xea1   :  { %v2600_v9 = vmul.f32 %v5557_v17, %v2598_v47 }
 0xea2   :  { %v7176_v2 = vadd.f32 %v2603_v50, %v2601_v4 }
 0xea3   :  { %v7178_v7 = vadd.f32 %v2602_v32, %v2600_v9 }
 0xea5   :  { %v5226_v21 = vpack.c.bf16 %v7176_v2, %v7178_v7 }
 0xea7   :  { %5227 = vmatprep.subr.bf16.mxu0 %v5226_v21 }
 0xea8   :  { %5229 = vmatpush3.bf16.msra.mxu0 %v5226_v21 }
 0xeab   :  { %5042 = vmatmul.mubr.msk.f32.vlgmr.msra.gmra.mrb[42].mxu0 %vm192_vm0, %v6940_v31 }
 0xeac   :  { %5044 = vmatprep.mubr.msk.f32.mxu0 %vm192_vm0, %v6947_v60 }
 0xeaf   :  { %5045 = vmatmul.mubr.msk.f32.gmra.mrb[44].mxu0 %vm192_vm0, %v6954_v56 }
 0xeb0   :  { %5047 = vmatprep.mubr.msk.f32.mxu0 %vm192_vm0, %v6961_v29 }
 0xeb3   :  { %5048 = vmatmul.mubr.msk.f32.gmra.mrb[46].mxu0 %vm192_vm0, %v6968_v23 }
 0xeb4   :  { %5067 = vmatprep.mubr.msk.f32.mxu0 %vm192_vm0, %v6975_v5 }
 0xf7e   :  { %v5043_v45 = vpop.f32.mrb[42].mxu0 }
 0xf7f   :  { %v2711_v33 = vadd.f32 %v5043_v45, %v6121_v43  ;;  %v2705_v8 = vpop.f32.mrb[43].mxu0 }
 0xf80   :  { %v2706_v10 = vadd.f32 %v2705_v8, %v5953_v36 }
 0xf81   :  { %v2735_v51 = vadd.f32 %v2711_v33, %v2634_v54  ;;  %v2632_v33 = vmul.f32 %v2626_v48, %v6288_v61 }
 0xf82   :  { %v2734_v52 = vadd.f32 %v2706_v10, %v2633_v12  ;;  %v5046_v18 = vpop.f32.mrb[44].mxu0 }
 0xf83   :  { %v4567_v49 = vmul.f32 -1.442695, %v2735_v51  ;;  %v2721_v1 = vadd.f32 %v5046_v18, %v7748_v30  ;;  %v2715_v20 = vpop.f32.mrb[45].mxu0 }
 0xf84   :  { %v4566_v13 = vmul.f32 -1.442695, %v2734_v52  ;;  %v2716_v16 = vadd.f32 %v2715_v20, %v5959_v39  ;;  %v2638_v52 = vadd.f32 %v2632_v33, %v6335_v57 }
 0xf85   :  { %5558 = vpow2.f32 %v4567_v49  ;;  %v2749_v42 = vadd.f32 %v2721_v1, %v2636_v53  ;;  %v2637_v49 = vadd.f32 %v2631_v59, %v5971_v44 }
 0xf86   :  { %5560 = vpow2.f32 %v4566_v13  ;;  %v2748_v47 = vadd.f32 %v2716_v16, %v2635_v63  ;;  %v5049_v17 = vpop.f32.mrb[46].mxu0 }
 0xf87   :  { %v2725_v4 = vpop.f32.mrb[47].mxu0  ;;  %v4569_v50 = vmul.f32 -1.442695, %v2749_v42  ;;  %v2731_v12 = vadd.f32 %v5049_v17, %v6309_v55 }
 0xf88   :  { %v4568_v9 = vmul.f32 -1.442695, %v2748_v47  ;;  %v2726_v25 = vadd.f32 %v2725_v4, %v5963_v41 }
 0xf89   :  { %5562 = vpow2.f32 %v4569_v50 }
 0xf8a   :  { %5564 = vpow2.f32 %v4568_v9 }
 0xf8f   :  { %v5559_v32 = vpop.eup %5558 }
 0xf90   :  { %v5561_v21 = vpop.eup %5560  ;;  %v2743_v62 = vadd.f32 1.0, %v5559_v32 }
 0xf91   :  { %v2742_v28 = vadd.f32 1.0, %v5561_v21 }
 0xf92   :  { %5566 = vrcp.f32 %v2743_v62 }
 0xf93   :  { %5568 = vrcp.f32 %v2742_v28  ;;  %v5563_v15 = vpop.eup %5562 }
 0xf94   :  { %v5565_v45 = vpop.eup %5564  ;;  %v2757_v54 = vadd.f32 1.0, %v5563_v15 }
 0xf95   :  { %v2756_v8 = vadd.f32 1.0, %v5565_v45 }
 0xf96   :  { %5570 = vrcp.f32 %v2757_v54 }
 0xf97   :  { %5572 = vrcp.f32 %v2756_v8 }
 0xf9c   :  { %v5567_v10 = vpop.eup %5566 }
 0xf9d   :  { %v5569_v51 = vpop.eup %5568  ;;  %v2763_v18 = vmul.f32 %v5567_v10, %v2731_v12 }
 0xf9e   :  { %v2762_v53 = vmul.f32 %v5569_v51, %v2726_v25 }
 0xf9f   :  { %v2765_v1 = vadd.f32 %v2763_v18, %v2638_v52 }
 0xfa0   :  { %v2764_v20 = vadd.f32 %v2762_v53, %v2637_v49  ;;  %v5571_v13 = vpop.eup %5570 }
 0xfa1   :  { %5574 = vtanh.f32 %v2765_v1  ;;  %v5573_v48 = vpop.eup %5572  ;;  %v2769_v63 = vsub.f32 1.0, %v5571_v13  ;;  %v2773_v4 = vmul.f32 %v5571_v13, %v7176_v2  ;;  %v7781_v2 = vsub.f32 %v6461_v46, %v6418_v24 }
 0xfa2   :  { %5576 = vtanh.f32 %v2764_v20  ;;  %v2768_v42 = vsub.f32 1.0, %v5573_v48  ;;  %v2772_v9 = vmul.f32 %v5573_v48, %v7178_v7 }
 0xfab   :  { %v5575_v16 = vpop.eup %5574 }
 0xfac   :  { %v5577_v47 = vpop.eup %5576  ;;  %v2771_v17 = vmul.f32 %v5575_v16, %v2769_v63 }
 0xfad   :  { %v2770_v50 = vmul.f32 %v5577_v47, %v2768_v42 }
 0xfae   :  { %v7218_v32 = vadd.f32 %v2773_v4, %v2771_v17 }
 0xfaf   :  { %v7220_v21 = vadd.f32 %v2772_v9, %v2770_v50 }
 0xfb1   :  { %v5230_v62 = vpack.c.bf16 %v7218_v32, %v7220_v21 }
 0xfb3   :  { %5231 = vmatprep.subr.bf16.mxu1 %v5230_v62 }
 0xfb4   :  { %5233 = vmatpush3.bf16.msra.mxu1 %v5230_v62 }
 0xfb7   :  { %5055 = vmatmul.mubr.msk.f32.vlgmr.msra.gmra.mrb[42].mxu1 %vm192_vm0, %v6940_v31  ;;  %v2796_v31 = vrot.slane %v7781_v2, %v6135_v14 }
 0xfb8   :  { %5057 = vmatprep.mubr.msk.f32.mxu1 %vm192_vm0, %v6947_v60 }
 0xfb9   :  { %v2798_v7 = vmul.f32 %v2796_v31, %v5951_v35  ;;  %v2797_v60 = vmul.f32 %v2796_v31, %v5949_v34  ;;  %v2799_v54 = vmul.f32 %v2796_v31, %v5955_v37  ;;  %v2802_v50 = vmul.f32 %v2796_v31, %v6288_v61 }
 0xfba   :  { %v2801_v62 = vmul.f32 %v2796_v31, %v5961_v40 }
 0xfbb   :  { %5058 = vmatmul.mubr.msk.f32.gmra.mrb[44].mxu1 %vm192_vm0, %v6954_v56  ;;  %v2804_v56 = vadd.f32 %v2798_v7, %v6093_v11  ;;  %v2803_v45 = vadd.f32 %v2797_v60, %v6069_v58  ;;  %v2805_v51 = vadd.f32 %v2799_v54, %v5957_v38 }
 0xfbc   :  { %5060 = vmatprep.mubr.msk.f32.mxu1 %vm192_vm0, %v6961_v29 }
 0xfbf   :  { %5061 = vmatmul.mubr.msk.f32.gmra.mrb[46].mxu1 %vm192_vm0, %v6968_v23  ;;  %v2800_v23 = vmul.f32 %v2796_v31, %v6155_v27 }
 0xfc0   :  { %5080 = vmatprep.mubr.msk.f32.mxu1 %vm192_vm0, %v6975_v5 }
 0xfc1   :  { %v2806_v59 = vadd.f32 %v2800_v23, %v6194_v0 }
0x108a   :  { %v5056_v28 = vpop.f32.mrb[42].mxu1 }
0x108b   :  { %v2881_v29 = vadd.f32 %v5056_v28, %v6121_v43  ;;  %v2875_v15 = vpop.f32.mrb[43].mxu1 }
0x108c   :  { %v2876_v5 = vadd.f32 %v2875_v15, %v5953_v36  ;;  %v2807_v15 = vadd.f32 %v2801_v62, %v5971_v44 }
0x108d   :  { %v2905_v24 = vadd.f32 %v2881_v29, %v2804_v56  ;;  %v2808_v56 = vadd.f32 %v2802_v50, %v6335_v57 }
0x108e   :  { %v2904_v46 = vadd.f32 %v2876_v5, %v2803_v45  ;;  %v5059_v33 = vpop.f32.mrb[44].mxu1 }
0x108f   :  { %v4577_v8 = vmul.f32 -1.442695, %v2905_v24  ;;  %v2891_v12 = vadd.f32 %v5059_v33, %v7748_v30  ;;  %v2885_v10 = vpop.f32.mrb[45].mxu1 }
0x1090   :  { %v4576_v25 = vmul.f32 -1.442695, %v2904_v46  ;;  %v2886_v52 = vadd.f32 %v2885_v10, %v5959_v39 }
0x1091   :  { %5578 = vpow2.f32 %v4577_v8  ;;  %v2919_v18 = vadd.f32 %v2891_v12, %v2806_v59 }
0x1092   :  { %5580 = vpow2.f32 %v4576_v25  ;;  %v2918_v49 = vadd.f32 %v2886_v52, %v2805_v51  ;;  %v5062_v53 = vpop.f32.mrb[46].mxu1 }
0x1093   :  { %v2895_v1 = vpop.f32.mrb[47].mxu1  ;;  %v4579_v20 = vmul.f32 -1.442695, %v2919_v18  ;;  %v2901_v2 = vadd.f32 %v5062_v53, %v6309_v55  ;;  %v7290_v53 = vld [vmem:[%s7648_s4 + $0x20] sm:$0xff] }
0x1094   :  { %v4578_v13 = vmul.f32 -1.442695, %v2918_v49  ;;  %v2896_v60 = vadd.f32 %v2895_v1, %v5963_v41  ;;  %v7269_v49 = vld [vmem:[%s7648_s4 + $0x8] sm:$0xff] }
0x1095   :  { %5582 = vpow2.f32 %v4579_v20  ;;  %v7297_v1 = vld [vmem:[%s7648_s4 + $0x28] sm:$0xff]  ;;  %v7304_v20 = vld [vmem:[%s7648_s4] sm:$0xff] }
0x1096   :  { %5584 = vpow2.f32 %v4578_v13  ;;  %v7782_v13 = vsub.f32 %v6479_v22, %v6435_v6 }
0x109b   :  { %v5579_v48 = vpop.eup %5578 }
0x109c   :  { %v5581_v63 = vpop.eup %5580  ;;  %v2913_v16 = vadd.f32 1.0, %v5579_v48  ;;  %v2966_v48 = vrot.slane %v7782_v13, %v6135_v14 }
0x109d   :  { %v2912_v42 = vadd.f32 1.0, %v5581_v63 }
0x109e   :  { %5586 = vrcp.f32 %v2913_v16  ;;  %v2968_v63 = vmul.f32 %v2966_v48, %v5951_v35  ;;  %v2967_v16 = vmul.f32 %v2966_v48, %v5949_v34  ;;  %v2970_v50 = vmul.f32 %v2966_v48, %v6155_v27 }
0x109f   :  { %5588 = vrcp.f32 %v2912_v42  ;;  %v5583_v47 = vpop.eup %5582 }
0x10a0   :  { %v5585_v17 = vpop.eup %5584  ;;  %v2927_v4 = vadd.f32 1.0, %v5583_v47  ;;  %v2974_v47 = vadd.f32 %v2968_v63, %v6093_v11  ;;  %v2972_v63 = vmul.f32 %v2966_v48, %v6288_v61 }
0x10a1   :  { %v2926_v9 = vadd.f32 1.0, %v5585_v17 }
0x10a2   :  { %5590 = vrcp.f32 %v2927_v4 }
0x10a3   :  { %5592 = vrcp.f32 %v2926_v9  ;;  %v2973_v9 = vadd.f32 %v2967_v16, %v6069_v58 }
0x10a8   :  { %v5587_v7 = vpop.eup %5586 }
0x10a9   :  { %v5589_v28 = vpop.eup %5588  ;;  %v2933_v29 = vmul.f32 %v5587_v7, %v2901_v2  ;;  %v2969_v2 = vmul.f32 %v2966_v48, %v5955_v37 }
0x10aa   :  { %v2932_v23 = vmul.f32 %v5589_v28, %v2896_v60  ;;  %v2976_v28 = vadd.f32 %v2970_v50, %v6194_v0 }
0x10ab   :  { %v2935_v45 = vadd.f32 %v2933_v29, %v2808_v56 }
0x10ac   :  { %v2934_v5 = vadd.f32 %v2932_v23, %v2807_v15  ;;  %v5591_v54 = vpop.eup %5590  ;;  %v2975_v23 = vadd.f32 %v2969_v2, %v5957_v38 }
0x10ad   :  { %5594 = vtanh.f32 %v2935_v45  ;;  %v5593_v31 = vpop.eup %5592  ;;  %v2939_v24 = vsub.f32 1.0, %v5591_v54  ;;  %v2943_v12 = vmul.f32 %v5591_v54, %v7218_v32  ;;  %v7276_v32 = vld [vmem:[%s7648_s4 + $0x10] sm:$0xff] }
0x10ae   :  { %5596 = vtanh.f32 %v2934_v5  ;;  %v2938_v33 = vsub.f32 1.0, %v5593_v31  ;;  %v2942_v25 = vmul.f32 %v5593_v31, %v7220_v21  ;;  %v7283_v21 = vld [vmem:[%s7648_s4 + $0x18] sm:$0xff] }
0x10b7   :  { %v5595_v46 = vpop.eup %5594 }
0x10b8   :  { %v5597_v8 = vpop.eup %5596  ;;  %v2941_v59 = vmul.f32 %v5595_v46, %v2939_v24 }
0x10b9   :  { %v2940_v10 = vmul.f32 %v5597_v8, %v2938_v33 }
0x10ba   :  { %v7260_v51 = vadd.f32 %v2943_v12, %v2941_v59 }
0x10bb   :  { %v7262_v52 = vadd.f32 %v2942_v25, %v2940_v10 }
0x10bd   :  { %v5234_v18 = vpack.c.bf16 %v7260_v51, %v7262_v52 }
0x10bf   :  { %5235 = vmatprep.subr.bf16.mxu0 %v5234_v18 }
0x10c0   :  { %5237 = vmatpush3.bf16.msra.mxu0 %v5234_v18 }
0x10c3   :  { %5068 = vmatmul.mubr.msk.f32.vlgmr.msra.gmra.mrb[48].mxu0 %vm192_vm0, %v7269_v49 }
0x10c4   :  { %5070 = vmatprep.mubr.msk.f32.mxu0 %vm192_vm0, %v7276_v32 }
0x10c7   :  { %5071 = vmatmul.mubr.msk.f32.gmra.mrb[50].mxu0 %vm192_vm0, %v7283_v21 }
0x10c8   :  { %5073 = vmatprep.mubr.msk.f32.mxu0 %vm192_vm0, %v7290_v53 }
0x10cb   :  { %5074 = vmatmul.mubr.msk.f32.gmra.mrb[52].mxu0 %vm192_vm0, %v7297_v1 }
0x10cc   :  { %5093 = vmatprep.mubr.msk.f32.mxu0 %vm192_vm0, %v7304_v20 }
0x1196   :  { %v5069_v42 = vpop.f32.mrb[48].mxu0 }
0x1197   :  { %v3051_v17 = vadd.f32 %v5069_v42, %v6121_v43  ;;  %v3045_v4 = vpop.f32.mrb[49].mxu0  ;;  %v2971_v42 = vmul.f32 %v2966_v48, %v5961_v40 }
0x1198   :  { %v3046_v62 = vadd.f32 %v3045_v4, %v5953_v36 }
0x1199   :  { %v3075_v6 = vadd.f32 %v3051_v17, %v2974_v47  ;;  %v2977_v2 = vadd.f32 %v2971_v42, %v5971_v44 }
0x119a   :  { %v3074_v22 = vadd.f32 %v3046_v62, %v2973_v9  ;;  %v5072_v7 = vpop.f32.mrb[50].mxu0  ;;  %v2978_v9 = vadd.f32 %v2972_v63, %v6335_v57 }
0x119b   :  { %v4587_v60 = vmul.f32 -1.442695, %v3075_v6  ;;  %v3061_v56 = vadd.f32 %v5072_v7, %v7748_v30  ;;  %v3055_v29 = vpop.f32.mrb[51].mxu0 }
0x119c   :  { %v4586_v15 = vmul.f32 -1.442695, %v3074_v22  ;;  %v3056_v45 = vadd.f32 %v3055_v29, %v5959_v39 }
0x119d   :  { %5598 = vpow2.f32 %v4587_v60  ;;  %v3089_v5 = vadd.f32 %v3061_v56, %v2976_v28 }
0x119e   :  { %5600 = vpow2.f32 %v4586_v15  ;;  %v3088_v54 = vadd.f32 %v3056_v45, %v2975_v23  ;;  %v5075_v31 = vpop.f32.mrb[52].mxu0 }
0x119f   :  { %v3065_v24 = vpop.f32.mrb[53].mxu0  ;;  %v4589_v46 = vmul.f32 -1.442695, %v3089_v5  ;;  %v3071_v47 = vadd.f32 %v5075_v31, %v6309_v55 }
0x11a0   :  { %v4588_v33 = vmul.f32 -1.442695, %v3088_v54  ;;  %v3066_v4 = vadd.f32 %v3065_v24, %v5963_v41 }
0x11a1   :  { %5602 = vpow2.f32 %v4589_v46 }
0x11a2   :  { %5604 = vpow2.f32 %v4588_v33 }
0x11a7   :  { %v5599_v8 = vpop.eup %5598 }
0x11a8   :  { %v5601_v59 = vpop.eup %5600  ;;  %v3083_v12 = vadd.f32 1.0, %v5599_v8 }
0x11a9   :  { %v3082_v10 = vadd.f32 1.0, %v5601_v59 }
0x11aa   :  { %5606 = vrcp.f32 %v3083_v12 }
0x11ab   :  { %5608 = vrcp.f32 %v3082_v10  ;;  %v5603_v25 = vpop.eup %5602 }
0x11ac   :  { %v5605_v18 = vpop.eup %5604  ;;  %v3097_v13 = vadd.f32 1.0, %v5603_v25 }
0x11ad   :  { %v3096_v16 = vadd.f32 1.0, %v5605_v18 }
0x11ae   :  { %5610 = vrcp.f32 %v3097_v13 }
0x11af   :  { %5612 = vrcp.f32 %v3096_v16 }
0x11b4   :  { %v5607_v17 = vpop.eup %5606 }
0x11b5   :  { %v5609_v50 = vpop.eup %5608  ;;  %v3103_v62 = vmul.f32 %v5607_v17, %v3071_v47 }
0x11b6   :  { %v3102_v6 = vmul.f32 %v5609_v50, %v3066_v4 }
0x11b7   :  { %v3105_v22 = vadd.f32 %v3103_v62, %v2978_v9 }
0x11b8   :  { %v3104_v7 = vadd.f32 %v3102_v6, %v2977_v2  ;;  %v5611_v60 = vpop.eup %5610 }
0x11b9   :  { %5614 = vtanh.f32 %v3105_v22  ;;  %v5613_v48 = vpop.eup %5612  ;;  %v3109_v28 = vsub.f32 1.0, %v5611_v60  ;;  %v3113_v45 = vmul.f32 %v5611_v60, %v7260_v51  ;;  %v7783_v51 = vsub.f32 %v6497_v26, %v6457_v19 }
0x11ba   :  { %5616 = vtanh.f32 %v3104_v7  ;;  %v3108_v29 = vsub.f32 1.0, %v5613_v48  ;;  %v3112_v54 = vmul.f32 %v5613_v48, %v7262_v52 }
0x11bb   :  { %v3136_v52 = vrot.slane %v7783_v51, %v6135_v14 }
0x11bd   :  { %v3138_v33 = vmul.f32 %v3136_v52, %v5951_v35  ;;  %v3137_v8 = vmul.f32 %v3136_v52, %v5949_v34  ;;  %v3140_v18 = vmul.f32 %v3136_v52, %v6155_v27  ;;  %v3139_v16 = vmul.f32 %v3136_v52, %v5955_v37 }
0x11bf   :  { %v3144_v12 = vadd.f32 %v3138_v33, %v6093_v11  ;;  %v3143_v13 = vadd.f32 %v3137_v8, %v6069_v58  ;;  %v3146_v17 = vadd.f32 %v3140_v18, %v6194_v0  ;;  %v3145_v62 = vadd.f32 %v3139_v16, %v5957_v38 }
0x11c0   :  { %v3141_v33 = vmul.f32 %v3136_v52, %v5961_v40 }
0x11c3   :  { %v5615_v56 = vpop.eup %5614 }
0x11c4   :  { %v5617_v15 = vpop.eup %5616  ;;  %v3111_v23 = vmul.f32 %v5615_v56, %v3109_v28 }
0x11c5   :  { %v3110_v5 = vmul.f32 %v5617_v15, %v3108_v29 }
0x11c6   :  { %v7332_v31 = vadd.f32 %v3113_v45, %v3111_v23 }
0x11c7   :  { %v7334_v24 = vadd.f32 %v3112_v54, %v3110_v5 }
0x11c9   :  { %v5238_v46 = vpack.c.bf16 %v7332_v31, %v7334_v24 }
0x11cb   :  { %5239 = vmatprep.subr.bf16.mxu1 %v5238_v46 }
0x11cc   :  { %5241 = vmatpush3.bf16.msra.mxu1 %v5238_v46  ;;  %v3142_v46 = vmul.f32 %v3136_v52, %v6288_v61 }
0x11cf   :  { %5081 = vmatmul.mubr.msk.f32.vlgmr.msra.gmra.mrb[48].mxu1 %vm192_vm0, %v7269_v49 }
0x11d0   :  { %5083 = vmatprep.mubr.msk.f32.mxu1 %vm192_vm0, %v7276_v32 }
0x11d3   :  { %5084 = vmatmul.mubr.msk.f32.gmra.mrb[50].mxu1 %vm192_vm0, %v7283_v21 }
0x11d4   :  { %5086 = vmatprep.mubr.msk.f32.mxu1 %vm192_vm0, %v7290_v53 }
0x11d7   :  { %5087 = vmatmul.mubr.msk.f32.gmra.mrb[52].mxu1 %vm192_vm0, %v7297_v1 }
0x11d8   :  { %5106 = vmatprep.mubr.msk.f32.mxu1 %vm192_vm0, %v7304_v20 }
0x12a2   :  { %v5082_v59 = vpop.f32.mrb[48].mxu1 }
0x12a3   :  { %v3221_v10 = vadd.f32 %v5082_v59, %v6121_v43  ;;  %v3215_v25 = vpop.f32.mrb[49].mxu1 }
0x12a4   :  { %v3216_v63 = vadd.f32 %v3215_v25, %v5953_v36  ;;  %v3148_v25 = vadd.f32 %v3142_v46, %v6335_v57 }
0x12a5   :  { %v3245_v19 = vadd.f32 %v3221_v10, %v3144_v12 }
0x12a6   :  { %v3244_v26 = vadd.f32 %v3216_v63, %v3143_v13  ;;  %v5085_v42 = vpop.f32.mrb[50].mxu1  ;;  %v3147_v13 = vadd.f32 %v3141_v33, %v5971_v44 }
0x12a7   :  { %v4597_v47 = vmul.f32 -1.442695, %v3245_v19  ;;  %v3231_v4 = vadd.f32 %v5085_v42, %v7748_v30  ;;  %v3225_v50 = vpop.f32.mrb[51].mxu1 }
0x12a8   :  { %v4596_v9 = vmul.f32 -1.442695, %v3244_v26  ;;  %v3226_v2 = vadd.f32 %v3225_v50, %v5959_v39 }
0x12a9   :  { %5618 = vpow2.f32 %v4597_v47  ;;  %v3259_v6 = vadd.f32 %v3231_v4, %v3146_v17 }
0x12aa   :  { %5620 = vpow2.f32 %v4596_v9  ;;  %v3258_v22 = vadd.f32 %v3226_v2, %v3145_v62  ;;  %v5088_v7 = vpop.f32.mrb[52].mxu1 }
0x12ab   :  { %v3235_v60 = vpop.f32.mrb[53].mxu1  ;;  %v4599_v48 = vmul.f32 -1.442695, %v3259_v6  ;;  %v3241_v8 = vadd.f32 %v5088_v7, %v6309_v55 }
0x12ac   :  { %v4598_v28 = vmul.f32 -1.442695, %v3258_v22  ;;  %v3236_v12 = vadd.f32 %v3235_v60, %v5963_v41 }
0x12ad   :  { %5622 = vpow2.f32 %v4599_v48 }
0x12ae   :  { %5624 = vpow2.f32 %v4598_v28 }
0x12b3   :  { %v5619_v56 = vpop.eup %5618 }
0x12b4   :  { %v5621_v29 = vpop.eup %5620  ;;  %v3253_v15 = vadd.f32 1.0, %v5619_v56 }
0x12b5   :  { %v3252_v23 = vadd.f32 1.0, %v5621_v29 }
0x12b6   :  { %5626 = vrcp.f32 %v3253_v15 }
0x12b7   :  { %5628 = vrcp.f32 %v3252_v23  ;;  %v5623_v45 = vpop.eup %5622 }
0x12b8   :  { %v5625_v5 = vpop.eup %5624  ;;  %v3267_v54 = vadd.f32 1.0, %v5623_v45 }
0x12b9   :  { %v3266_v51 = vadd.f32 1.0, %v5625_v5 }
0x12ba   :  { %5630 = vrcp.f32 %v3267_v54 }
0x12bb   :  { %5632 = vrcp.f32 %v3266_v51 }
0x12c0   :  { %v5627_v59 = vpop.eup %5626 }
0x12c1   :  { %v5629_v10 = vpop.eup %5628  ;;  %v3273_v18 = vmul.f32 %v5627_v59, %v3241_v8 }
0x12c2   :  { %v3272_v63 = vmul.f32 %v5629_v10, %v3236_v12 }
0x12c3   :  { %v3275_v16 = vadd.f32 %v3273_v18, %v3148_v25 }
0x12c4   :  { %v3274_v19 = vadd.f32 %v3272_v63, %v3147_v13  ;;  %v5631_v26 = vpop.eup %5630 }
0x12c5   :  { %5634 = vtanh.f32 %v3275_v16  ;;  %v5633_v52 = vpop.eup %5632  ;;  %v3279_v42 = vsub.f32 1.0, %v5631_v26  ;;  %v3283_v9 = vmul.f32 %v5631_v26, %v7332_v31  ;;  %v7784_v31 = vld [vmem:[#allocation24_spill] sm:$0xff] }
0x12c6   :  { %5636 = vtanh.f32 %v3274_v19  ;;  %v3278_v17 = vsub.f32 1.0, %v5633_v52  ;;  %v3282_v2 = vmul.f32 %v5633_v52, %v7334_v24  ;;  %v7785_v24 = vsub.f32 %v6515_v3, %v7784_v31 }
0x12c8   :  { %v3306_v60 = vrot.slane %v7785_v24, %v6135_v14 }
0x12ca   :  { %v3308_v48 = vmul.f32 %v3306_v60, %v5951_v35  ;;  %v3307_v28 = vmul.f32 %v3306_v60, %v5949_v34  ;;  %v3310_v45 = vmul.f32 %v3306_v60, %v6155_v27  ;;  %v3309_v46 = vmul.f32 %v3306_v60, %v5955_v37 }
0x12cb   :  { %v3311_v24 = vmul.f32 %v3306_v60, %v5961_v40 }
0x12cc   :  { %v3314_v29 = vadd.f32 %v3308_v48, %v6093_v11  ;;  %v3313_v5 = vadd.f32 %v3307_v28, %v6069_v58  ;;  %v3316_v59 = vadd.f32 %v3310_v45, %v6194_v0  ;;  %v3315_v18 = vadd.f32 %v3309_v46, %v5957_v38 }
0x12cd   :  { %v3317_v45 = vadd.f32 %v3311_v24, %v5971_v44 }
0x12cf   :  { %v5635_v47 = vpop.eup %5634 }
0x12d0   :  { %v5637_v4 = vpop.eup %5636  ;;  %v3281_v50 = vmul.f32 %v5635_v47, %v3279_v42 }
0x12d1   :  { %v3280_v62 = vmul.f32 %v5637_v4, %v3278_v17 }
0x12d2   :  { %v7374_v6 = vadd.f32 %v3283_v9, %v3281_v50 }
0x12d3   :  { %v7376_v22 = vadd.f32 %v3282_v2, %v3280_v62 }
0x12d5   :  { %v5242_v7 = vpack.c.bf16 %v7374_v6, %v7376_v22 }
0x12d7   :  { %5243 = vmatprep.subr.bf16.mxu0 %v5242_v7 }
0x12d8   :  { %5245 = vmatpush3.bf16.msra.mxu0 %v5242_v7  ;;  %v3312_v7 = vmul.f32 %v3306_v60, %v6288_v61 }
0x12db   :  { %5094 = vmatmul.mubr.msk.f32.vlgmr.msra.gmra.mrb[54].mxu0 %vm192_vm0, %v7269_v49 }
0x12dc   :  { %5096 = vmatprep.mubr.msk.f32.mxu0 %vm192_vm0, %v7276_v32 }
0x12df   :  { %5097 = vmatmul.mubr.msk.f32.gmra.mrb[56].mxu0 %vm192_vm0, %v7283_v21 }
0x12e0   :  { %5099 = vmatprep.mubr.msk.f32.mxu0 %vm192_vm0, %v7290_v53 }
0x12e3   :  { %5100 = vmatmul.mubr.msk.f32.gmra.mrb[58].mxu0 %vm192_vm0, %v7297_v1 }
0x12e4   :  { %5119 = vmatprep.mubr.msk.f32.mxu0 %vm192_vm0, %v7304_v20 }
0x13ae   :  { %v5095_v56 = vpop.f32.mrb[54].mxu0 }
0x13af   :  { %v3391_v15 = vadd.f32 %v5095_v56, %v6121_v43  ;;  %v3385_v23 = vpop.f32.mrb[55].mxu0 }
0x13b0   :  { %v3386_v54 = vadd.f32 %v3385_v23, %v5953_v36 }
0x13b1   :  { %v3415_v3 = vadd.f32 %v3391_v15, %v3314_v29  ;;  %v3318_v15 = vadd.f32 %v3312_v7, %v6335_v57 }
0x13b2   :  { %v3414_v51 = vadd.f32 %v3386_v54, %v3313_v5  ;;  %v5098_v33 = vpop.f32.mrb[56].mxu0 }
0x13b3   :  { %v4607_v8 = vmul.f32 -1.442695, %v3415_v3  ;;  %v3401_v12 = vadd.f32 %v5098_v33, %v7748_v30  ;;  %v3395_v10 = vpop.f32.mrb[57].mxu0 }
0x13b4   :  { %v4606_v25 = vmul.f32 -1.442695, %v3414_v51  ;;  %v3396_v13 = vadd.f32 %v3395_v10, %v5959_v39 }
0x13b5   :  { %5638 = vpow2.f32 %v4607_v8  ;;  %v3429_v63 = vadd.f32 %v3401_v12, %v3316_v59 }
0x13b6   :  { %5640 = vpow2.f32 %v4606_v25  ;;  %v3428_v16 = vadd.f32 %v3396_v13, %v3315_v18  ;;  %v5101_v19 = vpop.f32.mrb[58].mxu0 }
0x13b7   :  { %v3405_v26 = vpop.f32.mrb[59].mxu0  ;;  %v4609_v52 = vmul.f32 -1.442695, %v3429_v63  ;;  %v3411_v48 = vadd.f32 %v5101_v19, %v6309_v55 }
0x13b8   :  { %v4608_v42 = vmul.f32 -1.442695, %v3428_v16  ;;  %v3406_v56 = vadd.f32 %v3405_v26, %v5963_v41 }
0x13b9   :  { %5642 = vpow2.f32 %v4609_v52 }
0x13ba   :  { %5644 = vpow2.f32 %v4608_v42 }
0x13bf   :  { %v5639_v47 = vpop.eup %5638 }
0x13c0   :  { %v5641_v17 = vpop.eup %5640  ;;  %v3423_v4 = vadd.f32 1.0, %v5639_v47 }
0x13c1   :  { %v3422_v50 = vadd.f32 1.0, %v5641_v17 }
0x13c2   :  { %5646 = vrcp.f32 %v3423_v4 }
0x13c3   :  { %5648 = vrcp.f32 %v3422_v50  ;;  %v5643_v9 = vpop.eup %5642 }
0x13c4   :  { %v5645_v62 = vpop.eup %5644  ;;  %v3437_v2 = vadd.f32 1.0, %v5643_v9 }
0x13c5   :  { %v3436_v31 = vadd.f32 1.0, %v5645_v62 }
0x13c6   :  { %5650 = vrcp.f32 %v3437_v2 }
0x13c7   :  { %5652 = vrcp.f32 %v3436_v31 }
0x13cc   :  { %v5647_v28 = vpop.eup %5646 }
0x13cd   :  { %v5649_v29 = vpop.eup %5648  ;;  %v3443_v23 = vmul.f32 %v5647_v28, %v3411_v48 }
0x13ce   :  { %v3442_v5 = vmul.f32 %v5649_v29, %v3406_v56 }
0x13cf   :  { %v3445_v54 = vadd.f32 %v3443_v23, %v3318_v15 }
0x13d0   :  { %v3444_v46 = vadd.f32 %v3442_v5, %v3317_v45  ;;  %v5651_v3 = vpop.eup %5650 }
0x13d1   :  { %5654 = vtanh.f32 %v3445_v54  ;;  %v5653_v60 = vpop.eup %5652  ;;  %v3449_v51 = vsub.f32 1.0, %v5651_v3  ;;  %v3453_v10 = vmul.f32 %v5651_v3, %v7374_v6  ;;  %v7786_v6 = vld [vmem:[#allocation28_spill] sm:$0xff] }
0x13d2   :  { %5656 = vtanh.f32 %v3444_v46  ;;  %v3448_v8 = vsub.f32 1.0, %v5653_v60  ;;  %v3452_v18 = vmul.f32 %v5653_v60, %v7376_v22  ;;  %v7787_v22 = vld [vmem:[#allocation25_spill] sm:$0xff] }
0x13d3   :  { %v7788_v19 = vsub.f32 %v7786_v6, %v7787_v22 }
0x13d5   :  { %v3476_v26 = vrot.slane %v7788_v19, %v6135_v14 }
0x13d7   :  { %v3478_v52 = vmul.f32 %v3476_v26, %v5951_v35  ;;  %v3477_v42 = vmul.f32 %v3476_v26, %v5949_v34  ;;  %v3480_v9 = vmul.f32 %v3476_v26, %v6155_v27  ;;  %v3479_v7 = vmul.f32 %v3476_v26, %v5955_v37 }
0x13d8   :  { %v3482_v6 = vmul.f32 %v3476_v26, %v6288_v61  ;;  %v3481_v19 = vmul.f32 %v3476_v26, %v5961_v40 }
0x13d9   :  { %v3484_v17 = vadd.f32 %v3478_v52, %v6093_v11  ;;  %v3483_v62 = vadd.f32 %v3477_v42, %v6069_v58  ;;  %v3486_v56 = vadd.f32 %v3480_v9, %v6194_v0  ;;  %v3485_v45 = vadd.f32 %v3479_v7, %v5957_v38 }
0x13da   :  { %v3487_v9 = vadd.f32 %v3481_v19, %v5971_v44 }
0x13db   :  { %v5655_v33 = vpop.eup %5654 }
0x13dc   :  { %v5657_v59 = vpop.eup %5656  ;;  %v3451_v12 = vmul.f32 %v5655_v33, %v3449_v51 }
0x13dd   :  { %v3450_v25 = vmul.f32 %v5657_v59, %v3448_v8 }
0x13de   :  { %v7416_v13 = vadd.f32 %v3453_v10, %v3451_v12 }
0x13df   :  { %v7418_v63 = vadd.f32 %v3452_v18, %v3450_v25 }
0x13e1   :  { %v5246_v16 = vpack.c.bf16 %v7416_v13, %v7418_v63 }
0x13e3   :  { %5247 = vmatprep.subr.bf16.mxu1 %v5246_v16 }
0x13e4   :  { %5249 = vmatpush3.bf16.msra.mxu1 %v5246_v16 }
0x13e7   :  { %5107 = vmatmul.mubr.msk.f32.vlgmr.msra.gmra.mrb[54].mxu1 %vm192_vm0, %v7269_v49 }
0x13e8   :  { %5109 = vmatprep.mubr.msk.f32.mxu1 %vm192_vm0, %v7276_v32 }
0x13eb   :  { %5110 = vmatmul.mubr.msk.f32.gmra.mrb[56].mxu1 %vm192_vm0, %v7283_v21 }
0x13ec   :  { %5112 = vmatprep.mubr.msk.f32.mxu1 %vm192_vm0, %v7290_v53 }
0x13ef   :  { %5113 = vmatmul.mubr.msk.f32.gmra.mrb[58].mxu1 %vm192_vm0, %v7297_v1 }
0x13f0   :  { %5132 = vmatprep.mubr.msk.f32.mxu1 %vm192_vm0, %v7304_v20 }
0x14ba   :  { %v5108_v47 = vpop.f32.mrb[54].mxu1 }
0x14bb   :  { %v3561_v4 = vadd.f32 %v5108_v47, %v6121_v43  ;;  %v3555_v50 = vpop.f32.mrb[55].mxu1 }
0x14bc   :  { %v3556_v2 = vadd.f32 %v3555_v50, %v5953_v36 }
0x14bd   :  { %v3585_v31 = vadd.f32 %v3561_v4, %v3484_v17  ;;  %v3488_v4 = vadd.f32 %v3482_v6, %v6335_v57 }
0x14be   :  { %v3584_v24 = vadd.f32 %v3556_v2, %v3483_v62  ;;  %v5111_v48 = vpop.f32.mrb[56].mxu1 }
0x14bf   :  { %v4617_v28 = vmul.f32 -1.442695, %v3585_v31  ;;  %v3571_v29 = vadd.f32 %v5111_v48, %v7748_v30  ;;  %v3565_v15 = vpop.f32.mrb[57].mxu1 }
0x14c0   :  { %v4616_v23 = vmul.f32 -1.442695, %v3584_v24  ;;  %v3566_v5 = vadd.f32 %v3565_v15, %v5959_v39 }
0x14c1   :  { %5658 = vpow2.f32 %v4617_v28  ;;  %v3599_v54 = vadd.f32 %v3571_v29, %v3486_v56 }
0x14c2   :  { %5660 = vpow2.f32 %v4616_v23  ;;  %v3598_v46 = vadd.f32 %v3566_v5, %v3485_v45  ;;  %v5114_v3 = vpop.f32.mrb[58].mxu1 }
0x14c3   :  { %v3575_v60 = vpop.f32.mrb[59].mxu1  ;;  %v4619_v51 = vmul.f32 -1.442695, %v3599_v54  ;;  %v3581_v52 = vadd.f32 %v5114_v3, %v6309_v55 }
0x14c4   :  { %v4618_v33 = vmul.f32 -1.442695, %v3598_v46  ;;  %v3576_v47 = vadd.f32 %v3575_v60, %v5963_v41 }
0x14c5   :  { %5662 = vpow2.f32 %v4619_v51 }
0x14c6   :  { %5664 = vpow2.f32 %v4618_v33 }
0x14cb   :  { %v5659_v8 = vpop.eup %5658 }
0x14cc   :  { %v5661_v59 = vpop.eup %5660  ;;  %v3593_v12 = vadd.f32 1.0, %v5659_v8 }
0x14cd   :  { %v3592_v10 = vadd.f32 1.0, %v5661_v59 }
0x14ce   :  { %5666 = vrcp.f32 %v3593_v12 }
0x14cf   :  { %5668 = vrcp.f32 %v3592_v10  ;;  %v5663_v25 = vpop.eup %5662 }
0x14d0   :  { %v5665_v18 = vpop.eup %5664  ;;  %v3607_v16 = vadd.f32 1.0, %v5663_v25 }
0x14d1   :  { %v3606_v22 = vadd.f32 1.0, %v5665_v18 }
0x14d2   :  { %5670 = vrcp.f32 %v3607_v16 }
0x14d3   :  { %5672 = vrcp.f32 %v3606_v22 }
0x14d8   :  { %v5667_v42 = vpop.eup %5666 }
0x14d9   :  { %v5669_v17 = vpop.eup %5668  ;;  %v3613_v50 = vmul.f32 %v5667_v42, %v3581_v52 }
0x14da   :  { %v3612_v62 = vmul.f32 %v5669_v17, %v3576_v47 }
0x14db   :  { %v3615_v2 = vadd.f32 %v3613_v50, %v3488_v4 }
0x14dc   :  { %v3614_v7 = vadd.f32 %v3612_v62, %v3487_v9  ;;  %v5671_v31 = vpop.eup %5670 }
0x14dd   :  { %5674 = vtanh.f32 %v3615_v2  ;;  %v5673_v26 = vpop.eup %5672  ;;  %v3619_v24 = vsub.f32 1.0, %v5671_v31  ;;  %v3623_v15 = vmul.f32 %v5671_v31, %v7416_v13  ;;  %v7789_v13 = vld [vmem:[#allocation30_spill] sm:$0xff] }
0x14de   :  { %5676 = vtanh.f32 %v3614_v7  ;;  %v3618_v28 = vsub.f32 1.0, %v5673_v26  ;;  %v3622_v45 = vmul.f32 %v5673_v26, %v7418_v63  ;;  %v7790_v63 = vld [vmem:[#allocation26_spill] sm:$0xff] }
0x14df   :  { %v7791_v3 = vsub.f32 %v7789_v13, %v7790_v63 }
0x14e1   :  { %v3646_v60 = vrot.slane %v7791_v3, %v6135_v14 }
0x14e3   :  { %v3648_v51 = vmul.f32 %v3646_v60, %v5951_v35  ;;  %v3647_v33 = vmul.f32 %v3646_v60, %v5949_v34  ;;  %v3650_v25 = vmul.f32 %v3646_v60, %v6155_v27  ;;  %v3649_v6 = vmul.f32 %v3646_v60, %v5955_v37 }
0x14e4   :  { %v3652_v13 = vmul.f32 %v3646_v60, %v6288_v61  ;;  %v3651_v3 = vmul.f32 %v3646_v60, %v5961_v40 }
0x14e5   :  { %v3654_v59 = vadd.f32 %v3648_v51, %v6093_v11  ;;  %v3653_v18 = vadd.f32 %v3647_v33, %v6069_v58  ;;  %v3656_v47 = vadd.f32 %v3650_v25, %v6194_v0  ;;  %v3655_v9 = vadd.f32 %v3649_v6, %v5957_v38 }
0x14e6   :  { %v3657_v25 = vadd.f32 %v3651_v3, %v5971_v44 }
0x14e7   :  { %v5675_v48 = vpop.eup %5674 }
0x14e8   :  { %v5677_v56 = vpop.eup %5676  ;;  %v3621_v29 = vmul.f32 %v5675_v48, %v3619_v24 }
0x14e9   :  { %v3620_v23 = vmul.f32 %v5677_v56, %v3618_v28 }
0x14ea   :  { %v7458_v5 = vadd.f32 %v3623_v15, %v3621_v29 }
0x14eb   :  { %v7460_v54 = vadd.f32 %v3622_v45, %v3620_v23 }
0x14ed   :  { %v5250_v46 = vpack.c.bf16 %v7458_v5, %v7460_v54 }
0x14ef   :  { %5251 = vmatprep.subr.bf16.mxu0 %v5250_v46 }
0x14f0   :  { %5253 = vmatpush3.bf16.msra.mxu0 %v5250_v46 }
0x14f3   :  { %5120 = vmatmul.mubr.msk.f32.vlgmr.msra.gmra.mrb[60].mxu0 %vm192_vm0, %v7269_v49 }
0x14f4   :  { %5122 = vmatprep.mubr.msk.f32.mxu0 %vm192_vm0, %v7276_v32 }
0x14f7   :  { %5123 = vmatmul.mubr.msk.f32.gmra.mrb[62].mxu0 %vm192_vm0, %v7283_v21 }
0x14f8   :  { %5125 = vmatprep.mubr.msk.f32.mxu0 %vm192_vm0, %v7290_v53 }
0x14fb   :  { %5126 = vmatmul.mubr.msk.f32.gmra.mrb[64].mxu0 %vm192_vm0, %v7297_v1 }
0x14fc   :  { %5145 = vmatprep.mubr.msk.f32.mxu0 %vm192_vm0, %v7304_v20 }
0x15c6   :  { %v5121_v8 = vpop.f32.mrb[60].mxu0 }
0x15c7   :  { %v3731_v12 = vadd.f32 %v5121_v8, %v6121_v43  ;;  %v3725_v10 = vpop.f32.mrb[61].mxu0 }
0x15c8   :  { %v3726_v16 = vadd.f32 %v3725_v10, %v5953_v36 }
0x15c9   :  { %v3755_v22 = vadd.f32 %v3731_v12, %v3654_v59  ;;  %v3658_v12 = vadd.f32 %v3652_v13, %v6335_v57 }
0x15ca   :  { %v3754_v19 = vadd.f32 %v3726_v16, %v3653_v18  ;;  %v5124_v52 = vpop.f32.mrb[62].mxu0 }
0x15cb   :  { %v4627_v42 = vmul.f32 -1.442695, %v3755_v22  ;;  %v3741_v17 = vadd.f32 %v5124_v52, %v7748_v30  ;;  %v3735_v4 = vpop.f32.mrb[63].mxu0 }
0x15cc   :  { %v4626_v50 = vmul.f32 -1.442695, %v3754_v19  ;;  %v3736_v62 = vadd.f32 %v3735_v4, %v5959_v39 }
0x15cd   :  { %5678 = vpow2.f32 %v4627_v42  ;;  %v3769_v2 = vadd.f32 %v3741_v17, %v3656_v47 }
0x15ce   :  { %5680 = vpow2.f32 %v4626_v50  ;;  %v3768_v7 = vadd.f32 %v3736_v62, %v3655_v9  ;;  %v5127_v31 = vpop.f32.mrb[64].mxu0 }
0x15cf   :  { %v3745_v26 = vpop.f32.mrb[65].mxu0  ;;  %v4629_v24 = vmul.f32 -1.442695, %v3769_v2  ;;  %v3751_v51 = vadd.f32 %v5127_v31, %v6309_v55 }
0x15d0   :  { %v4628_v48 = vmul.f32 -1.442695, %v3768_v7  ;;  %v3746_v8 = vadd.f32 %v3745_v26, %v5963_v41 }
0x15d1   :  { %5682 = vpow2.f32 %v4629_v24 }
0x15d2   :  { %5684 = vpow2.f32 %v4628_v48 }
0x15d7   :  { %v5679_v28 = vpop.eup %5678 }
0x15d8   :  { %v5681_v56 = vpop.eup %5680  ;;  %v3763_v29 = vadd.f32 1.0, %v5679_v28 }
0x15d9   :  { %v3762_v15 = vadd.f32 1.0, %v5681_v56 }
0x15da   :  { %5686 = vrcp.f32 %v3763_v29 }
0x15db   :  { %5688 = vrcp.f32 %v3762_v15  ;;  %v5683_v23 = vpop.eup %5682 }
0x15dc   :  { %v5685_v45 = vpop.eup %5684  ;;  %v3777_v46 = vadd.f32 1.0, %v5683_v23 }
0x15dd   :  { %v3776_v63 = vadd.f32 1.0, %v5685_v45 }
0x15de   :  { %5690 = vrcp.f32 %v3777_v46 }
0x15df   :  { %5692 = vrcp.f32 %v3776_v63 }
0x15e4   :  { %v5687_v33 = vpop.eup %5686 }
0x15e5   :  { %v5689_v59 = vpop.eup %5688  ;;  %v3783_v10 = vmul.f32 %v5687_v33, %v3751_v51 }
0x15e6   :  { %v3782_v18 = vmul.f32 %v5689_v59, %v3746_v8 }
0x15e7   :  { %v3785_v16 = vadd.f32 %v3783_v10, %v3658_v12 }
0x15e8   :  { %v3784_v6 = vadd.f32 %v3782_v18, %v3657_v25  ;;  %v5691_v22 = vpop.eup %5690 }
0x15e9   :  { %5694 = vtanh.f32 %v3785_v16  ;;  %v5693_v60 = vpop.eup %5692  ;;  %v3789_v19 = vsub.f32 1.0, %v5691_v22  ;;  %v3793_v4 = vmul.f32 %v5691_v22, %v7458_v5  ;;  %v7792_v5 = vld [vmem:[#allocation32_spill] sm:$0xff] }
0x15ea   :  { %5696 = vtanh.f32 %v3784_v6  ;;  %v3788_v42 = vsub.f32 1.0, %v5693_v60  ;;  %v3792_v9 = vmul.f32 %v5693_v60, %v7460_v54  ;;  %v7793_v54 = vld [vmem:[#allocation27_spill] sm:$0xff] }
0x15eb   :  { %v7794_v31 = vsub.f32 %v7792_v5, %v7793_v54 }
0x15ed   :  { %v3816_v26 = vrot.slane %v7794_v31, %v6135_v14 }
0x15ef   :  { %v3818_v24 = vmul.f32 %v3816_v26, %v5951_v35  ;;  %v3817_v48 = vmul.f32 %v3816_v26, %v5949_v34  ;;  %v3820_v23 = vmul.f32 %v3816_v26, %v6155_v27  ;;  %v3819_v46 = vmul.f32 %v3816_v26, %v5955_v37 }
0x15f0   :  { %v3821_v54 = vmul.f32 %v3816_v26, %v5961_v40 }
0x15f1   :  { %v3824_v56 = vadd.f32 %v3818_v24, %v6093_v11  ;;  %v3823_v45 = vadd.f32 %v3817_v48, %v6069_v58  ;;  %v3826_v33 = vadd.f32 %v3820_v23, %v6194_v0  ;;  %v3825_v10 = vadd.f32 %v3819_v46, %v5957_v38 }
0x15f3   :  { %v5695_v52 = vpop.eup %5694 }
0x15f4   :  { %v5697_v47 = vpop.eup %5696  ;;  %v3791_v17 = vmul.f32 %v5695_v52, %v3789_v19 }
0x15f5   :  { %v3790_v50 = vmul.f32 %v5697_v47, %v3788_v42 }
0x15f6   :  { %v7500_v62 = vadd.f32 %v3793_v4, %v3791_v17 }
0x15f7   :  { %v7502_v2 = vadd.f32 %v3792_v9, %v3790_v50 }
0x15f9   :  { %v5254_v7 = vpack.c.bf16 %v7500_v62, %v7502_v2 }
0x15fb   :  { %5255 = vmatprep.subr.bf16.mxu1 %v5254_v7 }
0x15fc   :  { %5257 = vmatpush3.bf16.msra.mxu1 %v5254_v7  ;;  %v3822_v7 = vmul.f32 %v3816_v26, %v6288_v61 }
0x15ff   :  { %5133 = vmatmul.mubr.msk.f32.vlgmr.msra.gmra.mrb[60].mxu1 %vm192_vm0, %v7269_v49 }
0x1600   :  { %5135 = vmatprep.mubr.msk.f32.mxu1 %vm192_vm0, %v7276_v32 }
0x1603   :  { %5136 = vmatmul.mubr.msk.f32.gmra.mrb[62].mxu1 %vm192_vm0, %v7283_v21 }
0x1604   :  { %5138 = vmatprep.mubr.msk.f32.mxu1 %vm192_vm0, %v7290_v53 }
0x1607   :  { %5139 = vmatmul.mubr.msk.f32.gmra.mrb[64].mxu1 %vm192_vm0, %v7297_v1 }
0x1608   :  { %5158 = vmatprep.mubr.msk.f32.mxu1 %vm192_vm0, %v7304_v20 }
0x16d2   :  { %v5134_v28 = vpop.f32.mrb[60].mxu1 }
0x16d3   :  { %v3901_v29 = vadd.f32 %v5134_v28, %v6121_v43  ;;  %v3895_v15 = vpop.f32.mrb[61].mxu1 }
0x16d4   :  { %v3896_v20 = vadd.f32 %v3895_v15, %v5953_v36  ;;  %v3827_v15 = vadd.f32 %v3821_v54, %v5971_v44 }
0x16d5   :  { %v3925_v13 = vadd.f32 %v3901_v29, %v3824_v56  ;;  %v3828_v56 = vadd.f32 %v3822_v7, %v6335_v57 }
0x16d6   :  { %v3924_v63 = vadd.f32 %v3896_v20, %v3823_v45  ;;  %v5137_v3 = vpop.f32.mrb[62].mxu1 }
0x16d7   :  { %v4637_v51 = vmul.f32 -1.442695, %v3925_v13  ;;  %v3911_v8 = vadd.f32 %v5137_v3, %v7748_v30  ;;  %v3905_v59 = vpop.f32.mrb[63].mxu1 }
0x16d8   :  { %v4636_v12 = vmul.f32 -1.442695, %v3924_v63  ;;  %v3906_v25 = vadd.f32 %v3905_v59, %v5959_v39 }
0x16d9   :  { %5698 = vpow2.f32 %v4637_v51  ;;  %v3939_v18 = vadd.f32 %v3911_v8, %v3826_v33 }
0x16da   :  { %5700 = vpow2.f32 %v4636_v12  ;;  %v3938_v16 = vadd.f32 %v3906_v25, %v3825_v10  ;;  %v5140_v6 = vpop.f32.mrb[64].mxu1 }
0x16db   :  { %v3915_v22 = vpop.f32.mrb[65].mxu1  ;;  %v4639_v60 = vmul.f32 -1.442695, %v3939_v18  ;;  %v3921_v31 = vadd.f32 %v5140_v6, %v6309_v55 }
0x16dc   :  { %v4638_v19 = vmul.f32 -1.442695, %v3938_v16  ;;  %v3916_v48 = vadd.f32 %v3915_v22, %v5963_v41 }
0x16dd   :  { %5702 = vpow2.f32 %v4639_v60 }
0x16de   :  { %5704 = vpow2.f32 %v4638_v19 }
0x16e3   :  { %v5699_v52 = vpop.eup %5698 }
0x16e4   :  { %v5701_v42 = vpop.eup %5700  ;;  %v3933_v47 = vadd.f32 1.0, %v5699_v52 }
0x16e5   :  { %v3932_v17 = vadd.f32 1.0, %v5701_v42 }
0x16e6   :  { %5706 = vrcp.f32 %v3933_v47 }
0x16e7   :  { %5708 = vrcp.f32 %v3932_v17  ;;  %v5703_v4 = vpop.eup %5702 }
0x16e8   :  { %v5705_v50 = vpop.eup %5704  ;;  %v3947_v9 = vadd.f32 1.0, %v5703_v4 }
0x16e9   :  { %v3946_v5 = vadd.f32 1.0, %v5705_v50 }
0x16ea   :  { %5710 = vrcp.f32 %v3947_v9 }
0x16eb   :  { %5712 = vrcp.f32 %v3946_v5 }
0x16f0   :  { %v5707_v24 = vpop.eup %5706 }
0x16f1   :  { %v5709_v28 = vpop.eup %5708  ;;  %v3953_v29 = vmul.f32 %v5707_v24, %v3921_v31 }
0x16f2   :  { %v3952_v23 = vmul.f32 %v5709_v28, %v3916_v48 }
0x16f3   :  { %v3955_v45 = vadd.f32 %v3953_v29, %v3828_v56 }
0x16f4   :  { %v3954_v20 = vadd.f32 %v3952_v23, %v3827_v15  ;;  %v5711_v46 = vpop.eup %5710 }
0x16f5   :  { %5714 = vtanh.f32 %v3955_v45  ;;  %v5713_v26 = vpop.eup %5712  ;;  %v3959_v13 = vsub.f32 1.0, %v5711_v46  ;;  %v3963_v8 = vmul.f32 %v5711_v46, %v7500_v62  ;;  %v7795_v62 = vld [vmem:[#allocation33_spill] sm:$0xff] }
0x16f6   :  { %5716 = vtanh.f32 %v3954_v20  ;;  %v3958_v3 = vsub.f32 1.0, %v5713_v26  ;;  %v3962_v12 = vmul.f32 %v5713_v26, %v7502_v2  ;;  %v7796_v2 = vld [vmem:[#allocation29_spill] sm:$0xff] }
0x16f7   :  { %v7797_v16 = vsub.f32 %v7795_v62, %v7796_v2 }
0x16f9   :  { %v3986_v6 = vrot.slane %v7797_v16, %v6135_v14 }
0x16fb   :  { %v3988_v22 = vmul.f32 %v3986_v6, %v5951_v35  ;;  %v3989_v42 = vmul.f32 %v3986_v6, %v5955_v37 }
0x16fd   :  { %v3995_v31 = vadd.f32 %v3989_v42, %v5957_v38 }
0x16ff   :  { %v5715_v63 = vpop.eup %5714 }
0x1700   :  { %v5717_v51 = vpop.eup %5716  ;;  %v3961_v33 = vmul.f32 %v5715_v63, %v3959_v13 }
0x1701   :  { %v3960_v59 = vmul.f32 %v5717_v51, %v3958_v3  ;;  %v3992_v51 = vmul.f32 %v3986_v6, %v6288_v61 }
0x1702   :  { %v7542_v10 = vadd.f32 %v3963_v8, %v3961_v33  ;;  %v3991_v8 = vmul.f32 %v3986_v6, %v5961_v40 }
0x1703   :  { %v7544_v25 = vadd.f32 %v3962_v12, %v3960_v59  ;;  %v3998_v2 = vadd.f32 %v3992_v51, %v6335_v57 }
0x1705   :  { %v5258_v18 = vpack.c.bf16 %v7542_v10, %v7544_v25 }
0x1707   :  { %5259 = vmatprep.subr.bf16.mxu0 %v5258_v18 }
0x1708   :  { %5261 = vmatpush3.bf16.msra.mxu0 %v5258_v18 }
0x170b   :  { %5146 = vmatmul.mubr.msk.f32.vlgmr.msra.gmra.mrb[66].mxu0 %vm192_vm0, %v7269_v49  ;;  %v3987_v49 = vmul.f32 %v3986_v6, %v5949_v34 }
0x170c   :  { %5148 = vmatprep.mubr.msk.f32.mxu0 %vm192_vm0, %v7276_v32  ;;  %v3994_v32 = vadd.f32 %v3988_v22, %v6093_v11  ;;  %v3997_v22 = vadd.f32 %v3991_v8, %v5971_v44 }
0x170d   :  { %v3993_v52 = vadd.f32 %v3987_v49, %v6069_v58 }
0x170f   :  { %5149 = vmatmul.mubr.msk.f32.gmra.mrb[68].mxu0 %vm192_vm0, %v7283_v21 }
0x1710   :  { %5151 = vmatprep.mubr.msk.f32.mxu0 %vm192_vm0, %v7290_v53  ;;  %v3990_v53 = vmul.f32 %v3986_v6, %v6155_v27 }
0x1712   :  { %v3996_v9 = vadd.f32 %v3990_v53, %v6194_v0 }
0x1713   :  { %5152 = vmatmul.mubr.msk.f32.gmra.mrb[70].mxu0 %vm192_vm0, %v7297_v1 }
0x17de   :  { %v5147_v60 = vpop.f32.mrb[66].mxu0 }
0x17df   :  { %v4071_v21 = vadd.f32 %v5147_v60, %v6121_v43  ;;  %v4065_v19 = vpop.f32.mrb[67].mxu0 }
0x17e0   :  { %v4066_v1 = vadd.f32 %v4065_v19, %v5953_v36 }
0x17e1   :  { %v4095_v47 = vadd.f32 %v4071_v21, %v3994_v32 }
0x17e2   :  { %v4094_v17 = vadd.f32 %v4066_v1, %v3993_v52  ;;  %v5150_v4 = vpop.f32.mrb[68].mxu0 }
0x17e3   :  { %v4647_v50 = vmul.f32 -1.442695, %v4095_v47  ;;  %v4081_v7 = vadd.f32 %v5150_v4, %v7748_v30  ;;  %v4075_v5 = vpop.f32.mrb[69].mxu0 }
0x17e4   :  { %v4646_v54 = vmul.f32 -1.442695, %v4094_v17  ;;  %v4076_v24 = vadd.f32 %v4075_v5, %v5959_v39  ;;  %v5777_v5 = vld [vmem:[%s7648_s4 + $0x8] sm:$0xff] }
0x17e5   :  { %5718 = vpow2.f32 %v4647_v50  ;;  %v4109_v48 = vadd.f32 %v4081_v7, %v3996_v9 }
0x17e6   :  { %5720 = vpow2.f32 %v4646_v54  ;;  %v4108_v28 = vadd.f32 %v4076_v24, %v3995_v31  ;;  %v5153_v56 = vpop.f32.mrb[70].mxu0  ;;  %v5780_v54 = vld [vmem:[%s7648_s4 + $0x20] sm:$0xff]  ;;  %v5781_v31 = vld [vmem:[%s7648_s4 + $0x28] sm:$0xff] }
0x17e7   :  { %v4085_v29 = vpop.f32.mrb[71].mxu0  ;;  %v4649_v15 = vmul.f32 -1.442695, %v4109_v48  ;;  %v4091_v59 = vadd.f32 %v5153_v56, %v6309_v55  ;;  %v4306_v24 = vld [vmem:[%s7656_s7] sm:$0xff]  ;;  %v7798_v48 = vld [vmem:[#allocation34_spill] sm:$0xff] }
0x17e8   :  { %v4648_v23 = vmul.f32 -1.442695, %v4108_v28  ;;  %v4086_v18 = vadd.f32 %v4085_v29, %v5963_v41  ;;  %5171 = vmatprep.mubr.msk.f32.mxu0 %vm192_vm0, %v4306_v24  ;;  %v7799_v28 = vld [vmem:[#allocation31_spill] sm:$0xff] }
0x17e9   :  { %5722 = vpow2.f32 %v4649_v15  ;;  %v7800_v56 = vsub.f32 %v7798_v48, %v7799_v28 }
0x17ea   :  { %5724 = vpow2.f32 %v4648_v23 }
0x17eb   :  { %v4156_v29 = vrot.slane %v7800_v56, %v6135_v14 }
0x17ed   :  { %v4158_v15 = vmul.f32 %v4156_v29, %v5951_v35  ;;  %v4157_v23 = vmul.f32 %v4156_v29, %v5949_v34  ;;  %v4159_v51 = vmul.f32 %v4156_v29, %v5955_v37 }
0x17ef   :  { %v5719_v45 = vpop.eup %5718 }
0x17f0   :  { %v5721_v20 = vpop.eup %5720  ;;  %v4103_v46 = vadd.f32 1.0, %v5719_v45 }
0x17f1   :  { %v4102_v26 = vadd.f32 1.0, %v5721_v20  ;;  %v4164_v20 = vadd.f32 %v4158_v15, %v6093_v11  ;;  %v4406_v15 = vrot.slane %v7799_v28, %v6135_v14 }
0x17f2   :  { %5726 = vrcp.f32 %v4103_v46 }
0x17f3   :  { %5728 = vrcp.f32 %v4102_v26  ;;  %v5723_v13 = vpop.eup %5722 }
0x17f4   :  { %v5725_v63 = vpop.eup %5724  ;;  %v4117_v3 = vadd.f32 1.0, %v5723_v13  ;;  %v4160_v13 = vmul.f32 %v4156_v29, %v6155_v27 }
0x17f5   :  { %v4116_v33 = vadd.f32 1.0, %v5725_v63  ;;  %v4163_v63 = vadd.f32 %v4157_v23, %v6069_v58  ;;  %v4318_v23 = vpop.permute.xlu0 %4317 }
0x17f6   :  { %5730 = vrcp.f32 %v4117_v3  ;;  %v4166_v34 = vadd.f32 %v4160_v13, %v6194_v0  ;;  %v4401_v13 = vld [vmem:[#allocation2] sm:$0xff] }
0x17f7   :  { %5732 = vrcp.f32 %v4116_v33 }
0x17fc   :  { %v5727_v12 = vpop.eup %5726 }
0x17fd   :  { %v5729_v62 = vpop.eup %5728  ;;  %v4123_v16 = vmul.f32 %v5727_v12, %v4091_v59 }
0x17fe   :  { %v4122_v49 = vmul.f32 %v5729_v62, %v4086_v18 }
0x17ff   :  { %v4125_v60 = vadd.f32 %v4123_v16, %v3998_v2 }
0x1800   :  { %v4124_v32 = vadd.f32 %v4122_v49, %v3997_v22  ;;  %v5731_v21 = vpop.eup %5730 }
0x1801   :  { %5734 = vtanh.f32 %v4125_v60  ;;  %v5733_v6 = vpop.eup %5732  ;;  %v4129_v19 = vsub.f32 1.0, %v5731_v21  ;;  %v4133_v47 = vmul.f32 %v5731_v21, %v7542_v10  ;;  %v5778_v10 = vld [vmem:[%s7648_s4 + $0x10] sm:$0xff] }
0x1802   :  { %5736 = vtanh.f32 %v4124_v32  ;;  %v4128_v52 = vsub.f32 1.0, %v5733_v6  ;;  %v4132_v4 = vmul.f32 %v5733_v6, %v7544_v25  ;;  %v5779_v25 = vld [vmem:[%s7648_s4 + $0x18] sm:$0xff]  ;;  %v4161_v6 = vmul.f32 %v4156_v29, %v5961_v40 }
0x180b   :  { %v5735_v53 = vpop.eup %5734 }
0x180c   :  { %v5737_v1 = vpop.eup %5736  ;;  %v4131_v42 = vmul.f32 %v5735_v53, %v4129_v19 }
0x180d   :  { %v4130_v17 = vmul.f32 %v5737_v1, %v4128_v52 }
0x180e   :  { %v7582_v50 = vadd.f32 %v4133_v47, %v4131_v42 }
0x180f   :  { %v7584_v9 = vadd.f32 %v4132_v4, %v4130_v17  ;;  %v4167_v17 = vadd.f32 %v4161_v6, %v5971_v44 }
0x1811   :  { %v5262_v7 = vpack.c.bf16 %v7582_v50, %v7584_v9 }
0x1813   :  { %5263 = vmatprep.subr.bf16.mxu1 %v5262_v7 }
0x1814   :  { %5265 = vmatpush3.bf16.msra.mxu1 %v5262_v7 }
0x1817   :  { %5159 = vmatmul.mubr.msk.f32.vlgmr.msra.gmra.mrb[66].mxu1 %vm192_vm0, %v5777_v5 }
0x1818   :  { %5161 = vmatprep.mubr.msk.f32.mxu1 %vm192_vm0, %v5778_v10 }
0x181b   :  { %5162 = vmatmul.mubr.msk.f32.gmra.mrb[68].mxu1 %vm192_vm0, %v5779_v25 }
0x181c   :  { %5164 = vmatprep.mubr.msk.f32.mxu1 %vm192_vm0, %v5780_v54 }
0x181f   :  { %5165 = vmatmul.mubr.msk.f32.gmra.mrb[70].mxu1 %vm192_vm0, %v5781_v31 }
0x18ea   :  { %v5160_v45 = vpop.f32.mrb[66].mxu1 }
0x18eb   :  { %v4241_v46 = vadd.f32 %v5160_v45, %v6121_v43  ;;  %v4235_v26 = vpop.f32.mrb[67].mxu1  ;;  %v4165_v43 = vadd.f32 %v4159_v51, %v5957_v38 }
0x18ec   :  { %v4236_v3 = vadd.f32 %v4235_v26, %v5953_v36 }
0x18ed   :  { %v4265_v33 = vadd.f32 %v4241_v46, %v4164_v20  ;;  %v4313_v20 = vpop.permute.xlu1 %4312 }
0x18ee   :  { %v4264_v8 = vadd.f32 %v4236_v3, %v4163_v63  ;;  %v5163_v59 = vpop.f32.mrb[68].mxu1  ;;  %v4407_v3 = vadd.f32 %v4406_v15, %v4401_v13 }
0x18ef   :  { %v4657_v35 = vmul.f32 -1.442695, %v4265_v33  ;;  %v4251_v12 = vadd.f32 %v5163_v59, %v7748_v30  ;;  %v4245_v11 = vpop.f32.mrb[69].mxu1 }
0x18f0   :  { %v4656_v18 = vmul.f32 -1.442695, %v4264_v8  ;;  %v4246_v27 = vadd.f32 %v4245_v11, %v5959_v39  ;;  %v4162_v39 = vmul.f32 %v4156_v29, %v6288_v61  ;;  %v4307_v29 = vld [vmem:[%s7656_s7 + $0x8] sm:$0xf] }
0x18f1   :  { %5738 = vpow2.f32 %v4657_v35  ;;  %v4279_v58 = vadd.f32 %v4251_v12, %v4166_v34 }
0x18f2   :  { %5740 = vpow2.f32 %v4656_v18  ;;  %v4278_v36 = vadd.f32 %v4246_v27, %v4165_v43  ;;  %v5166_v62 = vpop.f32.mrb[70].mxu1  ;;  %v4168_v42 = vadd.f32 %v4162_v39, %v6335_v57 }
0x18f3   :  { %v4255_v37 = vpop.f32.mrb[71].mxu1  ;;  %v4659_v2 = vmul.f32 -1.442695, %v4279_v58  ;;  %v4261_v19 = vadd.f32 %v5166_v62, %v6309_v55 }
0x18f4   :  { %v4658_v16 = vmul.f32 -1.442695, %v4278_v36  ;;  %v4256_v52 = vadd.f32 %v4255_v37, %v5963_v41 }
0x18f5   :  { %5742 = vpow2.f32 %v4659_v2 }
0x18f6   :  { %5744 = vpow2.f32 %v4658_v16 }
0x18fb   :  { %v5739_v22 = vpop.eup %5738 }
0x18fc   :  { %v5741_v0 = vpop.eup %5740  ;;  %v4273_v49 = vadd.f32 1.0, %v5739_v22 }
0x18fd   :  { %v4272_v30 = vadd.f32 1.0, %v5741_v0 }
0x18fe   :  { %5746 = vrcp.f32 %v4273_v49 }
0x18ff   :  { %5748 = vrcp.f32 %v4272_v30  ;;  %v5743_v60 = vpop.eup %5742 }
0x1900   :  { %v5745_v38 = vpop.eup %5744  ;;  %v4287_v32 = vadd.f32 1.0, %v5743_v60 }
0x1901   :  { %v4286_v21 = vadd.f32 1.0, %v5745_v38 }
0x1902   :  { %5750 = vrcp.f32 %v4287_v32 }
0x1903   :  { %5752 = vrcp.f32 %v4286_v21 }
0x1908   :  { %v5747_v53 = vpop.eup %5746 }
0x1909   :  { %v5749_v1 = vpop.eup %5748  ;;  %v4293_v47 = vmul.f32 %v5747_v53, %v4261_v19 }
0x190a   :  { %v4292_v4 = vmul.f32 %v5749_v1, %v4256_v52 }
0x190b   :  { %v4295_v7 = vadd.f32 %v4293_v47, %v4168_v42 }
0x190c   :  { %v4294_v5 = vadd.f32 %v4292_v4, %v4167_v17  ;;  %v5751_v61 = vpop.eup %5750 }
0x190d   :  { %5754 = vtanh.f32 %v4295_v7  ;;  %v5753_v40 = vpop.eup %5752  ;;  %v4299_v10 = vsub.f32 1.0, %v5751_v61  ;;  %v4303_v31 = vmul.f32 %v5751_v61, %v7582_v50  ;;  %v4402_v50 = vld [vmem:[#allocation2 + $0x8] sm:$0xf] }
0x190e   :  { %5756 = vtanh.f32 %v4294_v5  ;;  %v4298_v25 = vsub.f32 1.0, %v5753_v40  ;;  %v4302_v57 = vmul.f32 %v5753_v40, %v7584_v9  ;;  %v4408_v9 = vadd.f32 %v4406_v15, %v4402_v50 }
0x1917   :  { %v5755_v55 = vpop.eup %5754 }
0x1918   :  { %v5757_v54 = vpop.eup %5756  ;;  %v4301_v41 = vmul.f32 %v5755_v55, %v4299_v10 }
0x1919   :  { %v4300_v24 = vmul.f32 %v5757_v54, %v4298_v25 }
0x191a   :  { %v4305_v48 = vadd.f32 %v4303_v31, %v4301_v41 }
0x191b   :  { %v4304_v56 = vadd.f32 %v4302_v57, %v4300_v24 }
0x191d   :  { %v5266_v44 = vpack.c.bf16 %v4305_v48, %v4304_v56 }
0x191f   :  { %5267 = vmatprep.subr.bf16.mxu0 %v5266_v44 }
0x1920   :  { %5269 = vmatpush3.bf16.msra.mxu0 %v5266_v44 }
0x1923   :  { %5172 = vmatmul.mubr.msk.f32.vlgmr.msra.gmra.mrb[72].mxu0 %vm192_vm0, %v4307_v29 }
0x19f6   :  { %v5173_v45 = vpop.f32.mrb[72].mxu0 }
0x19f7   :  { %v4398_v46 = vadd.f32 %v5173_v45, %v4318_v23  ;;  %v4392_v26 = vpop.f32.mrb[73].mxu0 }
0x19f8   :  { %v4393_v63 = vadd.f32 %v4392_v26, %v4313_v20 }
0x19f9   :  { %v4410_v51 = vadd.f32 %v4408_v9, %v4398_v46 }
0x19fa   :  { %v4409_v33 = vadd.f32 %v4407_v3, %v4393_v63 }
0x19fb   :  { %4414 = vst.msk [vmem:[%s7657_s9 + $0x8] sm:$0xf] %vm4413_vm3, %v4410_v51 }
0x19fc   :  { %4412 = vst.msk [vmem:[%s7657_s9] sm:$0xff] %vm4411_vm4, %v4409_v33 }

</bundles_post_ra>
